<compile_context>
chip_gen: v7x
topology: tpu7x:2x2x1
jax: 0.10.0
libtpu: 0.0.40
codegen_flags: <defaults>
</compile_context>

<pallas_src>
import functools

import jax
import jax.numpy as jnp
from jax.experimental import pallas as pl
from jax.experimental.pallas import tpu as pltpu

KSIZE = 7
PAD = KSIZE // 2            # padding=3 in the PyTorch depthwise convs
_SQRT1_2 = 0.7071067811865476


def _erf(z):
    # Abramowitz & Stegun 7.1.26 polynomial erf, |err| <= 1.5e-7 (uses exp only,
    # which lowers cleanly in Mosaic; matches exact-erf GELU within fp32 noise).
    a1, a2, a3, a4, a5 = (0.254829592, -0.284496736, 1.421413741,
                          -1.453152027, 1.061405429)
    p = 0.3275911
    az = jnp.abs(z)
    t = 1.0 / (1.0 + p * az)
    poly = ((((a5 * t + a4) * t + a3) * t + a2) * t + a1) * t
    e = 1.0 - poly * jnp.exp(-az * az)
    return jnp.where(z >= 0.0, e, -e)


def _wemsub_kernel(x_ref, wcat_ref, taps_ref, masks_ref,
                   wm1_ref, bm1_ref, wm2_ref, bm2_ref,
                   wproj_ref, bproj_ref, alpha_ref,
                   out_ref, pad_ref, *, H, W, Cout):
    HW = H * W
    C2 = 2 * Cout
    HALO = (pad_ref.shape[1] - HW) // 2
    inv_hw = 1.0 / float(HW)

    # Zero only the halo strips; the interior is fully overwritten below.
    # (Cheap, and safe even when the batch grid axis is split across cores.)
    pad_ref[:, :HALO] = jnp.zeros((C2, HALO), jnp.float32)
    pad_ref[:, HALO + HW:] = jnp.zeros((C2, HALO), jnp.float32)

    xb = x_ref[0]                                   # (Cin, H*W), spatial on lanes

    # --- the three 1x1 convs as ONE MXU matmul: rows = [fc | wise_feat | gate]
    y = jnp.dot(wcat_ref[...], xb, preferred_element_type=jnp.float32)   # (3C, HW)

    x_fc = y[:Cout, :]
    alpha = alpha_ref[0, 0]                         # PReLU weight (SMEM scalar)
    wf_pre = y[Cout:2 * Cout, :]
    gate_pre = y[2 * Cout:, :]
    wf_act = jnp.where(wf_pre >= 0.0, wf_pre, alpha * wf_pre)   # PReLU
    gate_act = jnp.tanh(gate_pre)                               # Tanh

    # Stage both depthwise-conv inputs in the zero-halo scratch (aligned stores).
    pad_ref[:Cout, HALO:HALO + HW] = wf_act
    pad_ref[Cout:, HALO:HALO + HW] = gate_act

    # --- merged 7x7 depthwise conv for BOTH branches: 49 shifted MACs.
    # Vertical (H) padding = zero lane halo; horizontal (W) padding = per-kx mask.
    acc = jnp.zeros((C2, HW), jnp.float32)
    for kx in range(KSIZE):
        part = jnp.zeros((C2, HW), jnp.float32)
        for ky in range(KSIZE):
            d = (ky - PAD) * W + (kx - PAD)
            win = pad_ref[:, HALO + d:HALO + d + HW]            # (C2, HW) lane-dense
            t = ky * KSIZE + kx
            part = part + win * taps_ref[:, t:t + 1]            # per-channel tap
        acc = acc + part * masks_ref[kx:kx + 1, :]              # kill row wrap-around
    x_wf = acc[:Cout, :]
    x_gate = acc[Cout:, :]

    # --- global average pool of (x_fc + x_wf + x_gate) -> (Cout, 1)
    # single cross-lane reduce on the summed tensor (1 XLU reduce, not 3)
    f_sum = x_fc + x_wf + x_gate
    pooled = jnp.sum(f_sum, axis=1, keepdims=True) * inv_hw

    # --- reweight MLP (exact GELU via erf polynomial) + softmax over 3 branches
    h = jnp.dot(wm1_ref[...], pooled, preferred_element_type=jnp.float32) + bm1_ref[...]
    h = 0.5 * h * (1.0 + _erf(h * _SQRT1_2))
    r = jnp.dot(wm2_ref[...], h, preferred_element_type=jnp.float32) + bm2_ref[...]
    r0, r1, r2 = r[:Cout, :], r[Cout:2 * Cout, :], r[2 * Cout:, :]   # branch-major
    m = jnp.maximum(r0, jnp.maximum(r1, r2))
    e0 = jnp.exp(r0 - m)
    e1 = jnp.exp(r1 - m)
    e2 = jnp.exp(r2 - m)
    inv = 1.0 / (e0 + e1 + e2)

    # --- weighted branch combine + 1x1 projection; lane-dense (Cout, HW) store
    comb = (e0 * inv) * x_fc + (e1 * inv) * x_wf + (e2 * inv) * x_gate
    out = jnp.dot(wproj_ref[...], comb, preferred_element_type=jnp.float32) + bproj_ref[...]
    out_ref[0] = out


def _full(shape):
    nd = len(shape)
    return pl.BlockSpec(shape, lambda b: (0,) * nd)


@jax.jit
def wemsub_forward(x, params):
    """x: (B, Cin, H, W) float32 (NCHW, like PyTorch) -> (B, Cout, H, W)."""
    B, Cin, H, W = x.shape
    Cout = params["w_fc"].shape[0]
    hid = params["w_mlp1"].shape[0]
    C2, C3 = 2 * Cout, 3 * Cout
    HW = H * W
    HALO = -(-(PAD * W + PAD) // 128) * 128          # lane halo >= 3*W+3, 128-aligned
    LANES = 2 * HALO + HW

    x_flat = x.reshape(B, Cin, HW)

    # One fused weight for the three 1x1 convs (rows: [fc | wise_features | gate]).
    w_cat = jnp.concatenate(
        [params["w_fc"], params["w_wf1"], params["w_gate1"]], axis=0)        # (3C, Cin)
    # Merged depthwise taps: channels on rows ([wf | gate]), 49 taps on columns.
    taps = jnp.concatenate([params["w_wf_dw"], params["w_gate_dw"]], axis=0)  # (2C, 49)
    # Horizontal zero-padding masks for the flattened H*W layout, one per kx.
    w_idx = jnp.arange(HW, dtype=jnp.int32) % W
    shift = w_idx[None, :] + (jnp.arange(KSIZE, dtype=jnp.int32)[:, None] - PAD)
    masks = ((shift >= 0) & (shift < W)).astype(jnp.float32)                  # (7, HW)
    # Reweight-MLP fc2 rows permuted to branch-major [fc | wf | gate] blocks so the
    # in-kernel softmax over branches is plain (aligned) sublane slicing.
    j = jnp.arange(C3)
    perm = (j % Cout) * 3 + j // Cout
    w_mlp2p = params["w_mlp2"][perm, :]
    b_mlp2p = params["b_mlp2"][perm][:, None]
    b_mlp1 = params["b_mlp1"][:, None]
    b_proj = params["b_proj"][:, None]
    alpha = params["prelu_alpha"].reshape(1, 1)

    kernel = functools.partial(_wemsub_kernel, H=H, W=W, Cout=Cout)
    out_flat = pl.pallas_call(
        kernel,
        out_shape=jax.ShapeDtypeStruct((B, Cout, HW), jnp.float32),
        grid_spec=pltpu.PrefetchScalarGridSpec(
            num_scalar_prefetch=0,
            grid=(B,),
            in_specs=[
                pl.BlockSpec((1, Cin, HW), lambda b: (b, 0, 0)),    # x (per batch)
                _full((C3, Cin)),                                   # fused 1x1 weights
                _full((C2, KSIZE * KSIZE)),                         # merged dw taps
                _full((KSIZE, HW)),                                 # per-kx edge masks
                _full((hid, Cout)),                                 # reweight fc1 W
                _full((hid, 1)),                                    # reweight fc1 b
                _full((C3, hid)),                                   # reweight fc2 W (perm)
                _full((C3, 1)),                                     # reweight fc2 b (perm)
                _full((Cout, Cout)),                                # proj W
                _full((Cout, 1)),                                   # proj b
                pl.BlockSpec(memory_space=pltpu.MemorySpace.SMEM),  # PReLU alpha
            ],
            out_specs=pl.BlockSpec((1, Cout, HW), lambda b: (b, 0, 0)),
            scratch_shapes=[pltpu.VMEM((C2, LANES), jnp.float32)],
        ),
        compiler_params=pltpu.CompilerParams(
            dimension_semantics=("parallel",)),
    )(x_flat, w_cat, taps, masks, params["w_mlp1"], b_mlp1,
      w_mlp2p, b_mlp2p, params["w_proj"], b_proj, alpha)

    return out_flat.reshape(B, Cout, H, W)


# ----------------------------------------------------------------------------
# deterministic parameter init (shapes from WEMsub.__init__; bias=False except
# the reweight Mlp & proj which use bias=True; PReLU alpha = 0.25 default)
# ----------------------------------------------------------------------------
def init_params(key, cin, cout):
    ks = jax.random.split(key, 11)
    hid = max(cout // 4, 1)

    def w(k, shape, scale=0.1):
        return scale * jax.random.normal(k, shape, dtype=jnp.float32)

    return dict(
        w_fc=w(ks[0], (cout, cin)),                       # fc: Conv2d(Cin,Cout,1)
        w_gate1=w(ks[1], (cout, cin)),                    # gate[0]
        w_gate_dw=w(ks[2], (cout, KSIZE * KSIZE)),        # gate[2]: depthwise 7x7
        w_wf1=w(ks[3], (cout, cin)),                      # wise_features[0]
        w_wf_dw=w(ks[4], (cout, KSIZE * KSIZE)),          # wise_features[2]
        prelu_alpha=jnp.full((1, 1), 0.25, jnp.float32),  # nn.PReLU() default
        w_mlp1=w(ks[5], (hid, cout)),                     # reweight.fc1 (bias=True)
        b_mlp1=w(ks[6], (hid,)),
        w_mlp2=w(ks[7], (3 * cout, hid)),                 # reweight.fc2 (bias=True)
        b_mlp2=w(ks[8], (3 * cout,)),
        w_proj=w(ks[9], (cout, cout)),                    # proj (bias=True)
        b_proj=w(ks[10], (cout,)),
    )


# ----------------------------------------------------------------------------
# pure-JAX NCHW reference (mirrors the PyTorch module) for correctness check
# ----------------------------------------------------------------------------
def reference_forward(x, p):
    B, Cin, H, W = x.shape
    Cout = p["w_fc"].shape[0]
    hi = jax.lax.Precision.HIGHEST

    def conv1x1(v, wmat):
        return jnp.einsum("bihw,oi->bohw", v, wmat, precision=hi)

    def dwconv(v, wdw):
        c = v.shape[1]
        k = wdw.reshape(c, 1, KSIZE, KSIZE)
        return jax.lax.conv_general_dilated(
            v, k, window_strides=(1, 1), padding="SAME",
            dimension_numbers=("NCHW", "OIHW", "NCHW"),
            feature_group_count=c, precision=hi)

    x_fc = conv1x1(x, p["w_fc"])
    x_gate = dwconv(jnp.tanh(conv1x1(x, p["w_gate1"])), p["w_gate_dw"])
    t = conv1x1(x, p["w_wf1"])
    a = p["prelu_alpha"][0, 0]
    t = jnp.where(t >= 0.0, t, a * t)
    x_wf = dwconv(t, p["w_wf_dw"])

    f = x_fc + x_wf + x_gate
    pooled = jnp.mean(f, axis=(2, 3))                                  # (B, C)
    h = jax.nn.gelu(pooled @ p["w_mlp1"].T + p["b_mlp1"], approximate=False)
    r = h @ p["w_mlp2"].T + p["b_mlp2"]                                # (B, 3C)
    wts = jax.nn.softmax(r.reshape(B, Cout, 3), axis=-1)               # (B, C, 3)
    y = (wts[..., 0][:, :, None, None] * x_fc
         + wts[..., 1][:, :, None, None] * x_wf
         + wts[..., 2][:, :, None, None] * x_gate)
    y = conv1x1(y, p["w_proj"]) + p["b_proj"][None, :, None, None]
    return y


if __name__ == "__main__":
    B, Cin, Cout, H, W = 2, 4, 8, 16, 16
    key = jax.random.PRNGKey(0)
    kx_, kp_ = jax.random.split(key)
    x = jax.random.normal(kx_, (B, Cin, H, W), dtype=jnp.float32)   # NCHW like PyTorch
    params = init_params(kp_, Cin, Cout)

    out = jax.block_until_ready(wemsub_forward(x, params))
    ref = jax.block_until_ready(reference_forward(x, params))

    assert out.shape == (B, Cout, H, W), out.shape
    max_err = float(jnp.max(jnp.abs(out - ref)))
    if not bool(jnp.allclose(out, ref, atol=1e-2, rtol=1e-2)):
        raise AssertionError(f"Pallas output mismatch vs reference, max abs err = {max_err}")
    print("KERNEL_OK")
</pallas_src>

<mosaic_0001>
module attributes {stable_mosaic.version = 11 : i64} {
  func.func @_wemsub_kernel(%arg0: i32, %arg1: memref<1x4x256xf32, #tpu.memory_space<vmem>>, %arg2: memref<24x4xf32, #tpu.memory_space<vmem>>, %arg3: memref<16x49xf32, #tpu.memory_space<vmem>>, %arg4: memref<7x256xf32, #tpu.memory_space<vmem>>, %arg5: memref<2x8xf32, #tpu.memory_space<vmem>>, %arg6: memref<2x1xf32, #tpu.memory_space<vmem>>, %arg7: memref<24x2xf32, #tpu.memory_space<vmem>>, %arg8: memref<24x1xf32, #tpu.memory_space<vmem>>, %arg9: memref<8x8xf32, #tpu.memory_space<vmem>>, %arg10: memref<8x1xf32, #tpu.memory_space<vmem>>, %arg11: memref<1x1xf32, #tpu.memory_space<smem>>, %arg12: memref<1x8x256xf32, #tpu.memory_space<vmem>>, %arg13: memref<16x512xf32, #tpu.memory_space<vmem>>) attributes {dimension_semantics = [#tpu.dimension_semantics<parallel>], iteration_bounds = array<i64: 2>, scalar_prefetch = 0 : i64, scratch_operands = 1 : i64, tpu.core_type = #tpu.core_type<tc>, window_params = [{transform_indices = @transform_0, window_bounds = array<i64: 1, 4, 256>}, {pipeline_mode = #tpu.pipeline_mode<synchronous>, transform_indices = @transform_1, window_bounds = array<i64: 24, 4>}, {pipeline_mode = #tpu.pipeline_mode<synchronous>, transform_indices = @transform_2, window_bounds = array<i64: 16, 49>}, {pipeline_mode = #tpu.pipeline_mode<synchronous>, transform_indices = @transform_3, window_bounds = array<i64: 7, 256>}, {pipeline_mode = #tpu.pipeline_mode<synchronous>, transform_indices = @transform_4, window_bounds = array<i64: 2, 8>}, {pipeline_mode = #tpu.pipeline_mode<synchronous>, transform_indices = @transform_5, window_bounds = array<i64: 2, 1>}, {pipeline_mode = #tpu.pipeline_mode<synchronous>, transform_indices = @transform_6, window_bounds = array<i64: 24, 2>}, {pipeline_mode = #tpu.pipeline_mode<synchronous>, transform_indices = @transform_7, window_bounds = array<i64: 24, 1>}, {pipeline_mode = #tpu.pipeline_mode<synchronous>, transform_indices = @transform_8, window_bounds = array<i64: 8, 8>}, {pipeline_mode = #tpu.pipeline_mode<synchronous>, transform_indices = @transform_9, window_bounds = array<i64: 8, 1>}, {transform_indices = @transform_10, window_bounds = array<i64: 1, 1>}, {transform_indices = @transform_11, window_bounds = array<i64: 1, 8, 256>}]} {
    %cst = arith.constant 0.000000e+00 : f32
    %0 = vector.broadcast %cst : f32 to vector<16x128xf32>
    %c0 = arith.constant 0 : index
    %c0_0 = arith.constant 0 : index
    %1 = vector.load %arg13[%c0, %c0_0] : memref<16x512xf32, #tpu.memory_space<vmem>>, vector<16x128xf32>
    tpu.vector_store %arg13[%c0, %c0_0], %0 {strides = array<i32>} : memref<16x512xf32, #tpu.memory_space<vmem>>, vector<16x128xf32>,
    %cst_1 = arith.constant 0.000000e+00 : f32
    %2 = vector.broadcast %cst_1 : f32 to vector<16x128xf32>
    %c0_2 = arith.constant 0 : index
    %c384 = arith.constant 384 : index
    %3 = vector.load %arg13[%c0_2, %c384] : memref<16x512xf32, #tpu.memory_space<vmem>>, vector<16x128xf32>
    tpu.vector_store %arg13[%c0_2, %c384], %2 {strides = array<i32>} : memref<16x512xf32, #tpu.memory_space<vmem>>, vector<16x128xf32>,
    %c0_3 = arith.constant 0 : index
    %c0_4 = arith.constant 0 : index
    %c0_5 = arith.constant 0 : index
    %4 = vector.load %arg1[%c0_3, %c0_4, %c0_5] : memref<1x4x256xf32, #tpu.memory_space<vmem>>, vector<1x4x256xf32>
    %5 = vector.shape_cast %4 : vector<1x4x256xf32> to vector<4x256xf32>
    %c0_6 = arith.constant 0 : index
    %c0_7 = arith.constant 0 : index
    %6 = vector.load %arg2[%c0_6, %c0_7] : memref<24x4xf32, #tpu.memory_space<vmem>>, vector<24x4xf32>
    %cst_8 = arith.constant dense<0.000000e+00> : vector<24x256xf32>
    %7 = tpu.matmul %6, %5, %cst_8 {dimension_numbers = #tpu.dot_dimension_numbers<[1], [0], [0], [1], [0, 0, 1, 1], [], []>} : vector<24x4xf32>, vector<4x256xf32>, vector<24x256xf32> -> vector<24x256xf32>
    %8 = vector.extract_strided_slice %7 {offsets = [0, 0], sizes = [8, 256], strides = [1, 1]} : vector<24x256xf32> to vector<8x256xf32>
    %c0_9 = arith.constant 0 : index
    %c0_10 = arith.constant 0 : index
    %9 = memref.load %arg11[%c0_9, %c0_10] : memref<1x1xf32, #tpu.memory_space<smem>>
    %10 = vector.extract_strided_slice %7 {offsets = [8, 0], sizes = [8, 256], strides = [1, 1]} : vector<24x256xf32> to vector<8x256xf32>
    %11 = vector.extract_strided_slice %7 {offsets = [16, 0], sizes = [8, 256], strides = [1, 1]} : vector<24x256xf32> to vector<8x256xf32>
    %cst_11 = arith.constant 0.000000e+00 : f32
    %12 = vector.broadcast %cst_11 : f32 to vector<8x256xf32>
    %13 = arith.cmpf oge, %10, %12 : vector<8x256xf32>
    %14 = vector.broadcast %9 : f32 to vector<8x256xf32>
    %15 = arith.mulf %14, %10 : vector<8x256xf32>
    %16 = arith.select %13, %10, %15 : vector<8x256xi1>, vector<8x256xf32>
    %17 = math.tanh %11 : vector<8x256xf32>
    %c0_12 = arith.constant 0 : index
    %c128 = arith.constant 128 : index
    %18 = vector.load %arg13[%c0_12, %c128] : memref<16x512xf32, #tpu.memory_space<vmem>>, vector<8x256xf32>
    tpu.vector_store %arg13[%c0_12, %c128], %16 {strides = array<i32>} : memref<16x512xf32, #tpu.memory_space<vmem>>, vector<8x256xf32>,
    %c8 = arith.constant 8 : index
    %c128_13 = arith.constant 128 : index
    %19 = vector.load %arg13[%c8, %c128_13] : memref<16x512xf32, #tpu.memory_space<vmem>>, vector<8x256xf32>
    tpu.vector_store %arg13[%c8, %c128_13], %17 {strides = array<i32>} : memref<16x512xf32, #tpu.memory_space<vmem>>, vector<8x256xf32>,
    %cst_14 = arith.constant 0.000000e+00 : f32
    %20 = vector.broadcast %cst_14 : f32 to vector<16x256xf32>
    %cst_15 = arith.constant 0.000000e+00 : f32
    %21 = vector.broadcast %cst_15 : f32 to vector<16x256xf32>
    %c0_16 = arith.constant 0 : index
    %c77 = arith.constant 77 : index
    %22 = vector.load %arg13[%c0_16, %c77] : memref<16x512xf32, #tpu.memory_space<vmem>>, vector<16x256xf32>
    %c0_17 = arith.constant 0 : index
    %c0_18 = arith.constant 0 : index
    %23 = vector.load %arg3[%c0_17, %c0_18] : memref<16x49xf32, #tpu.memory_space<vmem>>, vector<16x1xf32>
    %24 = vector.broadcast %23 : vector<16x1xf32> to vector<16x256xf32>
    %25 = arith.mulf %22, %24 : vector<16x256xf32>
    %26 = arith.addf %21, %25 : vector<16x256xf32>
    %c0_19 = arith.constant 0 : index
    %c93 = arith.constant 93 : index
    %27 = vector.load %arg13[%c0_19, %c93] : memref<16x512xf32, #tpu.memory_space<vmem>>, vector<16x256xf32>
    %c0_20 = arith.constant 0 : index
    %c7 = arith.constant 7 : index
    %28 = vector.load %arg3[%c0_20, %c7] : memref<16x49xf32, #tpu.memory_space<vmem>>, vector<16x1xf32>
    %29 = vector.broadcast %28 : vector<16x1xf32> to vector<16x256xf32>
    %30 = arith.mulf %27, %29 : vector<16x256xf32>
    %31 = arith.addf %26, %30 : vector<16x256xf32>
    %c0_21 = arith.constant 0 : index
    %c109 = arith.constant 109 : index
    %32 = vector.load %arg13[%c0_21, %c109] : memref<16x512xf32, #tpu.memory_space<vmem>>, vector<16x256xf32>
    %c0_22 = arith.constant 0 : index
    %c14 = arith.constant 14 : index
    %33 = vector.load %arg3[%c0_22, %c14] : memref<16x49xf32, #tpu.memory_space<vmem>>, vector<16x1xf32>
    %34 = vector.broadcast %33 : vector<16x1xf32> to vector<16x256xf32>
    %35 = arith.mulf %32, %34 : vector<16x256xf32>
    %36 = arith.addf %31, %35 : vector<16x256xf32>
    %c0_23 = arith.constant 0 : index
    %c125 = arith.constant 125 : index
    %37 = vector.load %arg13[%c0_23, %c125] : memref<16x512xf32, #tpu.memory_space<vmem>>, vector<16x256xf32>
    %c0_24 = arith.constant 0 : index
    %c21 = arith.constant 21 : index
    %38 = vector.load %arg3[%c0_24, %c21] : memref<16x49xf32, #tpu.memory_space<vmem>>, vector<16x1xf32>
    %39 = vector.broadcast %38 : vector<16x1xf32> to vector<16x256xf32>
    %40 = arith.mulf %37, %39 : vector<16x256xf32>
    %41 = arith.addf %36, %40 : vector<16x256xf32>
    %c0_25 = arith.constant 0 : index
    %c141 = arith.constant 141 : index
    %42 = vector.load %arg13[%c0_25, %c141] : memref<16x512xf32, #tpu.memory_space<vmem>>, vector<16x256xf32>
    %c0_26 = arith.constant 0 : index
    %c28 = arith.constant 28 : index
    %43 = vector.load %arg3[%c0_26, %c28] : memref<16x49xf32, #tpu.memory_space<vmem>>, vector<16x1xf32>
    %44 = vector.broadcast %43 : vector<16x1xf32> to vector<16x256xf32>
    %45 = arith.mulf %42, %44 : vector<16x256xf32>
    %46 = arith.addf %41, %45 : vector<16x256xf32>
    %c0_27 = arith.constant 0 : index
    %c157 = arith.constant 157 : index
    %47 = vector.load %arg13[%c0_27, %c157] : memref<16x512xf32, #tpu.memory_space<vmem>>, vector<16x256xf32>
    %c0_28 = arith.constant 0 : index
    %c35 = arith.constant 35 : index
    %48 = vector.load %arg3[%c0_28, %c35] : memref<16x49xf32, #tpu.memory_space<vmem>>, vector<16x1xf32>
    %49 = vector.broadcast %48 : vector<16x1xf32> to vector<16x256xf32>
    %50 = arith.mulf %47, %49 : vector<16x256xf32>
    %51 = arith.addf %46, %50 : vector<16x256xf32>
    %c0_29 = arith.constant 0 : index
    %c173 = arith.constant 173 : index
    %52 = vector.load %arg13[%c0_29, %c173] : memref<16x512xf32, #tpu.memory_space<vmem>>, vector<16x256xf32>
    %c0_30 = arith.constant 0 : index
    %c42 = arith.constant 42 : index
    %53 = vector.load %arg3[%c0_30, %c42] : memref<16x49xf32, #tpu.memory_space<vmem>>, vector<16x1xf32>
    %54 = vector.broadcast %53 : vector<16x1xf32> to vector<16x256xf32>
    %55 = arith.mulf %52, %54 : vector<16x256xf32>
    %56 = arith.addf %51, %55 : vector<16x256xf32>
    %c0_31 = arith.constant 0 : index
    %c0_32 = arith.constant 0 : index
    %57 = vector.load %arg4[%c0_31, %c0_32] : memref<7x256xf32, #tpu.memory_space<vmem>>, vector<1x256xf32>
    %58 = vector.broadcast %57 : vector<1x256xf32> to vector<16x256xf32>
    %59 = arith.mulf %56, %58 : vector<16x256xf32>
    %60 = arith.addf %20, %59 : vector<16x256xf32>
    %cst_33 = arith.constant 0.000000e+00 : f32
    %61 = vector.broadcast %cst_33 : f32 to vector<16x256xf32>
    %c0_34 = arith.constant 0 : index
    %c78 = arith.constant 78 : index
    %62 = vector.load %arg13[%c0_34, %c78] : memref<16x512xf32, #tpu.memory_space<vmem>>, vector<16x256xf32>
    %c0_35 = arith.constant 0 : index
    %c1 = arith.constant 1 : index
    %63 = vector.load %arg3[%c0_35, %c1] : memref<16x49xf32, #tpu.memory_space<vmem>>, vector<16x1xf32>
    %64 = vector.broadcast %63 : vector<16x1xf32> to vector<16x256xf32>
    %65 = arith.mulf %62, %64 : vector<16x256xf32>
    %66 = arith.addf %61, %65 : vector<16x256xf32>
    %c0_36 = arith.constant 0 : index
    %c94 = arith.constant 94 : index
    %67 = vector.load %arg13[%c0_36, %c94] : memref<16x512xf32, #tpu.memory_space<vmem>>, vector<16x256xf32>
    %c0_37 = arith.constant 0 : index
    %c8_38 = arith.constant 8 : index
    %68 = vector.load %arg3[%c0_37, %c8_38] : memref<16x49xf32, #tpu.memory_space<vmem>>, vector<16x1xf32>
    %69 = vector.broadcast %68 : vector<16x1xf32> to vector<16x256xf32>
    %70 = arith.mulf %67, %69 : vector<16x256xf32>
    %71 = arith.addf %66, %70 : vector<16x256xf32>
    %c0_39 = arith.constant 0 : index
    %c110 = arith.constant 110 : index
    %72 = vector.load %arg13[%c0_39, %c110] : memref<16x512xf32, #tpu.memory_space<vmem>>, vector<16x256xf32>
    %c0_40 = arith.constant 0 : index
    %c15 = arith.constant 15 : index
    %73 = vector.load %arg3[%c0_40, %c15] : memref<16x49xf32, #tpu.memory_space<vmem>>, vector<16x1xf32>
    %74 = vector.broadcast %73 : vector<16x1xf32> to vector<16x256xf32>
    %75 = arith.mulf %72, %74 : vector<16x256xf32>
    %76 = arith.addf %71, %75 : vector<16x256xf32>
    %c0_41 = arith.constant 0 : index
    %c126 = arith.constant 126 : index
    %77 = vector.load %arg13[%c0_41, %c126] : memref<16x512xf32, #tpu.memory_space<vmem>>, vector<16x256xf32>
    %c0_42 = arith.constant 0 : index
    %c22 = arith.constant 22 : index
    %78 = vector.load %arg3[%c0_42, %c22] : memref<16x49xf32, #tpu.memory_space<vmem>>, vector<16x1xf32>
    %79 = vector.broadcast %78 : vector<16x1xf32> to vector<16x256xf32>
    %80 = arith.mulf %77, %79 : vector<16x256xf32>
    %81 = arith.addf %76, %80 : vector<16x256xf32>
    %c0_43 = arith.constant 0 : index
    %c142 = arith.constant 142 : index
    %82 = vector.load %arg13[%c0_43, %c142] : memref<16x512xf32, #tpu.memory_space<vmem>>, vector<16x256xf32>
    %c0_44 = arith.constant 0 : index
    %c29 = arith.constant 29 : index
    %83 = vector.load %arg3[%c0_44, %c29] : memref<16x49xf32, #tpu.memory_space<vmem>>, vector<16x1xf32>
    %84 = vector.broadcast %83 : vector<16x1xf32> to vector<16x256xf32>
    %85 = arith.mulf %82, %84 : vector<16x256xf32>
    %86 = arith.addf %81, %85 : vector<16x256xf32>
    %c0_45 = arith.constant 0 : index
    %c158 = arith.constant 158 : index
    %87 = vector.load %arg13[%c0_45, %c158] : memref<16x512xf32, #tpu.memory_space<vmem>>, vector<16x256xf32>
    %c0_46 = arith.constant 0 : index
    %c36 = arith.constant 36 : index
    %88 = vector.load %arg3[%c0_46, %c36] : memref<16x49xf32, #tpu.memory_space<vmem>>, vector<16x1xf32>
    %89 = vector.broadcast %88 : vector<16x1xf32> to vector<16x256xf32>
    %90 = arith.mulf %87, %89 : vector<16x256xf32>
    %91 = arith.addf %86, %90 : vector<16x256xf32>
    %c0_47 = arith.constant 0 : index
    %c174 = arith.constant 174 : index
    %92 = vector.load %arg13[%c0_47, %c174] : memref<16x512xf32, #tpu.memory_space<vmem>>, vector<16x256xf32>
    %c0_48 = arith.constant 0 : index
    %c43 = arith.constant 43 : index
    %93 = vector.load %arg3[%c0_48, %c43] : memref<16x49xf32, #tpu.memory_space<vmem>>, vector<16x1xf32>
    %94 = vector.broadcast %93 : vector<16x1xf32> to vector<16x256xf32>
    %95 = arith.mulf %92, %94 : vector<16x256xf32>
    %96 = arith.addf %91, %95 : vector<16x256xf32>
    %c1_49 = arith.constant 1 : index
    %c0_50 = arith.constant 0 : index
    %97 = vector.load %arg4[%c1_49, %c0_50] : memref<7x256xf32, #tpu.memory_space<vmem>>, vector<1x256xf32>
    %98 = vector.broadcast %97 : vector<1x256xf32> to vector<16x256xf32>
    %99 = arith.mulf %96, %98 : vector<16x256xf32>
    %100 = arith.addf %60, %99 : vector<16x256xf32>
    %cst_51 = arith.constant 0.000000e+00 : f32
    %101 = vector.broadcast %cst_51 : f32 to vector<16x256xf32>
    %c0_52 = arith.constant 0 : index
    %c79 = arith.constant 79 : index
    %102 = vector.load %arg13[%c0_52, %c79] : memref<16x512xf32, #tpu.memory_space<vmem>>, vector<16x256xf32>
    %c0_53 = arith.constant 0 : index
    %c2 = arith.constant 2 : index
    %103 = vector.load %arg3[%c0_53, %c2] : memref<16x49xf32, #tpu.memory_space<vmem>>, vector<16x1xf32>
    %104 = vector.broadcast %103 : vector<16x1xf32> to vector<16x256xf32>
    %105 = arith.mulf %102, %104 : vector<16x256xf32>
    %106 = arith.addf %101, %105 : vector<16x256xf32>
    %c0_54 = arith.constant 0 : index
    %c95 = arith.constant 95 : index
    %107 = vector.load %arg13[%c0_54, %c95] : memref<16x512xf32, #tpu.memory_space<vmem>>, vector<16x256xf32>
    %c0_55 = arith.constant 0 : index
    %c9 = arith.constant 9 : index
    %108 = vector.load %arg3[%c0_55, %c9] : memref<16x49xf32, #tpu.memory_space<vmem>>, vector<16x1xf32>
    %109 = vector.broadcast %108 : vector<16x1xf32> to vector<16x256xf32>
    %110 = arith.mulf %107, %109 : vector<16x256xf32>
    %111 = arith.addf %106, %110 : vector<16x256xf32>
    %c0_56 = arith.constant 0 : index
    %c111 = arith.constant 111 : index
    %112 = vector.load %arg13[%c0_56, %c111] : memref<16x512xf32, #tpu.memory_space<vmem>>, vector<16x256xf32>
    %c0_57 = arith.constant 0 : index
    %c16 = arith.constant 16 : index
    %113 = vector.load %arg3[%c0_57, %c16] : memref<16x49xf32, #tpu.memory_space<vmem>>, vector<16x1xf32>
    %114 = vector.broadcast %113 : vector<16x1xf32> to vector<16x256xf32>
    %115 = arith.mulf %112, %114 : vector<16x256xf32>
    %116 = arith.addf %111, %115 : vector<16x256xf32>
    %c0_58 = arith.constant 0 : index
    %c127 = arith.constant 127 : index
    %117 = vector.load %arg13[%c0_58, %c127] : memref<16x512xf32, #tpu.memory_space<vmem>>, vector<16x256xf32>
    %c0_59 = arith.constant 0 : index
    %c23 = arith.constant 23 : index
    %118 = vector.load %arg3[%c0_59, %c23] : memref<16x49xf32, #tpu.memory_space<vmem>>, vector<16x1xf32>
    %119 = vector.broadcast %118 : vector<16x1xf32> to vector<16x256xf32>
    %120 = arith.mulf %117, %119 : vector<16x256xf32>
    %121 = arith.addf %116, %120 : vector<16x256xf32>
    %c0_60 = arith.constant 0 : index
    %c143 = arith.constant 143 : index
    %122 = vector.load %arg13[%c0_60, %c143] : memref<16x512xf32, #tpu.memory_space<vmem>>, vector<16x256xf32>
    %c0_61 = arith.constant 0 : index
    %c30 = arith.constant 30 : index
    %123 = vector.load %arg3[%c0_61, %c30] : memref<16x49xf32, #tpu.memory_space<vmem>>, vector<16x1xf32>
    %124 = vector.broadcast %123 : vector<16x1xf32> to vector<16x256xf32>
    %125 = arith.mulf %122, %124 : vector<16x256xf32>
    %126 = arith.addf %121, %125 : vector<16x256xf32>
    %c0_62 = arith.constant 0 : index
    %c159 = arith.constant 159 : index
    %127 = vector.load %arg13[%c0_62, %c159] : memref<16x512xf32, #tpu.memory_space<vmem>>, vector<16x256xf32>
    %c0_63 = arith.constant 0 : index
    %c37 = arith.constant 37 : index
    %128 = vector.load %arg3[%c0_63, %c37] : memref<16x49xf32, #tpu.memory_space<vmem>>, vector<16x1xf32>
    %129 = vector.broadcast %128 : vector<16x1xf32> to vector<16x256xf32>
    %130 = arith.mulf %127, %129 : vector<16x256xf32>
    %131 = arith.addf %126, %130 : vector<16x256xf32>
    %c0_64 = arith.constant 0 : index
    %c175 = arith.constant 175 : index
    %132 = vector.load %arg13[%c0_64, %c175] : memref<16x512xf32, #tpu.memory_space<vmem>>, vector<16x256xf32>
    %c0_65 = arith.constant 0 : index
    %c44 = arith.constant 44 : index
    %133 = vector.load %arg3[%c0_65, %c44] : memref<16x49xf32, #tpu.memory_space<vmem>>, vector<16x1xf32>
    %134 = vector.broadcast %133 : vector<16x1xf32> to vector<16x256xf32>
    %135 = arith.mulf %132, %134 : vector<16x256xf32>
    %136 = arith.addf %131, %135 : vector<16x256xf32>
    %c2_66 = arith.constant 2 : index
    %c0_67 = arith.constant 0 : index
    %137 = vector.load %arg4[%c2_66, %c0_67] : memref<7x256xf32, #tpu.memory_space<vmem>>, vector<1x256xf32>
    %138 = vector.broadcast %137 : vector<1x256xf32> to vector<16x256xf32>
    %139 = arith.mulf %136, %138 : vector<16x256xf32>
    %140 = arith.addf %100, %139 : vector<16x256xf32>
    %cst_68 = arith.constant 0.000000e+00 : f32
    %141 = vector.broadcast %cst_68 : f32 to vector<16x256xf32>
    %c0_69 = arith.constant 0 : index
    %c80 = arith.constant 80 : index
    %142 = vector.load %arg13[%c0_69, %c80] : memref<16x512xf32, #tpu.memory_space<vmem>>, vector<16x256xf32>
    %c0_70 = arith.constant 0 : index
    %c3 = arith.constant 3 : index
    %143 = vector.load %arg3[%c0_70, %c3] : memref<16x49xf32, #tpu.memory_space<vmem>>, vector<16x1xf32>
    %144 = vector.broadcast %143 : vector<16x1xf32> to vector<16x256xf32>
    %145 = arith.mulf %142, %144 : vector<16x256xf32>
    %146 = arith.addf %141, %145 : vector<16x256xf32>
    %c0_71 = arith.constant 0 : index
    %c96 = arith.constant 96 : index
    %147 = vector.load %arg13[%c0_71, %c96] : memref<16x512xf32, #tpu.memory_space<vmem>>, vector<16x256xf32>
    %c0_72 = arith.constant 0 : index
    %c10 = arith.constant 10 : index
    %148 = vector.load %arg3[%c0_72, %c10] : memref<16x49xf32, #tpu.memory_space<vmem>>, vector<16x1xf32>
    %149 = vector.broadcast %148 : vector<16x1xf32> to vector<16x256xf32>
    %150 = arith.mulf %147, %149 : vector<16x256xf32>
    %151 = arith.addf %146, %150 : vector<16x256xf32>
    %c0_73 = arith.constant 0 : index
    %c112 = arith.constant 112 : index
    %152 = vector.load %arg13[%c0_73, %c112] : memref<16x512xf32, #tpu.memory_space<vmem>>, vector<16x256xf32>
    %c0_74 = arith.constant 0 : index
    %c17 = arith.constant 17 : index
    %153 = vector.load %arg3[%c0_74, %c17] : memref<16x49xf32, #tpu.memory_space<vmem>>, vector<16x1xf32>
    %154 = vector.broadcast %153 : vector<16x1xf32> to vector<16x256xf32>
    %155 = arith.mulf %152, %154 : vector<16x256xf32>
    %156 = arith.addf %151, %155 : vector<16x256xf32>
    %c0_75 = arith.constant 0 : index
    %c128_76 = arith.constant 128 : index
    %157 = vector.load %arg13[%c0_75, %c128_76] : memref<16x512xf32, #tpu.memory_space<vmem>>, vector<16x256xf32>
    %c0_77 = arith.constant 0 : index
    %c24 = arith.constant 24 : index
    %158 = vector.load %arg3[%c0_77, %c24] : memref<16x49xf32, #tpu.memory_space<vmem>>, vector<16x1xf32>
    %159 = vector.broadcast %158 : vector<16x1xf32> to vector<16x256xf32>
    %160 = arith.mulf %157, %159 : vector<16x256xf32>
    %161 = arith.addf %156, %160 : vector<16x256xf32>
    %c0_78 = arith.constant 0 : index
    %c144 = arith.constant 144 : index
    %162 = vector.load %arg13[%c0_78, %c144] : memref<16x512xf32, #tpu.memory_space<vmem>>, vector<16x256xf32>
    %c0_79 = arith.constant 0 : index
    %c31 = arith.constant 31 : index
    %163 = vector.load %arg3[%c0_79, %c31] : memref<16x49xf32, #tpu.memory_space<vmem>>, vector<16x1xf32>
    %164 = vector.broadcast %163 : vector<16x1xf32> to vector<16x256xf32>
    %165 = arith.mulf %162, %164 : vector<16x256xf32>
    %166 = arith.addf %161, %165 : vector<16x256xf32>
    %c0_80 = arith.constant 0 : index
    %c160 = arith.constant 160 : index
    %167 = vector.load %arg13[%c0_80, %c160] : memref<16x512xf32, #tpu.memory_space<vmem>>, vector<16x256xf32>
    %c0_81 = arith.constant 0 : index
    %c38 = arith.constant 38 : index
    %168 = vector.load %arg3[%c0_81, %c38] : memref<16x49xf32, #tpu.memory_space<vmem>>, vector<16x1xf32>
    %169 = vector.broadcast %168 : vector<16x1xf32> to vector<16x256xf32>
    %170 = arith.mulf %167, %169 : vector<16x256xf32>
    %171 = arith.addf %166, %170 : vector<16x256xf32>
    %c0_82 = arith.constant 0 : index
    %c176 = arith.constant 176 : index
    %172 = vector.load %arg13[%c0_82, %c176] : memref<16x512xf32, #tpu.memory_space<vmem>>, vector<16x256xf32>
    %c0_83 = arith.constant 0 : index
    %c45 = arith.constant 45 : index
    %173 = vector.load %arg3[%c0_83, %c45] : memref<16x49xf32, #tpu.memory_space<vmem>>, vector<16x1xf32>
    %174 = vector.broadcast %173 : vector<16x1xf32> to vector<16x256xf32>
    %175 = arith.mulf %172, %174 : vector<16x256xf32>
    %176 = arith.addf %171, %175 : vector<16x256xf32>
    %c3_84 = arith.constant 3 : index
    %c0_85 = arith.constant 0 : index
    %177 = vector.load %arg4[%c3_84, %c0_85] : memref<7x256xf32, #tpu.memory_space<vmem>>, vector<1x256xf32>
    %178 = vector.broadcast %177 : vector<1x256xf32> to vector<16x256xf32>
    %179 = arith.mulf %176, %178 : vector<16x256xf32>
    %180 = arith.addf %140, %179 : vector<16x256xf32>
    %cst_86 = arith.constant 0.000000e+00 : f32
    %181 = vector.broadcast %cst_86 : f32 to vector<16x256xf32>
    %c0_87 = arith.constant 0 : index
    %c81 = arith.constant 81 : index
    %182 = vector.load %arg13[%c0_87, %c81] : memref<16x512xf32, #tpu.memory_space<vmem>>, vector<16x256xf32>
    %c0_88 = arith.constant 0 : index
    %c4 = arith.constant 4 : index
    %183 = vector.load %arg3[%c0_88, %c4] : memref<16x49xf32, #tpu.memory_space<vmem>>, vector<16x1xf32>
    %184 = vector.broadcast %183 : vector<16x1xf32> to vector<16x256xf32>
    %185 = arith.mulf %182, %184 : vector<16x256xf32>
    %186 = arith.addf %181, %185 : vector<16x256xf32>
    %c0_89 = arith.constant 0 : index
    %c97 = arith.constant 97 : index
    %187 = vector.load %arg13[%c0_89, %c97] : memref<16x512xf32, #tpu.memory_space<vmem>>, vector<16x256xf32>
    %c0_90 = arith.constant 0 : index
    %c11 = arith.constant 11 : index
    %188 = vector.load %arg3[%c0_90, %c11] : memref<16x49xf32, #tpu.memory_space<vmem>>, vector<16x1xf32>
    %189 = vector.broadcast %188 : vector<16x1xf32> to vector<16x256xf32>
    %190 = arith.mulf %187, %189 : vector<16x256xf32>
    %191 = arith.addf %186, %190 : vector<16x256xf32>
    %c0_91 = arith.constant 0 : index
    %c113 = arith.constant 113 : index
    %192 = vector.load %arg13[%c0_91, %c113] : memref<16x512xf32, #tpu.memory_space<vmem>>, vector<16x256xf32>
    %c0_92 = arith.constant 0 : index
    %c18 = arith.constant 18 : index
    %193 = vector.load %arg3[%c0_92, %c18] : memref<16x49xf32, #tpu.memory_space<vmem>>, vector<16x1xf32>
    %194 = vector.broadcast %193 : vector<16x1xf32> to vector<16x256xf32>
    %195 = arith.mulf %192, %194 : vector<16x256xf32>
    %196 = arith.addf %191, %195 : vector<16x256xf32>
    %c0_93 = arith.constant 0 : index
    %c129 = arith.constant 129 : index
    %197 = vector.load %arg13[%c0_93, %c129] : memref<16x512xf32, #tpu.memory_space<vmem>>, vector<16x256xf32>
    %c0_94 = arith.constant 0 : index
    %c25 = arith.constant 25 : index
    %198 = vector.load %arg3[%c0_94, %c25] : memref<16x49xf32, #tpu.memory_space<vmem>>, vector<16x1xf32>
    %199 = vector.broadcast %198 : vector<16x1xf32> to vector<16x256xf32>
    %200 = arith.mulf %197, %199 : vector<16x256xf32>
    %201 = arith.addf %196, %200 : vector<16x256xf32>
    %c0_95 = arith.constant 0 : index
    %c145 = arith.constant 145 : index
    %202 = vector.load %arg13[%c0_95, %c145] : memref<16x512xf32, #tpu.memory_space<vmem>>, vector<16x256xf32>
    %c0_96 = arith.constant 0 : index
    %c32 = arith.constant 32 : index
    %203 = vector.load %arg3[%c0_96, %c32] : memref<16x49xf32, #tpu.memory_space<vmem>>, vector<16x1xf32>
    %204 = vector.broadcast %203 : vector<16x1xf32> to vector<16x256xf32>
    %205 = arith.mulf %202, %204 : vector<16x256xf32>
    %206 = arith.addf %201, %205 : vector<16x256xf32>
    %c0_97 = arith.constant 0 : index
    %c161 = arith.constant 161 : index
    %207 = vector.load %arg13[%c0_97, %c161] : memref<16x512xf32, #tpu.memory_space<vmem>>, vector<16x256xf32>
    %c0_98 = arith.constant 0 : index
    %c39 = arith.constant 39 : index
    %208 = vector.load %arg3[%c0_98, %c39] : memref<16x49xf32, #tpu.memory_space<vmem>>, vector<16x1xf32>
    %209 = vector.broadcast %208 : vector<16x1xf32> to vector<16x256xf32>
    %210 = arith.mulf %207, %209 : vector<16x256xf32>
    %211 = arith.addf %206, %210 : vector<16x256xf32>
    %c0_99 = arith.constant 0 : index
    %c177 = arith.constant 177 : index
    %212 = vector.load %arg13[%c0_99, %c177] : memref<16x512xf32, #tpu.memory_space<vmem>>, vector<16x256xf32>
    %c0_100 = arith.constant 0 : index
    %c46 = arith.constant 46 : index
    %213 = vector.load %arg3[%c0_100, %c46] : memref<16x49xf32, #tpu.memory_space<vmem>>, vector<16x1xf32>
    %214 = vector.broadcast %213 : vector<16x1xf32> to vector<16x256xf32>
    %215 = arith.mulf %212, %214 : vector<16x256xf32>
    %216 = arith.addf %211, %215 : vector<16x256xf32>
    %c4_101 = arith.constant 4 : index
    %c0_102 = arith.constant 0 : index
    %217 = vector.load %arg4[%c4_101, %c0_102] : memref<7x256xf32, #tpu.memory_space<vmem>>, vector<1x256xf32>
    %218 = vector.broadcast %217 : vector<1x256xf32> to vector<16x256xf32>
    %219 = arith.mulf %216, %218 : vector<16x256xf32>
    %220 = arith.addf %180, %219 : vector<16x256xf32>
    %cst_103 = arith.constant 0.000000e+00 : f32
    %221 = vector.broadcast %cst_103 : f32 to vector<16x256xf32>
    %c0_104 = arith.constant 0 : index
    %c82 = arith.constant 82 : index
    %222 = vector.load %arg13[%c0_104, %c82] : memref<16x512xf32, #tpu.memory_space<vmem>>, vector<16x256xf32>
    %c0_105 = arith.constant 0 : index
    %c5 = arith.constant 5 : index
    %223 = vector.load %arg3[%c0_105, %c5] : memref<16x49xf32, #tpu.memory_space<vmem>>, vector<16x1xf32>
    %224 = vector.broadcast %223 : vector<16x1xf32> to vector<16x256xf32>
    %225 = arith.mulf %222, %224 : vector<16x256xf32>
    %226 = arith.addf %221, %225 : vector<16x256xf32>
    %c0_106 = arith.constant 0 : index
    %c98 = arith.constant 98 : index
    %227 = vector.load %arg13[%c0_106, %c98] : memref<16x512xf32, #tpu.memory_space<vmem>>, vector<16x256xf32>
    %c0_107 = arith.constant 0 : index
    %c12 = arith.constant 12 : index
    %228 = vector.load %arg3[%c0_107, %c12] : memref<16x49xf32, #tpu.memory_space<vmem>>, vector<16x1xf32>
    %229 = vector.broadcast %228 : vector<16x1xf32> to vector<16x256xf32>
    %230 = arith.mulf %227, %229 : vector<16x256xf32>
    %231 = arith.addf %226, %230 : vector<16x256xf32>
    %c0_108 = arith.constant 0 : index
    %c114 = arith.constant 114 : index
    %232 = vector.load %arg13[%c0_108, %c114] : memref<16x512xf32, #tpu.memory_space<vmem>>, vector<16x256xf32>
    %c0_109 = arith.constant 0 : index
    %c19 = arith.constant 19 : index
    %233 = vector.load %arg3[%c0_109, %c19] : memref<16x49xf32, #tpu.memory_space<vmem>>, vector<16x1xf32>
    %234 = vector.broadcast %233 : vector<16x1xf32> to vector<16x256xf32>
    %235 = arith.mulf %232, %234 : vector<16x256xf32>
    %236 = arith.addf %231, %235 : vector<16x256xf32>
    %c0_110 = arith.constant 0 : index
    %c130 = arith.constant 130 : index
    %237 = vector.load %arg13[%c0_110, %c130] : memref<16x512xf32, #tpu.memory_space<vmem>>, vector<16x256xf32>
    %c0_111 = arith.constant 0 : index
    %c26 = arith.constant 26 : index
    %238 = vector.load %arg3[%c0_111, %c26] : memref<16x49xf32, #tpu.memory_space<vmem>>, vector<16x1xf32>
    %239 = vector.broadcast %238 : vector<16x1xf32> to vector<16x256xf32>
    %240 = arith.mulf %237, %239 : vector<16x256xf32>
    %241 = arith.addf %236, %240 : vector<16x256xf32>
    %c0_112 = arith.constant 0 : index
    %c146 = arith.constant 146 : index
    %242 = vector.load %arg13[%c0_112, %c146] : memref<16x512xf32, #tpu.memory_space<vmem>>, vector<16x256xf32>
    %c0_113 = arith.constant 0 : index
    %c33 = arith.constant 33 : index
    %243 = vector.load %arg3[%c0_113, %c33] : memref<16x49xf32, #tpu.memory_space<vmem>>, vector<16x1xf32>
    %244 = vector.broadcast %243 : vector<16x1xf32> to vector<16x256xf32>
    %245 = arith.mulf %242, %244 : vector<16x256xf32>
    %246 = arith.addf %241, %245 : vector<16x256xf32>
    %c0_114 = arith.constant 0 : index
    %c162 = arith.constant 162 : index
    %247 = vector.load %arg13[%c0_114, %c162] : memref<16x512xf32, #tpu.memory_space<vmem>>, vector<16x256xf32>
    %c0_115 = arith.constant 0 : index
    %c40 = arith.constant 40 : index
    %248 = vector.load %arg3[%c0_115, %c40] : memref<16x49xf32, #tpu.memory_space<vmem>>, vector<16x1xf32>
    %249 = vector.broadcast %248 : vector<16x1xf32> to vector<16x256xf32>
    %250 = arith.mulf %247, %249 : vector<16x256xf32>
    %251 = arith.addf %246, %250 : vector<16x256xf32>
    %c0_116 = arith.constant 0 : index
    %c178 = arith.constant 178 : index
    %252 = vector.load %arg13[%c0_116, %c178] : memref<16x512xf32, #tpu.memory_space<vmem>>, vector<16x256xf32>
    %c0_117 = arith.constant 0 : index
    %c47 = arith.constant 47 : index
    %253 = vector.load %arg3[%c0_117, %c47] : memref<16x49xf32, #tpu.memory_space<vmem>>, vector<16x1xf32>
    %254 = vector.broadcast %253 : vector<16x1xf32> to vector<16x256xf32>
    %255 = arith.mulf %252, %254 : vector<16x256xf32>
    %256 = arith.addf %251, %255 : vector<16x256xf32>
    %c5_118 = arith.constant 5 : index
    %c0_119 = arith.constant 0 : index
    %257 = vector.load %arg4[%c5_118, %c0_119] : memref<7x256xf32, #tpu.memory_space<vmem>>, vector<1x256xf32>
    %258 = vector.broadcast %257 : vector<1x256xf32> to vector<16x256xf32>
    %259 = arith.mulf %256, %258 : vector<16x256xf32>
    %260 = arith.addf %220, %259 : vector<16x256xf32>
    %cst_120 = arith.constant 0.000000e+00 : f32
    %261 = vector.broadcast %cst_120 : f32 to vector<16x256xf32>
    %c0_121 = arith.constant 0 : index
    %c83 = arith.constant 83 : index
    %262 = vector.load %arg13[%c0_121, %c83] : memref<16x512xf32, #tpu.memory_space<vmem>>, vector<16x256xf32>
    %c0_122 = arith.constant 0 : index
    %c6 = arith.constant 6 : index
    %263 = vector.load %arg3[%c0_122, %c6] : memref<16x49xf32, #tpu.memory_space<vmem>>, vector<16x1xf32>
    %264 = vector.broadcast %263 : vector<16x1xf32> to vector<16x256xf32>
    %265 = arith.mulf %262, %264 : vector<16x256xf32>
    %266 = arith.addf %261, %265 : vector<16x256xf32>
    %c0_123 = arith.constant 0 : index
    %c99 = arith.constant 99 : index
    %267 = vector.load %arg13[%c0_123, %c99] : memref<16x512xf32, #tpu.memory_space<vmem>>, vector<16x256xf32>
    %c0_124 = arith.constant 0 : index
    %c13 = arith.constant 13 : index
    %268 = vector.load %arg3[%c0_124, %c13] : memref<16x49xf32, #tpu.memory_space<vmem>>, vector<16x1xf32>
    %269 = vector.broadcast %268 : vector<16x1xf32> to vector<16x256xf32>
    %270 = arith.mulf %267, %269 : vector<16x256xf32>
    %271 = arith.addf %266, %270 : vector<16x256xf32>
    %c0_125 = arith.constant 0 : index
    %c115 = arith.constant 115 : index
    %272 = vector.load %arg13[%c0_125, %c115] : memref<16x512xf32, #tpu.memory_space<vmem>>, vector<16x256xf32>
    %c0_126 = arith.constant 0 : index
    %c20 = arith.constant 20 : index
    %273 = vector.load %arg3[%c0_126, %c20] : memref<16x49xf32, #tpu.memory_space<vmem>>, vector<16x1xf32>
    %274 = vector.broadcast %273 : vector<16x1xf32> to vector<16x256xf32>
    %275 = arith.mulf %272, %274 : vector<16x256xf32>
    %276 = arith.addf %271, %275 : vector<16x256xf32>
    %c0_127 = arith.constant 0 : index
    %c131 = arith.constant 131 : index
    %277 = vector.load %arg13[%c0_127, %c131] : memref<16x512xf32, #tpu.memory_space<vmem>>, vector<16x256xf32>
    %c0_128 = arith.constant 0 : index
    %c27 = arith.constant 27 : index
    %278 = vector.load %arg3[%c0_128, %c27] : memref<16x49xf32, #tpu.memory_space<vmem>>, vector<16x1xf32>
    %279 = vector.broadcast %278 : vector<16x1xf32> to vector<16x256xf32>
    %280 = arith.mulf %277, %279 : vector<16x256xf32>
    %281 = arith.addf %276, %280 : vector<16x256xf32>
    %c0_129 = arith.constant 0 : index
    %c147 = arith.constant 147 : index
    %282 = vector.load %arg13[%c0_129, %c147] : memref<16x512xf32, #tpu.memory_space<vmem>>, vector<16x256xf32>
    %c0_130 = arith.constant 0 : index
    %c34 = arith.constant 34 : index
    %283 = vector.load %arg3[%c0_130, %c34] : memref<16x49xf32, #tpu.memory_space<vmem>>, vector<16x1xf32>
    %284 = vector.broadcast %283 : vector<16x1xf32> to vector<16x256xf32>
    %285 = arith.mulf %282, %284 : vector<16x256xf32>
    %286 = arith.addf %281, %285 : vector<16x256xf32>
    %c0_131 = arith.constant 0 : index
    %c163 = arith.constant 163 : index
    %287 = vector.load %arg13[%c0_131, %c163] : memref<16x512xf32, #tpu.memory_space<vmem>>, vector<16x256xf32>
    %c0_132 = arith.constant 0 : index
    %c41 = arith.constant 41 : index
    %288 = vector.load %arg3[%c0_132, %c41] : memref<16x49xf32, #tpu.memory_space<vmem>>, vector<16x1xf32>
    %289 = vector.broadcast %288 : vector<16x1xf32> to vector<16x256xf32>
    %290 = arith.mulf %287, %289 : vector<16x256xf32>
    %291 = arith.addf %286, %290 : vector<16x256xf32>
    %c0_133 = arith.constant 0 : index
    %c179 = arith.constant 179 : index
    %292 = vector.load %arg13[%c0_133, %c179] : memref<16x512xf32, #tpu.memory_space<vmem>>, vector<16x256xf32>
    %c0_134 = arith.constant 0 : index
    %c48 = arith.constant 48 : index
    %293 = vector.load %arg3[%c0_134, %c48] : memref<16x49xf32, #tpu.memory_space<vmem>>, vector<16x1xf32>
    %294 = vector.broadcast %293 : vector<16x1xf32> to vector<16x256xf32>
    %295 = arith.mulf %292, %294 : vector<16x256xf32>
    %296 = arith.addf %291, %295 : vector<16x256xf32>
    %c6_135 = arith.constant 6 : index
    %c0_136 = arith.constant 0 : index
    %297 = vector.load %arg4[%c6_135, %c0_136] : memref<7x256xf32, #tpu.memory_space<vmem>>, vector<1x256xf32>
    %298 = vector.broadcast %297 : vector<1x256xf32> to vector<16x256xf32>
    %299 = arith.mulf %296, %298 : vector<16x256xf32>
    %300 = arith.addf %260, %299 : vector<16x256xf32>
    %301 = vector.extract_strided_slice %300 {offsets = [0, 0], sizes = [8, 256], strides = [1, 1]} : vector<16x256xf32> to vector<8x256xf32>
    %302 = vector.extract_strided_slice %300 {offsets = [8, 0], sizes = [8, 256], strides = [1, 1]} : vector<16x256xf32> to vector<8x256xf32>
    %303 = arith.addf %8, %301 : vector<8x256xf32>
    %304 = arith.addf %303, %302 : vector<8x256xf32>
    %cst_137 = arith.constant dense<0.000000e+00> : vector<8xf32>
    %305 = vector.multi_reduction <add>, %304, %cst_137 [1] : vector<8x256xf32> to vector<8xf32>
    %306 = vector.shape_cast %305 : vector<8xf32> to vector<8x1xf32>
    %cst_138 = arith.constant 3.906250e-03 : f32
    %307 = vector.broadcast %cst_138 : f32 to vector<8x1xf32>
    %308 = arith.mulf %306, %307 : vector<8x1xf32>
    %c0_139 = arith.constant 0 : index
    %c0_140 = arith.constant 0 : index
    %309 = vector.load %arg5[%c0_139, %c0_140] : memref<2x8xf32, #tpu.memory_space<vmem>>, vector<2x8xf32>
    %cst_141 = arith.constant dense<0.000000e+00> : vector<2x1xf32>
    %310 = tpu.matmul %309, %308, %cst_141 {dimension_numbers = #tpu.dot_dimension_numbers<[1], [0], [0], [1], [0, 0, 1, 1], [], []>} : vector<2x8xf32>, vector<8x1xf32>, vector<2x1xf32> -> vector<2x1xf32>
    %c0_142 = arith.constant 0 : index
    %c0_143 = arith.constant 0 : index
    %311 = vector.load %arg6[%c0_142, %c0_143] : memref<2x1xf32, #tpu.memory_space<vmem>>, vector<2x1xf32>
    %312 = arith.addf %310, %311 : vector<2x1xf32>
    %cst_144 = arith.constant 5.000000e-01 : f32
    %313 = vector.broadcast %cst_144 : f32 to vector<2x1xf32>
    %314 = arith.mulf %313, %312 : vector<2x1xf32>
    %cst_145 = arith.constant 0.707106769 : f32
    %315 = vector.broadcast %cst_145 : f32 to vector<2x1xf32>
    %316 = arith.mulf %312, %315 : vector<2x1xf32>
    %317 = math.absf %316 : vector<2x1xf32>
    %cst_146 = arith.constant 0.327591091 : f32
    %318 = vector.broadcast %cst_146 : f32 to vector<2x1xf32>
    %319 = arith.mulf %318, %317 : vector<2x1xf32>
    %cst_147 = arith.constant 1.000000e+00 : f32
    %320 = vector.broadcast %cst_147 : f32 to vector<2x1xf32>
    %321 = arith.addf %320, %319 : vector<2x1xf32>
    %cst_148 = arith.constant 1.000000e+00 : f32
    %322 = vector.broadcast %cst_148 : f32 to vector<2x1xf32>
    %323 = arith.divf %322, %321 : vector<2x1xf32>
    %cst_149 = arith.constant 1.06140542 : f32
    %324 = vector.broadcast %cst_149 : f32 to vector<2x1xf32>
    %325 = arith.mulf %324, %323 : vector<2x1xf32>
    %cst_150 = arith.constant -1.45315206 : f32
    %326 = vector.broadcast %cst_150 : f32 to vector<2x1xf32>
    %327 = arith.addf %325, %326 : vector<2x1xf32>
    %328 = arith.mulf %327, %323 : vector<2x1xf32>
    %cst_151 = arith.constant 1.42141378 : f32
    %329 = vector.broadcast %cst_151 : f32 to vector<2x1xf32>
    %330 = arith.addf %328, %329 : vector<2x1xf32>
    %331 = arith.mulf %330, %323 : vector<2x1xf32>
    %cst_152 = arith.constant -0.284496725 : f32
    %332 = vector.broadcast %cst_152 : f32 to vector<2x1xf32>
    %333 = arith.addf %331, %332 : vector<2x1xf32>
    %334 = arith.mulf %333, %323 : vector<2x1xf32>
    %cst_153 = arith.constant 0.254829586 : f32
    %335 = vector.broadcast %cst_153 : f32 to vector<2x1xf32>
    %336 = arith.addf %334, %335 : vector<2x1xf32>
    %337 = arith.mulf %336, %323 : vector<2x1xf32>
    %cst_154 = arith.constant 0.000000e+00 : f32
    %338 = vector.broadcast %cst_154 : f32 to vector<2x1xf32>
    %339 = arith.subf %338, %317 : vector<2x1xf32>
    %340 = arith.mulf %339, %317 : vector<2x1xf32>
    %341 = math.exp %340 : vector<2x1xf32>
    %342 = arith.mulf %337, %341 : vector<2x1xf32>
    %cst_155 = arith.constant 1.000000e+00 : f32
    %343 = vector.broadcast %cst_155 : f32 to vector<2x1xf32>
    %344 = arith.subf %343, %342 : vector<2x1xf32>
    %cst_156 = arith.constant 0.000000e+00 : f32
    %345 = vector.broadcast %cst_156 : f32 to vector<2x1xf32>
    %346 = arith.cmpf oge, %316, %345 : vector<2x1xf32>
    %cst_157 = arith.constant 0.000000e+00 : f32
    %347 = vector.broadcast %cst_157 : f32 to vector<2x1xf32>
    %348 = arith.subf %347, %344 : vector<2x1xf32>
    %349 = arith.select %346, %344, %348 : vector<2x1xi1>, vector<2x1xf32>
    %cst_158 = arith.constant 1.000000e+00 : f32
    %350 = vector.broadcast %cst_158 : f32 to vector<2x1xf32>
    %351 = arith.addf %350, %349 : vector<2x1xf32>
    %352 = arith.mulf %314, %351 : vector<2x1xf32>
    %c0_159 = arith.constant 0 : index
    %c0_160 = arith.constant 0 : index
    %353 = vector.load %arg7[%c0_159, %c0_160] : memref<24x2xf32, #tpu.memory_space<vmem>>, vector<24x2xf32>
    %cst_161 = arith.constant dense<0.000000e+00> : vector<24x1xf32>
    %354 = tpu.matmul %353, %352, %cst_161 {dimension_numbers = #tpu.dot_dimension_numbers<[1], [0], [0], [1], [0, 0, 1, 1], [], []>} : vector<24x2xf32>, vector<2x1xf32>, vector<24x1xf32> -> vector<24x1xf32>
    %c0_162 = arith.constant 0 : index
    %c0_163 = arith.constant 0 : index
    %355 = vector.load %arg8[%c0_162, %c0_163] : memref<24x1xf32, #tpu.memory_space<vmem>>, vector<24x1xf32>
    %356 = arith.addf %354, %355 : vector<24x1xf32>
    %357 = vector.extract_strided_slice %356 {offsets = [0, 0], sizes = [8, 1], strides = [1, 1]} : vector<24x1xf32> to vector<8x1xf32>
    %358 = vector.extract_strided_slice %356 {offsets = [8, 0], sizes = [8, 1], strides = [1, 1]} : vector<24x1xf32> to vector<8x1xf32>
    %359 = vector.extract_strided_slice %356 {offsets = [16, 0], sizes = [8, 1], strides = [1, 1]} : vector<24x1xf32> to vector<8x1xf32>
    %360 = arith.maximumf %358, %359 : vector<8x1xf32>
    %361 = arith.maximumf %357, %360 : vector<8x1xf32>
    %362 = arith.subf %357, %361 : vector<8x1xf32>
    %363 = math.exp %362 : vector<8x1xf32>
    %364 = arith.subf %358, %361 : vector<8x1xf32>
    %365 = math.exp %364 : vector<8x1xf32>
    %366 = arith.subf %359, %361 : vector<8x1xf32>
    %367 = math.exp %366 : vector<8x1xf32>
    %368 = arith.addf %363, %365 : vector<8x1xf32>
    %369 = arith.addf %368, %367 : vector<8x1xf32>
    %cst_164 = arith.constant 1.000000e+00 : f32
    %370 = vector.broadcast %cst_164 : f32 to vector<8x1xf32>
    %371 = arith.divf %370, %369 : vector<8x1xf32>
    %372 = arith.mulf %363, %371 : vector<8x1xf32>
    %373 = vector.broadcast %372 : vector<8x1xf32> to vector<8x256xf32>
    %374 = arith.mulf %373, %8 : vector<8x256xf32>
    %375 = arith.mulf %365, %371 : vector<8x1xf32>
    %376 = vector.broadcast %375 : vector<8x1xf32> to vector<8x256xf32>
    %377 = arith.mulf %376, %301 : vector<8x256xf32>
    %378 = arith.addf %374, %377 : vector<8x256xf32>
    %379 = arith.mulf %367, %371 : vector<8x1xf32>
    %380 = vector.broadcast %379 : vector<8x1xf32> to vector<8x256xf32>
    %381 = arith.mulf %380, %302 : vector<8x256xf32>
    %382 = arith.addf %378, %381 : vector<8x256xf32>
    %c0_165 = arith.constant 0 : index
    %c0_166 = arith.constant 0 : index
    %383 = vector.load %arg9[%c0_165, %c0_166] : memref<8x8xf32, #tpu.memory_space<vmem>>, vector<8x8xf32>
    %cst_167 = arith.constant dense<0.000000e+00> : vector<8x256xf32>
    %384 = tpu.matmul %383, %382, %cst_167 {dimension_numbers = #tpu.dot_dimension_numbers<[1], [0], [0], [1], [0, 0, 1, 1], [], []>} : vector<8x8xf32>, vector<8x256xf32>, vector<8x256xf32> -> vector<8x256xf32>
    %c0_168 = arith.constant 0 : index
    %c0_169 = arith.constant 0 : index
    %385 = vector.load %arg10[%c0_168, %c0_169] : memref<8x1xf32, #tpu.memory_space<vmem>>, vector<8x1xf32>
    %386 = vector.broadcast %385 : vector<8x1xf32> to vector<8x256xf32>
    %387 = arith.addf %384, %386 : vector<8x256xf32>
    %c0_170 = arith.constant 0 : index
    %c0_171 = arith.constant 0 : index
    %c0_172 = arith.constant 0 : index
    %388 = vector.load %arg12[%c0_170, %c0_171, %c0_172] : memref<1x8x256xf32, #tpu.memory_space<vmem>>, vector<1x8x256xf32>
    %389 = vector.shape_cast %388 : vector<1x8x256xf32> to vector<8x256xf32>
    %390 = vector.shape_cast %387 : vector<8x256xf32> to vector<1x8x256xf32>
    tpu.vector_store %arg12[%c0_170, %c0_171, %c0_172], %390 {strides = array<i32>} : memref<1x8x256xf32, #tpu.memory_space<vmem>>, vector<1x8x256xf32>,
    return
  }
  func.func @transform_0(%arg0: i32) -> (i32, i32, i32) {
    %c0_i32 = arith.constant 0 : i32
    %c0_i32_0 = arith.constant 0 : i32
    %c0_i32_1 = arith.constant 0 : i32
    return %arg0, %c0_i32, %c0_i32_0 : i32, i32, i32
  }
  func.func @transform_1(%arg0: i32) -> (i32, i32) {
    %c0_i32 = arith.constant 0 : i32
    %c0_i32_0 = arith.constant 0 : i32
    %c0_i32_1 = arith.constant 0 : i32
    return %c0_i32, %c0_i32_0 : i32, i32
  }
  func.func @transform_2(%arg0: i32) -> (i32, i32) {
    %c0_i32 = arith.constant 0 : i32
    %c0_i32_0 = arith.constant 0 : i32
    %c0_i32_1 = arith.constant 0 : i32
    return %c0_i32, %c0_i32_0 : i32, i32
  }
  func.func @transform_3(%arg0: i32) -> (i32, i32) {
    %c0_i32 = arith.constant 0 : i32
    %c0_i32_0 = arith.constant 0 : i32
    %c0_i32_1 = arith.constant 0 : i32
    return %c0_i32, %c0_i32_0 : i32, i32
  }
  func.func @transform_4(%arg0: i32) -> (i32, i32) {
    %c0_i32 = arith.constant 0 : i32
    %c0_i32_0 = arith.constant 0 : i32
    %c0_i32_1 = arith.constant 0 : i32
    return %c0_i32, %c0_i32_0 : i32, i32
  }
  func.func @transform_5(%arg0: i32) -> (i32, i32) {
    %c0_i32 = arith.constant 0 : i32
    %c0_i32_0 = arith.constant 0 : i32
    %c0_i32_1 = arith.constant 0 : i32
    return %c0_i32, %c0_i32_0 : i32, i32
  }
  func.func @transform_6(%arg0: i32) -> (i32, i32) {
    %c0_i32 = arith.constant 0 : i32
    %c0_i32_0 = arith.constant 0 : i32
    %c0_i32_1 = arith.constant 0 : i32
    return %c0_i32, %c0_i32_0 : i32, i32
  }
  func.func @transform_7(%arg0: i32) -> (i32, i32) {
    %c0_i32 = arith.constant 0 : i32
    %c0_i32_0 = arith.constant 0 : i32
    %c0_i32_1 = arith.constant 0 : i32
    return %c0_i32, %c0_i32_0 : i32, i32
  }
  func.func @transform_8(%arg0: i32) -> (i32, i32) {
    %c0_i32 = arith.constant 0 : i32
    %c0_i32_0 = arith.constant 0 : i32
    %c0_i32_1 = arith.constant 0 : i32
    return %c0_i32, %c0_i32_0 : i32, i32
  }
  func.func @transform_9(%arg0: i32) -> (i32, i32) {
    %c0_i32 = arith.constant 0 : i32
    %c0_i32_0 = arith.constant 0 : i32
    %c0_i32_1 = arith.constant 0 : i32
    return %c0_i32, %c0_i32_0 : i32, i32
  }
  func.func @transform_10(%arg0: i32) -> (i32, i32) {
    %c0_i32 = arith.constant 0 : i32
    %c0_i32_0 = arith.constant 0 : i32
    %c0_i32_1 = arith.constant 0 : i32
    return %c0_i32, %c0_i32_0 : i32, i32
  }
  func.func @transform_11(%arg0: i32) -> (i32, i32, i32) {
    %c0_i32 = arith.constant 0 : i32
    %c0_i32_0 = arith.constant 0 : i32
    %c0_i32_1 = arith.constant 0 : i32
    return %arg0, %c0_i32, %c0_i32_0 : i32, i32, i32
  }
}

</mosaic_0001>

<bundles_post_ra>
// kernel: wemsub_forward.1
= control target key start
LH: loop header
LB: loop body
LE: loop exit
PB: predicated region body
PF: predicated region fallthrough
CT: control target
= control target key end

     0   :  { %s3900_s19 = smov 0   ;;  %s6451_s0 = inlined_call_operand.vmem [shape: f32[2,4,256], index: 0, kind: input, shape index: {}]   ;;  %s6452_s1 = inlined_call_operand.vmem [shape: f32[24,4], index: 1, kind: input, shape index: {}]   ;;  %s6453_s2 = inlined_call_operand.vmem [shape: f32[16,49], index: 2, kind: input, shape index: {}]   ;;  %s6454_s3 = inlined_call_operand.vmem [shape: f32[7,256], index: 3, kind: input, shape index: {}]   ;;  %s6455_s4 = inlined_call_operand.vmem [shape: f32[2,8], index: 4, kind: input, shape index: {}]   ;;  %s6456_s5 = inlined_call_operand.vmem [shape: f32[2,1], index: 5, kind: input, shape index: {}]   ;;  %s6457_s6 = inlined_call_operand.vmem [shape: f32[24,2], index: 6, kind: input, shape index: {}]   ;;  %s6458_s7 = inlined_call_operand.vmem [shape: f32[24,1], index: 7, kind: input, shape index: {}]   ;;  %s6459_s8 = inlined_call_operand.vmem [shape: f32[8,8], index: 8, kind: input, shape index: {}]   ;;  %s6460_s9 = inlined_call_operand.vmem [shape: f32[8,1], index: 9, kind: input, shape index: {}]   ;;  %s6461_s10 = inlined_call_operand.<no memory space> [shape: f32[1,1], index: 10, kind: input, shape index: {}]   ;;  %s6462_s11 = inlined_call_operand.vmem [shape: f32[2,8,256], index: 11, kind: output, shape index: {}]  }
   0x1   :  { %16 = sst [smem:[#allocation3]] %s6461_s10 }
   0x2 LB: > { %s3521_s20 = sadd.s32 4294967295, %s3765_s19   ;;  %p3525_p0 = scmp.ge.s32.totalorder %s3765_s19, 1  ;;  %s3765_s19 = sphi %s3900_s19, %s22_s19  }
   0x3   : > { %p338_p1 = scmp.lt.s32.totalorder %s3765_s19, 3 }
   0x5   : > { %p339_p2 = pnand %p3525_p0, %p338_p1 }
   0x7   : > { %342 = sbr.rel (%p339_p2) target bundleno = 2332 (0x91c), region = 64 }
   0xe   : > { %v3911_v0 = vld [vmem:[%s6453_s2] sm:$0xff]  ;;  %p378_p3 = scmp.lt.s32.totalorder %s3521_s20, 1  ;;  %v3767_v1 = vmov 15   ;;  %v6463_v2 = vmov 0.0   ;;  %v3769_v3 = vmov 8   ;;  %v3770_v4 = vmov 9  }
   0xf   : > { %3652 = vset.pattern.permute.xlu1 %v3767_v1  ;;  %477 = vmatprep.mubr.f32.mxu0 %v6463_v2  ;;  %vm408_vm0 = vcmask 1043456   ;;  %v3926_v6 = vld [vmem:[%s6453_s2 + $0x8] sm:$0xff]  ;;  %v393_v8 = vld [vmem:[%s6452_s1] sm:$0xff]  ;;  %vm398_vm1 = vcmask 31744   ;;  %v3771_v9 = vmov 22   ;;  %v395_v11 = vld [vmem:[%s6452_s1 + $0x10] sm:$0xff] }
  0x10   : > { %940 = vperm.xlu1 %3652, %v3911_v0   ;;  %s7214_s20 = smov (!%p378_p3, %s3521_s20), 1  ;;  %3651 = vset.pattern.permute.xlu0 %v3769_v3  ;;  %v394_v10 = vld [vmem:[%s6452_s1 + $0x8] sm:$0xff]  ;;  %v3772_v12 = vmov 16   ;;  %v3773_v13 = vmov 10   ;;  %v3774_v14 = vmov 29   ;;  %v3775_v15 = vmov 23  }
  0x11   : > { %892 = vperm.xlu0 %3651, %v3911_v0   ;;  %3557 = vmatprep.subr.mxu1 %v6463_v2  ;;  %s3549_s10 = sshll.u32 %s7214_s20, 3  ;;  %v3776_v16 = vmov 30   ;;  %v3777_v17 = vmov 17   ;;  %v3778_v18 = vmov 11   ;;  %v3779_v19 = vmov 36   ;;  %s4083_s15 = sld [smem:[#allocation3]] }
  0x12   : > { %s382_s25 = scalar_lea.vmem %s6451_s0, %s3549_s10  ;;  %v3780_v20 = vmov 18   ;;  %v3781_v21 = vmov 37   ;;  %v3782_v22 = vmov 24   ;;  %v3783_v23 = vmov 38   ;;  %s3810_s16 = smov 112  }
  0x13   : > { %v392_v5 = vld [vmem:[%s382_s25] sm:$0xff]  ;;  %v3784_v24 = vmov 19   ;;  %v3785_v25 = vmov 12   ;;  %v3786_v26 = vmov 20   ;;  %v3787_v27 = vmov 43   ;;  %s3815_s17 = smov 96  }
  0x14   : > { %3653 = vset.pattern.permute.xlu1 %v3770_v4  ;;  %v397_v7 = vcombine.high %v392_v5, %v392_v5  ;;  %v3788_v28 = vmov 45   ;;  %v3789_v29 = vmov 26   ;;  %v3790_v30 = vmov 46   ;;  %s3816_s18 = smov 80   ;;  %s3819_s21 = smov 64  }
  0x15   : > { %1261 = vperm.xlu1 %3653, %v3911_v0   ;;  %896 = vperm.xlu0 %3651, %v3926_v6   ;;  %v3791_v31 = vmov 31   ;;  %v3792_v32 = vmov 27   ;;  %v3793_v33 = vmov 25   ;;  %v3794_v34 = vmov 40   ;;  %s3820_s22 = smov 48   ;;  %s3821_s10 = smov 32  }
  0x16   : > { %3530 = vmatprep.subr.msk.mxu0 %vm408_vm0, %v397_v7  ;;  %v3795_v35 = vmov 13   ;;  %v3796_v36 = vmov 41   ;;  %v3797_v37 = vmov 48   ;;  %v3798_v38 = vmov 44   ;;  %s3822_s25 = smov 78   ;;  %s3823_s28 = smov 79  }
  0x17   : > { %3531 = vmatpush1.msk.msra.mxu0 %vm408_vm0, %v392_v5  ;;  %v3799_v39 = vmov 1   ;;  %v3800_v41 = vmov 14   ;;  %v3801_v43 = vmov 32   ;;  %v3802_v44 = vmov 3   ;;  %s3825_s14 = smov 81   ;;  %s3826_s24 = smov 82  }
  0x18   : > { %3532 = vmatmul.mubr.msk.f32.vlgmr.msra.gmra.mrb[0].mxu0 %vm398_vm1, %v393_v8  ;;  %v3803_v47 = vmov 28   ;;  %v3804_v49 = vmov 4   ;;  %v3805_v53 = vmov 39   ;;  %v3806_v55 = vmov 33   ;;  %s3827_s27 = smov 83   ;;  %s3835_s23 = smov 51  }
  0x19   : > { %3655 = vset.pattern.permute.xlu1 %v3771_v9  ;;  %483 = vmatprep.mubr.f32.mxu0 %v6463_v2  ;;  %v3807_v3 = vmov 34   ;;  %vm572_vm4 = vcmask 916480   ;;  %vm621_vm5 = vcmask 785408   ;;  %vm670_vm6 = vcmask 654336   ;;  %s3550_s26 = sshll.u32 %s7214_s20, 4 }
  0x1a   : > { %988 = vperm.xlu1 %3655, %v3911_v0   ;;  %3654 = vset.pattern.permute.xlu0 %v3767_v1  ;;  %vm725_vm7 = vcmask 523264   ;;  %vm774_vm8 = vcmask 392192   ;;  %vm823_vm9 = vcmask 261120   ;;  %vm1194_vm10 = vcmask 637952   ;;  %s387_s29 = scalar_lea.vmem %s6462_s11, %s3550_s26 }
  0x1b   : > { %944 = vperm.xlu0 %3654, %v3926_v6   ;;  %vm1563_vm11 = vcmask 646144   ;;  %vm2290_vm12 = vcmask 662528   ;;  %vm2659_vm13 = vcmask 670720   ;;  %vm3028_vm14 = vcmask 678912  }
  0x1c   : > { %3533 = vmatmul.mubr.msk.f32.gmra.mrb[2].mxu0 %vm398_vm1, %v394_v10  ;;  %vm1223_vm15 = vcmask 1039360   ;;  %vm854_vm0 = vcmask 629760  }
  0x1d   : > { %489 = vmatprep.mubr.f32.mxu0 %v6463_v2 }
  0x1e   : > { %3656 = vset.pattern.permute.xlu1 %v3770_v4 }
  0x1f   : > { %1265 = vperm.xlu1 %3656, %v3926_v6   ;;  %3657 = vset.pattern.permute.xlu0 %v3772_v12 }
  0x20   : > { %3534 = vmatmul.mubr.msk.f32.gmra.mrb[4].mxu0 %vm398_vm1, %v395_v11  ;;  %1309 = vperm.xlu0 %3657, %v3911_v0   ;;  %vm1592_vm1 = vcmask 1031168  }
  0x21   : > { %3457 = vmatprep.mubr.f32.mxu0 %v6463_v2 }
  0x23   : > { %3658 = vset.pattern.permute.xlu1 %v3773_v13 }
  0x24   : > { %1630 = vperm.xlu1 %3658, %v3911_v0   ;;  %3662 = vset.pattern.permute.xlu0 %v3773_v13 }
  0x25   : > { %1634 = vperm.xlu0 %3662, %v3926_v6  }
  0x28   : > { %3659 = vset.pattern.permute.xlu1 %v3771_v9  ;;  %v3808_v9 = vmov 47  }
  0x29   : > { %992 = vperm.xlu1 %3659, %v3926_v6   ;;  %3663 = vset.pattern.permute.xlu0 %v3774_v14 }
  0x2a   : > { %1036 = vperm.xlu0 %3663, %v3911_v0  }
  0x2d   : > { %3660 = vset.pattern.permute.xlu1 %v3772_v12 }
  0x2e   : > { %1313 = vperm.xlu1 %3660, %v3926_v6   ;;  %1040 = vperm.xlu0 %3663, %v3926_v6  }
  0x32   : > { %3661 = vset.pattern.permute.xlu1 %v3775_v15  ;;  %3668 = vset.pattern.permute.xlu0 %v3776_v16 }
  0x33   : > { %1357 = vperm.xlu1 %3661, %v3911_v0   ;;  %1405 = vperm.xlu0 %3668, %v3911_v0  }
  0x37   : > { %3664 = vset.pattern.permute.xlu1 %v3777_v17  ;;  %3671 = vset.pattern.permute.xlu0 %v3778_v18 }
  0x38   : > { %1678 = vperm.xlu1 %3664, %v3911_v0   ;;  %1992 = vperm.xlu0 %3671, %v3926_v6  }
  0x3c   : > { %3665 = vset.pattern.permute.xlu1 %v3778_v18  ;;  %3674 = vset.pattern.permute.xlu0 %v3779_v19 }
  0x3d   : > { %1988 = vperm.xlu1 %3665, %v3911_v0   ;;  %1088 = vperm.xlu0 %3674, %v3926_v6  }
  0x41   : > { %3666 = vset.pattern.permute.xlu1 %v3779_v19  ;;  %3679 = vset.pattern.permute.xlu0 %v3780_v20 }
  0x42   : > { %1084 = vperm.xlu1 %3666, %v3911_v0   ;;  %2040 = vperm.xlu0 %3679, %v3926_v6  }
  0x46   : > { %3667 = vset.pattern.permute.xlu1 %v3775_v15  ;;  %3680 = vset.pattern.permute.xlu0 %v3781_v21 }
  0x47   : > { %1361 = vperm.xlu1 %3667, %v3926_v6   ;;  %1453 = vperm.xlu0 %3680, %v3911_v0  }
  0x4b   : > { %3669 = vset.pattern.permute.xlu1 %v3777_v17  ;;  %1457 = vperm.xlu0 %3680, %v3926_v6  }
  0x4c   : > { %1682 = vperm.xlu1 %3669, %v3926_v6  }
  0x4f   : > { %3687 = vset.pattern.permute.xlu0 %v3783_v23 }
  0x50   : > { %3670 = vset.pattern.permute.xlu1 %v3782_v22  ;;  %1812 = vperm.xlu0 %3687, %v3911_v0  }
  0x51   : > { %1726 = vperm.xlu1 %3670, %v3911_v0  }
  0x54   : > { %3688 = vset.pattern.permute.xlu0 %v3784_v24 }
  0x55   : > { %3672 = vset.pattern.permute.xlu1 %v3780_v20  ;;  %2405 = vperm.xlu0 %3688, %v3911_v0   ;;  %v499_v20 = vstv %s4083_s15  ;;  %s3829_s15 = smov 127  }
  0x56   : > { %2036 = vperm.xlu1 %3672, %v3911_v0  }
  0x59   : > { %2409 = vperm.xlu0 %3688, %v3926_v6  }
  0x5a   : > { %3673 = vset.pattern.permute.xlu1 %v3785_v25 }
  0x5b   : > { %2357 = vperm.xlu1 %3673, %v3911_v0  }
  0x5d   : > { %3693 = vset.pattern.permute.xlu0 %v3786_v26 }
  0x5e   : > { %2774 = vperm.xlu0 %3693, %v3911_v0  }
  0x5f   : > { %3675 = vset.pattern.permute.xlu1 %v3787_v27 }
  0x60   : > { %1132 = vperm.xlu1 %3675, %v3911_v0  }
  0x62   : > { %3696 = vset.pattern.permute.xlu0 %v3788_v28 }
  0x63   : > { %1860 = vperm.xlu0 %3696, %v3911_v0  }
  0x64   : > { %3676 = vset.pattern.permute.xlu1 %v3776_v16 }
  0x65   : > { %1409 = vperm.xlu1 %3676, %v3926_v6  }
  0x67   : > { %3699 = vset.pattern.permute.xlu0 %v3789_v29 }
  0x68   : > { %2457 = vperm.xlu0 %3699, %v3926_v6  }
  0x69   : > { %3677 = vset.pattern.permute.xlu1 %v3782_v22 }
  0x6a   : > { %1730 = vperm.xlu1 %3677, %v3926_v6  }
  0x6c   : > { %3704 = vset.pattern.permute.xlu0 %v3790_v30 }
  0x6d   : > { %2228 = vperm.xlu0 %3704, %v3911_v0  }
  0x6e   : > { %3678 = vset.pattern.permute.xlu1 %v3791_v31 }
  0x6f   : > { %1764 = vperm.xlu1 %3678, %v3911_v0  }
  0x71   : > { %3705 = vset.pattern.permute.xlu0 %v3792_v32 }
  0x72   : > { %2822 = vperm.xlu0 %3705, %v3911_v0  }
  0x73   : > { %3681 = vset.pattern.permute.xlu1 %v3793_v33 }
  0x74   : > { %2084 = vperm.xlu1 %3681, %v3911_v0  }
  0x76   : > { %2826 = vperm.xlu0 %3705, %v3926_v6  }
  0x78   : > { %3682 = vset.pattern.permute.xlu1 %v3785_v25 }
  0x79   : > { %2361 = vperm.xlu1 %3682, %v3926_v6  }
  0x7a   : > { %3710 = vset.pattern.permute.xlu0 %v3794_v34 }
  0x7b   : > { %2553 = vperm.xlu0 %3710, %v3926_v6  }
  0x7d   : > { %3683 = vset.pattern.permute.xlu1 %v3795_v35 }
  0x7e   : > { %2726 = vperm.xlu1 %3683, %v3911_v0  }
  0x7f   : > { %3713 = vset.pattern.permute.xlu0 %v3796_v36 }
  0x80   : > { %2918 = vperm.xlu0 %3713, %v3911_v0  }
  0x82   : > { %3684 = vset.pattern.permute.xlu1 %v3787_v27 }
  0x83   : > { %1136 = vperm.xlu1 %3684, %v3926_v6  }
  0x84   : > { %3716 = vset.pattern.permute.xlu0 %v3797_v37 }
  0x85   : > { %2966 = vperm.xlu0 %3716, %v3911_v0  }
  0x87   : > { %3685 = vset.pattern.permute.xlu1 %v3798_v38 }
  0x88   : > { %1501 = vperm.xlu1 %3685, %v3911_v0  }
  0x89   : > { %3719 = vset.pattern.permute.xlu0 %v3799_v39 }
  0x8a   : > { %872 = vperm.xlu0 %3719, %v3911_v0  }
  0x8c   : > { %3686 = vset.pattern.permute.xlu1 %v3791_v31 }
  0x8d   : > { %1768 = vperm.xlu1 %3686, %v3926_v6  }
  0x8e   : > { %876 = vperm.xlu0 %3719, %v3926_v6  }
  0x8f   : > { %v4000_v40 = vpop.permute.xlu1 %940 }
  0x90   : > { %v4044_v58 = vpop.permute.xlu0 %892 }
  0x91   : > { %3689 = vset.pattern.permute.xlu1 %v3793_v33 }
  0x92   : > { %2088 = vperm.xlu1 %3689, %v3926_v6   ;;  %3722 = vset.pattern.permute.xlu0 %v3800_v41 }
  0x93   : > { %594 = vperm.xlu0 %3722, %v3926_v6  }
  0x94   : > { %v4005_v42 = vpop.permute.xlu1 %1261  ;;  %v4051_v61 = vpop.permute.xlu0 %896 }
  0x96   : > { %3690 = vset.pattern.permute.xlu1 %v3801_v43 }
  0x97   : > { %2132 = vperm.xlu1 %3690, %v3911_v0   ;;  %3725 = vset.pattern.permute.xlu0 %v3802_v44 }
  0x98   : > { %1610 = vperm.xlu0 %3725, %v3911_v0  }
  0x99   : > { %v4009_v45 = vpop.permute.xlu1 %988 }
  0x9a   : > { %v4056_v63 = vpop.permute.xlu0 %944 }
  0x9b   : > { %3691 = vset.pattern.permute.xlu1 %v3789_v29 }
  0x9c   : > { %2453 = vperm.xlu1 %3691, %v3911_v0   ;;  %1614 = vperm.xlu0 %3725, %v3926_v6  }
  0x9e   : > { %v4014_v46 = vpop.permute.xlu1 %1265 }
  0x9f   : > { %v4062_v4 = vpop.permute.xlu0 %1309 }
  0xa0   : > { %3692 = vset.pattern.permute.xlu1 %v3795_v35  ;;  %3729 = vset.pattern.permute.xlu0 %v3803_v47 }
  0xa1   : > { %2730 = vperm.xlu1 %3692, %v3926_v6   ;;  %698 = vperm.xlu0 %3729, %v3926_v6  }
  0xa3   : > { %v4019_v48 = vpop.permute.xlu1 %1630 }
  0xa4   : > { %v4069_v7 = vpop.permute.xlu0 %1634 }
  0xa5   : > { %3694 = vset.pattern.permute.xlu1 %v3798_v38  ;;  %3731 = vset.pattern.permute.xlu0 %v3804_v49  ;;  %v3812_v38 = vmov 2  }
  0xa6   : > { %1505 = vperm.xlu1 %3694, %v3926_v6  }
  0xa8   : > { %v4023_v50 = vpop.permute.xlu1 %992 }
  0xa9   : > { %v4074_v10 = vpop.permute.xlu0 %1036 }
  0xaa   : > { %3695 = vset.pattern.permute.xlu1 %v3783_v23 }
  0xab   : > { %1816 = vperm.xlu1 %3695, %v3926_v6  }
  0xad   : > { %v4027_v51 = vpop.permute.xlu1 %1313  ;;  %v4081_v13 = vpop.permute.xlu0 %1040 }
  0xaf   : > { %3697 = vset.pattern.permute.xlu1 %v3801_v43  ;;  %v3813_v43 = vmov 6  }
  0xb0   : > { %2136 = vperm.xlu1 %3697, %v3926_v6  }
  0xb2   : > { %v4030_v52 = vpop.permute.xlu1 %1357  ;;  %v4092_v17 = vpop.permute.xlu0 %1405 }
  0xb4   : > { %3698 = vset.pattern.permute.xlu1 %v3805_v53 }
  0xb5   : > { %2180 = vperm.xlu1 %3698, %v3911_v0  }
  0xb7   : > { %v4033_v54 = vpop.permute.xlu1 %1678  ;;  %v4100_v24 = vpop.permute.xlu0 %1992 }
  0xb9   : > { %3700 = vset.pattern.permute.xlu1 %v3806_v55 }
  0xba   : > { %2501 = vperm.xlu1 %3700, %v3911_v0  }
  0xbc   : > { %v4036_v56 = vpop.permute.xlu1 %1988  ;;  %v4108_v29 = vpop.permute.xlu0 %1088 }
  0xbe   : > { %3701 = vset.pattern.permute.xlu1 %v3786_v26 }
  0xbf   : > { %2778 = vperm.xlu1 %3701, %v3926_v6  }
  0xc1   : > { %v4040_v57 = vpop.permute.xlu1 %1084  ;;  %v4116_v32 = vpop.permute.xlu0 %2040 }
  0xc3   : > { %3702 = vset.pattern.permute.xlu1 %v3788_v28  ;;  %v3809_v28 = vmov 7  }
  0xc4   : > { %1864 = vperm.xlu1 %3702, %v3926_v6  }
  0xc6   : > { %v4046_v59 = vpop.permute.xlu1 %1361 }
  0xc8   : > { %3703 = vset.pattern.permute.xlu1 %v3805_v53  ;;  %v3814_v53 = vmov 21  }
  0xc9   : > { %2184 = vperm.xlu1 %3703, %v3926_v6  }
  0xcb   : > { %v4049_v60 = vpop.permute.xlu1 %1682 }
  0xcd   : > { %3706 = vset.pattern.permute.xlu1 %v3806_v55 }
  0xce   : > { %2505 = vperm.xlu1 %3706, %v3926_v6  }
  0xd0   : > { %v4054_v62 = vpop.permute.xlu1 %1726 }
  0xd2   : > { %3707 = vset.pattern.permute.xlu1 %v3794_v34  ;;  %v6465_v34 = vmov 42  }
  0xd3   : > { %2549 = vperm.xlu1 %3707, %v3911_v0  }
  0xd5   : > { %v4060_v1 = vpop.permute.xlu1 %2036 }
  0xd7   : > { %3708 = vset.pattern.permute.xlu1 %v3807_v3 }
  0xd8   : > { %2870 = vperm.xlu1 %3708, %v3911_v0  }
  0xda   : > { %v4065_v5 = vpop.permute.xlu1 %2357 }
  0xdc   : > { %3709 = vset.pattern.permute.xlu1 %v3790_v30 }
  0xdd   : > { %2232 = vperm.xlu1 %3709, %v3926_v6  }
  0xdf   : > { %v4071_v8 = vpop.permute.xlu1 %1132 }
  0xe1   : > { %3711 = vset.pattern.permute.xlu1 %v3808_v9 }
  0xe2   : > { %2597 = vperm.xlu1 %3711, %v3911_v0  }
  0xe4   : > { %v4076_v11 = vpop.permute.xlu1 %1409 }
  0xe6   : > { %3712 = vset.pattern.permute.xlu1 %v3807_v3 }
  0xe7   : > { %2874 = vperm.xlu1 %3712, %v3926_v6  }
  0xe9   : > { %v4079_v12 = vpop.permute.xlu1 %1730 }
  0xeb   : > { %3714 = vset.pattern.permute.xlu1 %v3808_v9  ;;  %v4086_v14 = vpop.f32.mrb[0].mxu0 }
  0xec   : > { %2601 = vperm.xlu1 %3714, %v3926_v6   ;;  %6656 = vst [vmem:[#allocation4_spill] sm:$0xff] %v4086_v14  ;;  %v4088_v15 = vpop.f32.mrb[1].mxu0 }
  0xed   : > { %6657 = vst [vmem:[#allocation5_spill] sm:$0xff] %v4088_v15  ;;  %v1316_v15 = vmul.f32 0.0, %v4062_v4 }
  0xee   : > { %v4090_v16 = vpop.permute.xlu1 %1764 }
  0xef   : > { %v485_v18 = vpop.f32.mrb[2].mxu0 }
  0xf0   : > { %3715 = vset.pattern.permute.xlu1 %v3796_v36  ;;  %v487_v19 = vpop.f32.mrb[3].mxu0  ;;  %v500_v25 = vmul.f32 %v499_v20, %v485_v18  ;;  %vm497_vm2 = vcmp.ge.f32.partialorder %v485_v18, 0.0  ;;  %v4126_v36 = vpop.permute.xlu0 %1453 }
  0xf1   : > { %2922 = vperm.xlu1 %3715, %v3926_v6   ;;  %v501_v3 = vmul.f32 %v499_v20, %v487_v19  ;;  %vm498_vm3 = vcmp.ge.f32.partialorder %v487_v19, 0.0 }
  0xf2   : > { %v4105_v27 = vsel %vm497_vm2, %v485_v18, %v500_v25  ;;  %vm1950_vm2 = vcmask 1022976  }
  0xf3   : > { %v4097_v21 = vpop.permute.xlu1 %2084  ;;  %v491_v22 = vpop.f32.mrb[4].mxu0  ;;  %6658 = vst [vmem:[#allocation6_spill] sm:$0xff] %v4105_v27  ;;  %v900_v30 = vmul.f32 %v4044_v58, %v4105_v27  ;;  %v948_v55 = vmul.f32 %v4000_v40, %v4105_v27  ;;  %v4149_v25 = vsel %vm498_vm3, %v487_v19, %v501_v3  ;;  %v3817_v3 = vmov 35  }
  0xf4   : > { %v493_v23 = vpop.f32.mrb[5].mxu0  ;;  %v4136_v44 = vpop.permute.xlu0 %1457  ;;  %6660 = vst [vmem:[#allocation8_spill] sm:$0xff] %v4149_v25  ;;  %v1270_v20 = vmul.f32 %v4005_v42, %v4149_v25  ;;  %vm2319_vm3 = vcmask 1014784  }
  0xf5   : > { %3717 = vset.pattern.permute.xlu1 %v3797_v37  ;;  %3741 = vtanh.f32 %v493_v23  ;;  %913 = vrot.lane.b32.xlu0 %v900_v30, %s3810_s16  ;;  %v1268_v23 = vmul.f32 0.0, %v4005_v42 }
  0xf6   : > { %2970 = vperm.xlu1 %3717, %v3926_v6   ;;  %3743 = vtanh.f32 %v491_v22 }
  0xf8   : > { %v4103_v26 = vpop.permute.xlu1 %2361  ;;  %v4145_v18 = vpop.permute.xlu0 %1812 }
  0xf9   : > { %1972 = vperm.xlu0 %3731, %v3926_v6  }
  0xfa   : > { %3718 = vset.pattern.permute.xlu1 %v3809_v28 }
  0xfb   : > { %541 = vperm.xlu1 %3718, %v3911_v0  }
  0xfc   : > { %v4157_v22 = vpop.permute.xlu0 %2405 }
  0xfd   : > { %v4112_v31 = vpop.permute.xlu1 %2726  ;;  %3734 = vset.pattern.permute.xlu0 %v6465_v34  ;;  %v901_v34 = vmul.f32 %v4044_v58, %v4149_v25 }
  0xfe   : > { %792 = vperm.xlu0 %3734, %v3911_v0  }
  0xff   : > { %545 = vperm.xlu1 %3718, %v3926_v6   ;;  %v4129_v37 = vpop.eup %3741 }
 0x100   : > { %6659 = vst [vmem:[#allocation7_spill] sm:$0xff] %v4129_v37  ;;  %v904_v39 = vmul.f32 %v4129_v37, %v4051_v61 }
 0x102   : > { %v4118_v33 = vpop.permute.xlu1 %1136  ;;  %3736 = vset.pattern.permute.xlu0 %v3813_v43 }
 0x103   : > { %3720 = vset.pattern.permute.xlu1 %v3800_v41  ;;  %921 = vrot.lane.b32.xlu0 %v904_v39, %s3810_s16  ;;  %v4169_v39 = vpop.permute.xlu0 %2409 }
 0x104   : > { %590 = vperm.xlu1 %3720, %v3911_v0  }
 0x107   : > { %v4124_v35 = vpop.permute.xlu1 %1501  ;;  %961 = vrot.lane.b32.xlu0 %v948_v55, %s3815_s17  ;;  %v4179_v55 = vpop.permute.xlu0 %2774 }
 0x108   : > { %3721 = vset.pattern.permute.xlu1 %v3812_v38 }
 0x109   : > { %1241 = vperm.xlu1 %3721, %v3911_v0  }
 0x10b   : > { %1280 = vrot.lane.b32.xlu0 %v1268_v23, %s3810_s16  ;;  %v899_v23 = vmul.f32 0.0, %v4044_v58  ;;  %v1638_v58 = vmul.f32 %v4019_v48, %v4105_v27 }
 0x10c   : > { %v4134_v41 = vpop.permute.xlu1 %1768 }
 0x10d   : > { %3723 = vset.pattern.permute.xlu1 %v3814_v53 }
 0x10e   : > { %639 = vperm.xlu1 %3723, %v3911_v0  }
 0x10f   : > { %1284 = vrot.lane.b32.xlu0 %v1270_v20, %s3810_s16  ;;  %v997_v20 = vmul.f32 %v4009_v45, %v4149_v25 }
 0x111   : > { %v4142_v9 = vpop.permute.xlu1 %2088 }
 0x112   : > { %3724 = vset.pattern.permute.xlu1 %v3812_v38  ;;  %v4162_v38 = vpop.eup %3743 }
 0x113   : > { %1245 = vperm.xlu1 %3724, %v3926_v6   ;;  %6661 = vst [vmem:[#allocation9_spill] sm:$0xff] %v4162_v38  ;;  %2706 = vperm.xlu0 %3736, %v3911_v0   ;;  %v951_v19 = vmul.f32 %v4162_v38, %v4056_v63  ;;  %v1272_v2 = vmul.f32 %v4162_v38, %v4014_v46 }
 0x116   : > { %v4152_v28 = vpop.permute.xlu1 %2132 }
 0x117   : > { %3726 = vset.pattern.permute.xlu1 %v3814_v53  ;;  %967 = vrot.lane.b32.xlu0 %v951_v19, %s3815_s17  ;;  %v995_v53 = vmul.f32 0.0, %v4009_v45  ;;  %v4189_v19 = vpop.permute.xlu0 %1860 }
 0x118   : > { %643 = vperm.xlu1 %3726, %v3926_v6   ;;  %6662 = vst [vmem:[#allocation10_spill] sm:$0xff] %v4189_v19 }
 0x11b   : > { %v4160_v30 = vpop.permute.xlu1 %2453  ;;  %1007 = vrot.lane.b32.xlu0 %v995_v53, %s3816_s18  ;;  %v3818_v53 = vmov 5  }
 0x11c   : > { %3727 = vset.pattern.permute.xlu1 %v3803_v47 }
 0x11d   : > { %694 = vperm.xlu1 %3727, %v3911_v0  }
 0x11f   : > { %1011 = vrot.lane.b32.xlu0 %v997_v20, %s3816_s18  ;;  %v4201_v20 = vpop.permute.xlu0 %2457 }
 0x120   : > { %v4171_v43 = vpop.permute.xlu1 %2730 }
 0x121   : > { %3728 = vset.pattern.permute.xlu1 %v3804_v49 }
 0x122   : > { %1968 = vperm.xlu1 %3728, %v3911_v0  }
 0x123   : > { %1288 = vrot.lane.b32.xlu0 %v1272_v2, %s3810_s16  ;;  %v4210_v2 = vpop.permute.xlu0 %2228 }
 0x124   : > { %6663 = vst [vmem:[#allocation11_spill] sm:$0xff] %v4210_v2  ;;  %v999_v2 = vmul.f32 %v4162_v38, %v4023_v50 }
 0x125   : > { %v4177_v47 = vpop.permute.xlu1 %1505 }
 0x126   : > { %3730 = vset.pattern.permute.xlu1 %v3817_v3 }
 0x127   : > { %743 = vperm.xlu1 %3730, %v3911_v0   ;;  %1328 = vrot.lane.b32.xlu0 %v1316_v15, %s3815_s17  ;;  %v902_v15 = vmul.f32 0.0, %v4051_v61 }
 0x12a   : > { %v4187_v49 = vpop.permute.xlu1 %1816 }
 0x12b   : > { %911 = vrot.lane.b32.xlu1 %v899_v23, %s3810_s16  ;;  %v1318_v23 = vmul.f32 %v4062_v4, %v4149_v25 }
 0x12c   : > { %3732 = vset.pattern.permute.xlu1 %v3818_v53 }
 0x12d   : > { %1332 = vrot.lane.b32.xlu0 %v1318_v23, %s3815_s17 }
 0x12f   : > { %v4198_v14 = vpop.permute.xlu1 %2136  ;;  %915 = vrot.lane.b32.xlu1 %v901_v34, %s3810_s16 }
 0x131   : > { %1651 = vrot.lane.b32.xlu0 %v1638_v58, %s3810_s16  ;;  %v947_v58 = vmul.f32 0.0, %v4000_v40 }
 0x133   : > { %2337 = vperm.xlu1 %3732, %v3911_v0   ;;  %v4220_v0 = vpop.permute.xlu0 %2822 }
 0x134   : > { %v4207_v19 = vpop.permute.xlu1 %2180  ;;  %6664 = vst [vmem:[#allocation12_spill] sm:$0xff] %v4220_v0 }
 0x135   : > { %2710 = vperm.xlu0 %3736, %v3926_v6  }
 0x137   : > { %3733 = vset.pattern.permute.xlu1 %v3817_v3  ;;  %v903_v3 = vmul.f32 %v4162_v38, %v4051_v61  ;;  %v4234_v0 = vpop.permute.xlu0 %2826  ;;  %v1045_v61 = vmul.f32 0.0, %v4074_v10 }
 0x138   : > { %747 = vperm.xlu1 %3733, %v3926_v6   ;;  %6666 = vst [vmem:[#allocation14_spill] sm:$0xff] %v4234_v0  ;;  %v1269_v0 = vmul.f32 %v4005_v42, %v4105_v27  ;;  %v1366_v42 = vmul.f32 %v4030_v52, %v4149_v25 }
 0x139   : > { %v4215_v34 = vpop.permute.xlu1 %2501  ;;  %1015 = vrot.lane.b32.xlu0 %v999_v2, %s3816_s18 }
 0x13c   : > { %917 = vrot.lane.b32.xlu1 %v902_v15, %s3810_s16 }
 0x13d   : > { %3735 = vset.pattern.permute.xlu1 %v3818_v53  ;;  %v949_v53 = vmul.f32 %v4000_v40, %v4149_v25  ;;  %v1364_v40 = vmul.f32 0.0, %v4030_v52 }
 0x13e   : > { %v4223_v23 = vpop.permute.xlu1 %2778 }
 0x13f   : > { %6665 = vst [vmem:[#allocation13_spill] sm:$0xff] %v4223_v23  ;;  %v1043_v23 = vmul.f32 %v4074_v10, %v4105_v27 }
 0x140   : > { %919 = vrot.lane.b32.xlu1 %v903_v3, %s3810_s16  ;;  %v4246_v3 = vpop.permute.xlu0 %2553 }
 0x141   : > { %1055 = vrot.lane.b32.xlu0 %v1043_v23, %s3819_s21  ;;  %6668 = vst [vmem:[#allocation16_spill] sm:$0xff] %v4246_v3  ;;  %v1685_v3 = vmul.f32 0.0, %v4033_v54 }
 0x143   : > { %v4232_v15 = vpop.permute.xlu1 %1864 }
 0x144   : > { %959 = vrot.lane.b32.xlu1 %v947_v58, %s3815_s17  ;;  %v1320_v58 = vmul.f32 %v4162_v38, %v4027_v51 }
 0x145   : > { %1059 = vrot.lane.b32.xlu0 %v1045_v61, %s3819_s21 }
 0x148   : > { %v4243_v2 = vpop.permute.xlu1 %2184  ;;  %963 = vrot.lane.b32.xlu1 %v949_v53, %s3815_s17  ;;  %v6670_v53 = vmov 42  }
 0x149   : > { %6667 = vst [vmem:[#allocation15_spill] sm:$0xff] %v4243_v2  ;;  %1336 = vrot.lane.b32.xlu0 %v1320_v58, %s3815_s17  ;;  %v4258_v2 = vpop.permute.xlu0 %2918 }
 0x14a   : > { %6669 = vst [vmem:[#allocation17_spill] sm:$0xff] %v4258_v2  ;;  %v950_v2 = vmul.f32 0.0, %v4056_v63 }
 0x14c   : > { %1282 = vrot.lane.b32.xlu1 %v1269_v0, %s3810_s16 }
 0x14d   : > { %v4254_v23 = vpop.permute.xlu1 %2505  ;;  %1376 = vrot.lane.b32.xlu0 %v1364_v40, %s3816_s18  ;;  %v4267_v0 = vpop.permute.xlu0 %2966  ;;  %v1641_v40 = vmul.f32 %v4162_v38, %v4069_v7 }
 0x14e   : > { %6671 = vst [vmem:[#allocation18_spill] sm:$0xff] %v4267_v0 }
 0x150   : > { %2341 = vperm.xlu1 %3735, %v3926_v6  }
 0x151   : > { %1380 = vrot.lane.b32.xlu0 %v1366_v42, %s3816_s18  ;;  %v4281_v0 = vpop.permute.xlu0 %872 }
 0x152   : > { %v4262_v61 = vpop.permute.xlu1 %2549  ;;  %6673 = vst [vmem:[#allocation20_spill] sm:$0xff] %v4281_v0 }
 0x154   : > { %3737 = vset.pattern.permute.xlu1 %v6670_v53  ;;  %v952_v53 = vmul.f32 %v4129_v37, %v4056_v63  ;;  %v1271_v63 = vmul.f32 0.0, %v4014_v46 }
 0x155   : > { %796 = vperm.xlu1 %3737, %v3926_v6   ;;  %1657 = vrot.lane.b32.xlu0 %v1641_v40, %s3810_s16  ;;  %v996_v6 = vmul.f32 %v4009_v45, %v4105_v27  ;;  %v1687_v40 = vmul.f32 %v4033_v54, %v4149_v25 }
 0x157   : > { %v4271_v58 = vpop.permute.xlu1 %2870 }
 0x158   : > { %6672 = vst [vmem:[#allocation19_spill] sm:$0xff] %v4271_v58  ;;  %v4293_v58 = vpop.permute.xlu0 %876 }
 0x159   : > { %965 = vrot.lane.b32.xlu1 %v950_v2, %s3815_s17  ;;  %1697 = vrot.lane.b32.xlu0 %v1685_v3, %s3815_s17  ;;  %6674 = vst [vmem:[#allocation21_spill] sm:$0xff] %v4293_v58  ;;  %v1996_v3 = vmul.f32 %v4036_v56, %v4105_v27  ;;  %v1273_v58 = vmul.f32 %v4129_v37, %v4014_v46  ;;  %v1637_v46 = vmul.f32 0.0, %v4019_v48 }
 0x15c   : > { %v4283_v42 = vpop.permute.xlu1 %2232 }
 0x15d   : > { %969 = vrot.lane.b32.xlu1 %v952_v53, %s3815_s17  ;;  %1701 = vrot.lane.b32.xlu0 %v1687_v40, %s3815_s17  ;;  %v1046_v53 = vmul.f32 %v4162_v38, %v4081_v13  ;;  %v4308_v40 = vpop.permute.xlu0 %594 }
 0x15e   : > { %6675 = vst [vmem:[#allocation22_spill] sm:$0xff] %v4308_v40 }
 0x161   : > { %v4291_v2 = vpop.permute.xlu1 %2597  ;;  %1009 = vrot.lane.b32.xlu1 %v996_v6, %s3816_s18  ;;  %2009 = vrot.lane.b32.xlu0 %v1996_v3, %s3810_s16  ;;  %v1048_v3 = vmul.f32 0.0, %v4081_v13  ;;  %v4317_v0 = vpop.permute.xlu0 %1610 }
 0x162   : > { %6676 = vst [vmem:[#allocation23_spill] sm:$0xff] %v4317_v0  ;;  %v998_v0 = vmul.f32 0.0, %v4023_v50 }
 0x165   : > { %1286 = vrot.lane.b32.xlu1 %v1271_v63, %s3810_s16  ;;  %1061 = vrot.lane.b32.xlu0 %v1046_v53, %s3819_s21  ;;  %v1317_v63 = vmul.f32 %v4062_v4, %v4105_v27  ;;  %v1092_v53 = vmul.f32 %v4040_v57, %v4149_v25  ;;  %v1367_v4 = vmul.f32 0.0, %v4046_v59 }
 0x166   : > { %v4302_v45 = vpop.permute.xlu1 %2874 }
 0x169   : > { %1290 = vrot.lane.b32.xlu1 %v1273_v58, %s3810_s16  ;;  %1065 = vrot.lane.b32.xlu0 %v1048_v3, %s3819_s21  ;;  %v4326_v58 = vpop.permute.xlu0 %1614  ;;  %v1639_v3 = vmul.f32 %v4019_v48, %v4149_v25  ;;  %v1413_v48 = vmul.f32 %v4092_v17, %v4149_v25 }
 0x16a   : > { %6678 = vst [vmem:[#allocation25_spill] sm:$0xff] %v4326_v58  ;;  %v1369_v58 = vmul.f32 %v4129_v37, %v4046_v59 }
 0x16b   : > { %v4312_v6 = vpop.permute.xlu1 %2601 }
 0x16d   : > { %1330 = vrot.lane.b32.xlu1 %v1317_v63, %s3815_s17  ;;  %1105 = vrot.lane.b32.xlu0 %v1092_v53, %s3820_s22  ;;  %v1000_v53 = vmul.f32 %v4129_v37, %v4023_v50  ;;  %v1319_v50 = vmul.f32 0.0, %v4027_v51 }
 0x170   : > { %v4324_v40 = vpop.permute.xlu1 %2922 }
 0x171   : > { %6677 = vst [vmem:[#allocation24_spill] sm:$0xff] %v4324_v40  ;;  %1649 = vrot.lane.b32.xlu1 %v1637_v46, %s3810_s16  ;;  %1382 = vrot.lane.b32.xlu0 %v1367_v4, %s3816_s18  ;;  %v4340_v40 = vpop.permute.xlu0 %698 }
 0x172   : > { %6679 = vst [vmem:[#allocation26_spill] sm:$0xff] %v4340_v40 }
 0x175   : > { %v4333_v63 = vpop.permute.xlu1 %2970  ;;  %1653 = vrot.lane.b32.xlu1 %v1639_v3, %s3810_s16  ;;  %1386 = vrot.lane.b32.xlu0 %v1369_v58, %s3816_s18  ;;  %v4350_v4 = vpop.permute.xlu0 %913  ;;  %v1688_v58 = vmul.f32 0.0, %v4049_v60 }
 0x176   : > { %6680 = vst [vmem:[#allocation27_spill] sm:$0xff] %v4350_v4 }
 0x179   : > { %1013 = vrot.lane.b32.xlu1 %v998_v0, %s3816_s18  ;;  %1426 = vrot.lane.b32.xlu0 %v1413_v48, %s3819_s21  ;;  %v1044_v0 = vmul.f32 %v4074_v10, %v4149_v25  ;;  %v4360_v40 = vpop.permute.xlu0 %1972  ;;  %v1690_v48 = vmul.f32 %v4129_v37, %v4049_v60  ;;  %v1734_v10 = vmul.f32 %v4054_v62, %v4149_v25 }
 0x17a   : > { %v4344_v46 = vpop.permute.xlu1 %541  ;;  %6681 = vst [vmem:[#allocation28_spill] sm:$0xff] %v4360_v40 }
 0x17d   : > { %1017 = vrot.lane.b32.xlu1 %v1000_v53, %s3816_s18  ;;  %1703 = vrot.lane.b32.xlu0 %v1688_v58, %s3815_s17  ;;  %v4370_v53 = vpop.permute.xlu0 %792  ;;  %v1321_v58 = vmul.f32 %v4129_v37, %v4027_v51 }
 0x17e   : > { %v4354_v3 = vpop.permute.xlu1 %545  ;;  %6682 = vst [vmem:[#allocation29_spill] sm:$0xff] %v4370_v53 }
 0x181   : > { %1057 = vrot.lane.b32.xlu1 %v1044_v0, %s3819_s21  ;;  %1707 = vrot.lane.b32.xlu0 %v1690_v48, %s3815_s17  ;;  %v4380_v40 = vpop.permute.xlu0 %921  ;;  %v1365_v48 = vmul.f32 %v4030_v52, %v4105_v27 }
 0x182   : > { %6684 = vst [vmem:[#allocation31_spill] sm:$0xff] %v4380_v40 }
 0x183   : > { %v4366_v4 = vpop.permute.xlu1 %590 }
 0x185   : > { %1334 = vrot.lane.b32.xlu1 %v1319_v50, %s3815_s17  ;;  %1743 = vrot.lane.b32.xlu0 %v1734_v10, %s3816_s18  ;;  %v1999_v50 = vmul.f32 %v4162_v38, %v4100_v24  ;;  %v4390_v51 = vpop.permute.xlu0 %961  ;;  %v1640_v10 = vmul.f32 0.0, %v4069_v7 }
 0x186   : > { %6685 = vst [vmem:[#allocation32_spill] sm:$0xff] %v4390_v51 }
 0x188   : > { %v4376_v0 = vpop.permute.xlu1 %1241 }
 0x189   : > { %6683 = vst [vmem:[#allocation30_spill] sm:$0xff] %v4376_v0  ;;  %1338 = vrot.lane.b32.xlu1 %v1321_v58, %s3815_s17  ;;  %2015 = vrot.lane.b32.xlu0 %v1999_v50, %s3810_s16  ;;  %v2043_v58 = vmul.f32 0.0, %v4060_v1  ;;  %v4396_v52 = vpop.permute.xlu0 %1280  ;;  %v2045_v50 = vmul.f32 %v4060_v1, %v4149_v25 }
 0x18a   : > { %6686 = vst [vmem:[#allocation33_spill] sm:$0xff] %v4396_v52 }
 0x18d   : > { %v4387_v53 = vpop.permute.xlu1 %639  ;;  %1378 = vrot.lane.b32.xlu1 %v1365_v48, %s3816_s18  ;;  %2055 = vrot.lane.b32.xlu0 %v2043_v58, %s3815_s17  ;;  %v1642_v48 = vmul.f32 %v4129_v37, %v4069_v7  ;;  %v4406_v40 = vpop.permute.xlu0 %1284  ;;  %v1686_v58 = vmul.f32 %v4033_v54, %v4105_v27  ;;  %v1995_v7 = vmul.f32 0.0, %v4036_v56  ;;  %v1096_v54 = vmul.f32 0.0, %v4108_v29 }
 0x18e   : > { %6688 = vst [vmem:[#allocation35_spill] sm:$0xff] %v4406_v40 }
 0x191   : > { %1655 = vrot.lane.b32.xlu1 %v1640_v10, %s3810_s16  ;;  %2059 = vrot.lane.b32.xlu0 %v2045_v50, %s3815_s17  ;;  %v2365_v10 = vmul.f32 %v4065_v5, %v4105_v27  ;;  %v1094_v50 = vmul.f32 %v4162_v38, %v4108_v29 }
 0x192   : > { %v4398_v0 = vpop.permute.xlu1 %1245 }
 0x193   : > { %6687 = vst [vmem:[#allocation34_spill] sm:$0xff] %v4398_v0 }
 0x195   : > { %1659 = vrot.lane.b32.xlu1 %v1642_v48, %s3810_s16  ;;  %2378 = vrot.lane.b32.xlu0 %v2365_v10, %s3810_s16  ;;  %v4419_v48 = vpop.permute.xlu0 %2706  ;;  %v1997_v10 = vmul.f32 %v4036_v56, %v4149_v25 }
 0x196   : > { %6689 = vst [vmem:[#allocation36_spill] sm:$0xff] %v4419_v48  ;;  %v1140_v48 = vmul.f32 %v4071_v8, %v4149_v25 }
 0x197   : > { %v4412_v52 = vpop.permute.xlu1 %643 }
 0x199   : > { %1699 = vrot.lane.b32.xlu1 %v1686_v58, %s3815_s17  ;;  %1109 = vrot.lane.b32.xlu0 %v1094_v50, %s3820_s22  ;;  %v4428_v40 = vpop.permute.xlu0 %967  ;;  %v1047_v50 = vmul.f32 %v4129_v37, %v4081_v13 }
 0x19a   : > { %6690 = vst [vmem:[#allocation37_spill] sm:$0xff] %v4428_v40 }
 0x19c   : > { %v4421_v0 = vpop.permute.xlu1 %694 }
 0x19d   : > { %2007 = vrot.lane.b32.xlu1 %v1995_v7, %s3810_s16  ;;  %1113 = vrot.lane.b32.xlu0 %v1096_v54, %s3820_s22  ;;  %v4438_v7 = vpop.permute.xlu0 %1007  ;;  %v1091_v54 = vmul.f32 %v4040_v57, %v4105_v27 }
 0x19e   : > { %6692 = vst [vmem:[#allocation39_spill] sm:$0xff] %v4438_v7 }
 0x1a1   : > { %v4431_v58 = vpop.permute.xlu1 %1968  ;;  %2011 = vrot.lane.b32.xlu1 %v1997_v10, %s3810_s16  ;;  %1153 = vrot.lane.b32.xlu0 %v1140_v48, %s3821_s10  ;;  %v1415_v10 = vmul.f32 %v4162_v38, %v4076_v11  ;;  %v1093_v48 = vmul.f32 0.0, %v4040_v57 }
 0x1a2   : > { %6691 = vst [vmem:[#allocation38_spill] sm:$0xff] %v4431_v58  ;;  %v4448_v58 = vpop.permute.xlu0 %1011 }
 0x1a3   : > { %6693 = vst [vmem:[#allocation40_spill] sm:$0xff] %v4448_v58  ;;  %v1461_v58 = vmul.f32 %v4126_v36, %v4149_v25 }
 0x1a5   : > { %1063 = vrot.lane.b32.xlu1 %v1047_v50, %s3819_s21  ;;  %1430 = vrot.lane.b32.xlu0 %v1415_v10, %s3819_s21  ;;  %v1417_v50 = vmul.f32 0.0, %v4076_v11 }
 0x1a6   : > { %v4442_v56 = vpop.permute.xlu1 %743  ;;  %v4456_v7 = vpop.permute.xlu0 %1288 }
 0x1a7   : > { %6695 = vst [vmem:[#allocation42_spill] sm:$0xff] %v4456_v7 }
 0x1a9   : > { %1103 = vrot.lane.b32.xlu1 %v1091_v54, %s3820_s22  ;;  %1434 = vrot.lane.b32.xlu0 %v1417_v50, %s3819_s21  ;;  %v1368_v54 = vmul.f32 %v4162_v38, %v4046_v59  ;;  %v1412_v50 = vmul.f32 %v4092_v17, %v4105_v27  ;;  %v1414_v59 = vmul.f32 0.0, %v4092_v17  ;;  %v1733_v17 = vmul.f32 %v4054_v62, %v4105_v27 }
 0x1aa   : > { %v4452_v13 = vpop.permute.xlu1 %911  ;;  %v4466_v10 = vpop.permute.xlu0 %1328  ;;  %v2093_v62 = vmul.f32 0.0, %v4097_v21 }
 0x1ab   : > { %6694 = vst [vmem:[#allocation41_spill] sm:$0xff] %v4452_v13  ;;  %6697 = vst [vmem:[#allocation44_spill] sm:$0xff] %v4466_v10 }
 0x1ad   : > { %1107 = vrot.lane.b32.xlu1 %v1093_v48, %s3820_s22  ;;  %1474 = vrot.lane.b32.xlu0 %v1461_v58, %s3820_s22  ;;  %v1735_v48 = vmul.f32 %v4162_v38, %v4079_v12  ;;  %v1771_v58 = vmul.f32 %v4090_v16, %v4105_v27 }
 0x1ae   : > { %v4460_v40 = vpop.permute.xlu1 %915  ;;  %v4476_v13 = vpop.permute.xlu0 %1332 }
 0x1af   : > { %6696 = vst [vmem:[#allocation43_spill] sm:$0xff] %v4460_v40  ;;  %6699 = vst [vmem:[#allocation46_spill] sm:$0xff] %v4476_v13 }
 0x1b1   : > { %1384 = vrot.lane.b32.xlu1 %v1368_v54, %s3816_s18  ;;  %1745 = vrot.lane.b32.xlu0 %v1735_v48, %s3816_s18  ;;  %v1689_v48 = vmul.f32 %v4162_v38, %v4049_v60  ;;  %v1998_v60 = vmul.f32 0.0, %v4100_v24 }
 0x1b2   : > { %v4470_v57 = vpop.permute.xlu1 %2337  ;;  %v4485_v10 = vpop.permute.xlu0 %1651 }
 0x1b3   : > { %6698 = vst [vmem:[#allocation45_spill] sm:$0xff] %v4470_v57  ;;  %6701 = vst [vmem:[#allocation48_spill] sm:$0xff] %v4485_v10  ;;  %v1773_v57 = vmul.f32 0.0, %v4090_v16 }
 0x1b5   : > { %1424 = vrot.lane.b32.xlu1 %v1412_v50, %s3819_s21  ;;  %1783 = vrot.lane.b32.xlu0 %v1771_v58, %s3819_s21  ;;  %v2047_v58 = vmul.f32 %v4162_v38, %v4116_v32 }
 0x1b6   : > { %v4494_v50 = vpop.permute.xlu0 %2710 }
 0x1b7   : > { %v4483_v54 = vpop.permute.xlu1 %747  ;;  %6702 = vst [vmem:[#allocation49_spill] sm:$0xff] %v4494_v50 }
 0x1b8   : > { %6700 = vst [vmem:[#allocation47_spill] sm:$0xff] %v4483_v54 }
 0x1b9   : > { %1428 = vrot.lane.b32.xlu1 %v1414_v59, %s3819_s21  ;;  %1787 = vrot.lane.b32.xlu0 %v1773_v57, %s3819_s21  ;;  %v2091_v57 = vmul.f32 %v4097_v21, %v4105_v27 }
 0x1ba   : > { %v4504_v10 = vpop.permute.xlu0 %1015 }
 0x1bb   : > { %v4492_v13 = vpop.permute.xlu1 %917  ;;  %6704 = vst [vmem:[#allocation51_spill] sm:$0xff] %v4504_v10 }
 0x1bd   : > { %1705 = vrot.lane.b32.xlu1 %v1689_v48, %s3815_s17  ;;  %2063 = vrot.lane.b32.xlu0 %v2047_v58, %s3815_s17  ;;  %v2000_v58 = vmul.f32 %v4129_v37, %v4100_v24  ;;  %v2364_v24 = vmul.f32 0.0, %v4065_v5 }
 0x1be   : > { %v4513_v50 = vpop.permute.xlu0 %1055 }
 0x1bf   : > { %v4502_v59 = vpop.permute.xlu1 %919  ;;  %6706 = vst [vmem:[#allocation53_spill] sm:$0xff] %v4513_v50 }
 0x1c0   : > { %6703 = vst [vmem:[#allocation50_spill] sm:$0xff] %v4502_v59 }
 0x1c1   : > { %1741 = vrot.lane.b32.xlu1 %v1733_v17, %s3816_s18  ;;  %2103 = vrot.lane.b32.xlu0 %v2091_v57, %s3816_s18  ;;  %v2368_v57 = vmul.f32 %v4162_v38, %v4103_v26 }
 0x1c2   : > { %v4522_v17 = vpop.permute.xlu0 %1059 }
 0x1c3   : > { %v4511_v48 = vpop.permute.xlu1 %959  ;;  %6708 = vst [vmem:[#allocation55_spill] sm:$0xff] %v4522_v17 }
 0x1c4   : > { %6705 = vst [vmem:[#allocation52_spill] sm:$0xff] %v4511_v48  ;;  %v2044_v48 = vmul.f32 %v4060_v1, %v4105_v27  ;;  %v2366_v1 = vmul.f32 %v4065_v5, %v4149_v25 }
 0x1c5   : > { %2013 = vrot.lane.b32.xlu1 %v1998_v60, %s3810_s16  ;;  %2107 = vrot.lane.b32.xlu0 %v2093_v62, %s3816_s18  ;;  %v2412_v62 = vmul.f32 0.0, %v4157_v22 }
 0x1c6   : > { %v4532_v50 = vpop.permute.xlu0 %1336 }
 0x1c7   : > { %v4520_v7 = vpop.permute.xlu1 %963  ;;  %6710 = vst [vmem:[#allocation57_spill] sm:$0xff] %v4532_v50 }
 0x1c8   : > { %6707 = vst [vmem:[#allocation54_spill] sm:$0xff] %v4520_v7 }
 0x1c9   : > { %2017 = vrot.lane.b32.xlu1 %v2000_v58, %s3810_s16  ;;  %2384 = vrot.lane.b32.xlu0 %v2368_v57, %s3810_s16  ;;  %v2414_v57 = vmul.f32 %v4157_v22, %v4149_v25 }
 0x1ca   : > { %v4540_v58 = vpop.permute.xlu0 %1376 }
 0x1cb   : > { %v4530_v60 = vpop.permute.xlu1 %1282  ;;  %6712 = vst [vmem:[#allocation59_spill] sm:$0xff] %v4540_v58 }
 0x1cc   : > { %6709 = vst [vmem:[#allocation56_spill] sm:$0xff] %v4530_v60 }
 0x1cd   : > { %2057 = vrot.lane.b32.xlu1 %v2044_v48, %s3815_s17  ;;  %2424 = vrot.lane.b32.xlu0 %v2412_v62, %s3815_s17  ;;  %v1095_v62 = vmul.f32 %v4129_v37, %v4108_v29 }
 0x1ce   : > { %v4548_v50 = vpop.permute.xlu0 %1380 }
 0x1cf   : > { %v4538_v17 = vpop.permute.xlu1 %2341  ;;  %6713 = vst [vmem:[#allocation60_spill] sm:$0xff] %v4548_v50 }
 0x1d0   : > { %6711 = vst [vmem:[#allocation58_spill] sm:$0xff] %v4538_v17  ;;  %v842_v17 = vlaneseq }
 0x1d1   : > { %2376 = vrot.lane.b32.xlu1 %v2364_v24, %s3810_s16  ;;  %2428 = vrot.lane.b32.xlu0 %v2414_v57, %s3815_s17  ;;  %v2734_v24 = vmul.f32 %v4112_v31, %v4105_v27  ;;  %v1142_v57 = vmul.f32 %v4162_v38, %v4118_v33 }
 0x1d2   : > { %v4558_v58 = vpop.permute.xlu0 %1657  ;;  %v4564_v50 = vshrl.u32 %v842_v17, 7  ;;  %v4582_v17 = vld [vmem:[%s6454_s3 + $0x1] ss:$8 sm:$0x3] }
 0x1d3   : > { %6715 = vst [vmem:[#allocation62_spill] sm:$0xff] %v4558_v58 }
 0x1d4   : > { %v4550_v48 = vpop.permute.xlu1 %796  ;;  %v4576_v58 = vsub.s32 1, %v4564_v50 }
 0x1d5   : > { %6714 = vst [vmem:[#allocation61_spill] sm:$0xff] %v4550_v48  ;;  %2380 = vrot.lane.b32.xlu1 %v2366_v1, %s3810_s16  ;;  %2747 = vrot.lane.b32.xlu0 %v2734_v24, %s3810_s16  ;;  %v1139_v1 = vmul.f32 %v4071_v8, %v4105_v27  ;;  %v1144_v24 = vmul.f32 0.0, %v4118_v33 }
 0x1d6   : > { %v4570_v29 = vpop.permute.xlu0 %1697 }
 0x1d7   : > { %6717 = vst [vmem:[#allocation64_spill] sm:$0xff] %v4570_v29 }
 0x1d8   : > { %v4560_v5 = vpop.permute.xlu1 %965 }
 0x1d9   : > { %6716 = vst [vmem:[#allocation63_spill] sm:$0xff] %v4560_v5  ;;  %1111 = vrot.lane.b32.xlu1 %v1095_v62, %s3820_s22  ;;  %1157 = vrot.lane.b32.xlu0 %v1142_v57, %s3821_s10  ;;  %v1141_v62 = vmul.f32 0.0, %v4071_v8  ;;  %v1189_v57 = vrot.slane %v4582_v17, %v4576_v58  ;;  %v1460_v8 = vmul.f32 %v4126_v36, %v4105_v27 }
 0x1da   : > { %v4586_v10 = vpop.permute.xlu0 %1701 }
 0x1db   : > { %6719 = vst [vmem:[#allocation66_spill] sm:$0xff] %v4586_v10 }
 0x1dc   : > { %v4572_v60 = vpop.permute.xlu1 %969 }
 0x1dd   : > { %6718 = vst [vmem:[#allocation65_spill] sm:$0xff] %v4572_v60  ;;  %1151 = vrot.lane.b32.xlu1 %v1139_v1, %s3821_s10  ;;  %1161 = vrot.lane.b32.xlu0 %v1144_v24, %s3821_s10  ;;  %v1416_v1 = vmul.f32 %v4129_v37, %v4076_v11  ;;  %v1464_v24 = vmul.f32 %v4129_v37, %v4136_v44  ;;  %v1462_v11 = vmul.f32 0.0, %v4126_v36 }
 0x1de   : > { %v4596_v60 = vpop.permute.xlu0 %2009  ;;  %v1772_v36 = vmul.f32 %v4090_v16, %v4149_v25  ;;  %v1821_v16 = vmul.f32 0.0, %v4145_v18 }
 0x1df   : > { %6720 = vst [vmem:[#allocation67_spill] sm:$0xff] %v4596_v60 }
 0x1e0   : > { %v4588_v29 = vpop.permute.xlu1 %1009 }
 0x1e1   : > { %1155 = vrot.lane.b32.xlu1 %v1141_v62, %s3821_s10  ;;  %1192 = vrot.lane.b32.xlu0 %v1189_v57, %s3822_s25  ;;  %v1508_v57 = vmul.f32 %v4124_v35, %v4105_v27 }
 0x1e2   : > { %v4606_v10 = vpop.permute.xlu0 %1061 }
 0x1e3   : > { %6721 = vst [vmem:[#allocation68_spill] sm:$0xff] %v4606_v10 }
 0x1e4   : > { %v4598_v5 = vpop.permute.xlu1 %1286 }
 0x1e5   : > { %1432 = vrot.lane.b32.xlu1 %v1416_v1, %s3819_s21  ;;  %1480 = vrot.lane.b32.xlu0 %v1464_v24, %s3820_s22  ;;  %v1510_v24 = vmul.f32 0.0, %v4124_v35 }
 0x1e6   : > { %v4615_v1 = vpop.permute.xlu0 %1065 }
 0x1e7   : > { %6723 = vst [vmem:[#allocation70_spill] sm:$0xff] %v4615_v1 }
 0x1e8   : > { %v4608_v62 = vpop.permute.xlu1 %1290 }
 0x1e9   : > { %6722 = vst [vmem:[#allocation69_spill] sm:$0xff] %v4608_v62  ;;  %1472 = vrot.lane.b32.xlu1 %v1460_v8, %s3820_s22  ;;  %1520 = vrot.lane.b32.xlu0 %v1508_v57, %s3821_s10  ;;  %v1736_v62 = vmul.f32 %v4129_v37, %v4079_v12  ;;  %v1775_v57 = vmul.f32 %v4129_v37, %v4134_v41  ;;  %v2046_v12 = vmul.f32 0.0, %v4116_v32 }
 0x1ea   : > { %v4624_v10 = vpop.permute.xlu0 %1105 }
 0x1eb   : > { %6725 = vst [vmem:[#allocation72_spill] sm:$0xff] %v4624_v10 }
 0x1ec   : > { %v4617_v60 = vpop.permute.xlu1 %1330 }
 0x1ed   : > { %6724 = vst [vmem:[#allocation71_spill] sm:$0xff] %v4617_v60  ;;  %1476 = vrot.lane.b32.xlu1 %v1462_v11, %s3820_s22  ;;  %1524 = vrot.lane.b32.xlu0 %v1510_v24, %s3821_s10  ;;  %v1819_v24 = vmul.f32 %v4145_v18, %v4105_v27 }
 0x1ee   : > { %v4634_v11 = vpop.permute.xlu0 %1382 }
 0x1ef   : > { %6727 = vst [vmem:[#allocation74_spill] sm:$0xff] %v4634_v11 }
 0x1f0   : > { %v4626_v8 = vpop.permute.xlu1 %1649 }
 0x1f1   : > { %6726 = vst [vmem:[#allocation73_spill] sm:$0xff] %v4626_v8  ;;  %1747 = vrot.lane.b32.xlu1 %v1736_v62, %s3816_s18  ;;  %1791 = vrot.lane.b32.xlu0 %v1775_v57, %s3819_s21  ;;  %v2048_v57 = vmul.f32 %v4129_v37, %v4116_v32  ;;  %v2367_v32 = vmul.f32 0.0, %v4103_v26 }
 0x1f2   : > { %v4643_v62 = vpop.permute.xlu0 %1386 }
 0x1f3   : > { %6729 = vst [vmem:[#allocation76_spill] sm:$0xff] %v4643_v62  ;;  %v2092_v62 = vmul.f32 %v4097_v21, %v4149_v25  ;;  %v2369_v21 = vmul.f32 %v4129_v37, %v4103_v26  ;;  %v2733_v26 = vmul.f32 0.0, %v4112_v31 }
 0x1f4   : > { %v4636_v1 = vpop.permute.xlu1 %1653 }
 0x1f5   : > { %6728 = vst [vmem:[#allocation75_spill] sm:$0xff] %v4636_v1  ;;  %1785 = vrot.lane.b32.xlu1 %v1772_v36, %s3819_s21  ;;  %1831 = vrot.lane.b32.xlu0 %v1819_v24, %s3820_s22  ;;  %v2095_v24 = vmul.f32 %v4129_v37, %v4142_v9 }
 0x1f6   : > { %v4652_v1 = vpop.permute.xlu0 %1426 }
 0x1f7   : > { %6730 = vst [vmem:[#allocation77_spill] sm:$0xff] %v4652_v1 }
 0x1f8   : > { %v4645_v8 = vpop.permute.xlu1 %1013 }
 0x1f9   : > { %2061 = vrot.lane.b32.xlu1 %v2046_v12, %s3815_s17  ;;  %1835 = vrot.lane.b32.xlu0 %v1821_v16, %s3820_s22  ;;  %v2139_v16 = vmul.f32 %v4152_v28, %v4105_v27 }
 0x1fa   : > { %v4662_v12 = vpop.permute.xlu0 %1703 }
 0x1fb   : > { %6732 = vst [vmem:[#allocation79_spill] sm:$0xff] %v4662_v12 }
 0x1fc   : > { %v4654_v36 = vpop.permute.xlu1 %1017 }
 0x1fd   : > { %6731 = vst [vmem:[#allocation78_spill] sm:$0xff] %v4654_v36  ;;  %2065 = vrot.lane.b32.xlu1 %v2048_v57, %s3815_s17  ;;  %2111 = vrot.lane.b32.xlu0 %v2095_v24, %s3816_s18  ;;  %v2141_v24 = vmul.f32 0.0, %v4152_v28 }
 0x1fe   : > { %v4671_v57 = vpop.permute.xlu0 %1707 }
 0x1ff   : > { %6734 = vst [vmem:[#allocation81_spill] sm:$0xff] %v4671_v57  ;;  %v2413_v57 = vmul.f32 %v4157_v22, %v4105_v27  ;;  %v2735_v22 = vmul.f32 %v4112_v31, %v4149_v25 }
 0x200   : > { %v4664_v11 = vpop.permute.xlu1 %1057 }
 0x201   : > { %6733 = vst [vmem:[#allocation80_spill] sm:$0xff] %v4664_v11  ;;  %2105 = vrot.lane.b32.xlu1 %v2092_v62, %s3816_s18  ;;  %2151 = vrot.lane.b32.xlu0 %v2139_v16, %s3819_s21  ;;  %v2416_v16 = vmul.f32 %v4162_v38, %v4169_v39 }
 0x202   : > { %v4680_v12 = vpop.permute.xlu0 %1743 }
 0x203   : > { %6736 = vst [vmem:[#allocation83_spill] sm:$0xff] %v4680_v12 }
 0x204   : > { %v4673_v1 = vpop.permute.xlu1 %1334 }
 0x205   : > { %6735 = vst [vmem:[#allocation82_spill] sm:$0xff] %v4673_v1  ;;  %2382 = vrot.lane.b32.xlu1 %v2367_v32, %s3810_s16  ;;  %2155 = vrot.lane.b32.xlu0 %v2141_v24, %s3819_s21  ;;  %v2460_v24 = vmul.f32 %v4160_v30, %v4105_v27 }
 0x206   : > { %v4690_v32 = vpop.permute.xlu0 %2015 }
 0x207   : > { %6738 = vst [vmem:[#allocation85_spill] sm:$0xff] %v4690_v32 }
 0x208   : > { %v4682_v62 = vpop.permute.xlu1 %1338 }
 0x209   : > { %6737 = vst [vmem:[#allocation84_spill] sm:$0xff] %v4682_v62  ;;  %2386 = vrot.lane.b32.xlu1 %v2369_v21, %s3810_s16  ;;  %2432 = vrot.lane.b32.xlu0 %v2416_v16, %s3815_s17  ;;  %v2462_v16 = vmul.f32 0.0, %v4160_v30 }
 0x20a   : > { %v4699_v21 = vpop.permute.xlu0 %2055 }
 0x20b   : > { %6740 = vst [vmem:[#allocation87_spill] sm:$0xff] %v4699_v21  ;;  %v4715_v21 = vsub.s32 0, %v4564_v50  ;;  %v2781_v50 = vmul.f32 0.0, %v4179_v55 }
 0x20c   : > { %v4692_v1 = vpop.permute.xlu1 %1378 }
 0x20d   : > { %6739 = vst [vmem:[#allocation86_spill] sm:$0xff] %v4692_v1  ;;  %2426 = vrot.lane.b32.xlu1 %v2413_v57, %s3815_s17  ;;  %2472 = vrot.lane.b32.xlu0 %v2460_v24, %s3816_s18  ;;  %6744 = vst [vmem:[#allocation91_spill] sm:$0xff] %v4715_v21  ;;  %v1143_v24 = vmul.f32 %v4129_v37, %v4118_v33  ;;  %v1463_v33 = vmul.f32 %v4162_v38, %v4136_v44 }
 0x20e   : > { %v4708_v32 = vpop.permute.xlu0 %2059 }
 0x20f   : > { %6742 = vst [vmem:[#allocation89_spill] sm:$0xff] %v4708_v32 }
 0x210   : > { %v4701_v12 = vpop.permute.xlu1 %1655 }
 0x211   : > { %6741 = vst [vmem:[#allocation88_spill] sm:$0xff] %v4701_v12  ;;  %2745 = vrot.lane.b32.xlu1 %v2733_v26, %s3810_s16  ;;  %2476 = vrot.lane.b32.xlu0 %v2462_v16, %s3816_s18  ;;  %v2737_v26 = vmul.f32 %v4162_v38, %v4171_v43 }
 0x212   : > { %v4721_v31 = vpop.permute.xlu0 %2378 }
 0x213   : > { %6745 = vst [vmem:[#allocation92_spill] sm:$0xff] %v4721_v31 }
 0x214   : > { %v4710_v57 = vpop.permute.xlu1 %1659 }
 0x215   : > { %6743 = vst [vmem:[#allocation90_spill] sm:$0xff] %v4710_v57  ;;  %2749 = vrot.lane.b32.xlu1 %v2735_v22, %s3810_s16  ;;  %2753 = vrot.lane.b32.xlu0 %v2737_v26, %s3810_s16  ;;  %v1185_v22 = vrot.slane %v4582_v17, %v4715_v21  ;;  %v2783_v26 = vmul.f32 %v4179_v55, %v4149_v25  ;;  %v4749_v17 = vld [vmem:[%s6454_s3 + $0x2] ss:$8 sm:$0x3] }
 0x216   : > { %v4730_v16 = vpop.permute.xlu0 %1109 }
 0x217   : > { %6747 = vst [vmem:[#allocation94_spill] sm:$0xff] %v4730_v16 }
 0x218   : > { %v4723_v12 = vpop.permute.xlu1 %1699 }
 0x219   : > { %6746 = vst [vmem:[#allocation93_spill] sm:$0xff] %v4723_v12  ;;  %1159 = vrot.lane.b32.xlu1 %v1143_v24, %s3821_s10  ;;  %2793 = vrot.lane.b32.xlu0 %v2781_v50, %s3815_s17  ;;  %v1512_v50 = vmul.f32 %v4129_v37, %v4177_v47  ;;  %v1822_v12 = vmul.f32 %v4162_v38, %v4187_v49 }
 0x21a   : > { %v4740_v24 = vpop.permute.xlu0 %1113 }
 0x21c   : > { %v4732_v32 = vpop.permute.xlu1 %2007 }
 0x21d   : > { %6748 = vst [vmem:[#allocation95_spill] sm:$0xff] %v4732_v32  ;;  %1190 = vrot.lane.b32.xlu1 %v1185_v22, %s3822_s25  ;;  %2797 = vrot.lane.b32.xlu0 %v2783_v26, %s3815_s17  ;;  %v1465_v22 = vmul.f32 0.0, %v4136_v44  ;;  %v1554_v26 = vrot.slane %v4749_v17, %v4715_v21 }
 0x21e   : > { %v4754_v32 = vpop.permute.xlu0 %1153 }
 0x21f   : > { %6750 = vst [vmem:[#allocation97_spill] sm:$0xff] %v4754_v32 }
 0x220   : > { %v4742_v31 = vpop.permute.xlu1 %2011 }
 0x221   : > { %6749 = vst [vmem:[#allocation96_spill] sm:$0xff] %v4742_v31  ;;  %1478 = vrot.lane.b32.xlu1 %v1463_v33, %s3820_s22  ;;  %1528 = vrot.lane.b32.xlu0 %v1512_v50, %s3821_s10  ;;  %v1509_v33 = vmul.f32 %v4124_v35, %v4149_v25  ;;  %v1774_v50 = vmul.f32 %v4162_v38, %v4134_v41  ;;  %v1776_v35 = vmul.f32 0.0, %v4134_v41 }
 0x222   : > { %v4764_v31 = vpop.permute.xlu0 %1430  ;;  %v2094_v41 = vmul.f32 %v4162_v38, %v4142_v9 }
 0x223   : > { %6752 = vst [vmem:[#allocation99_spill] sm:$0xff] %v4764_v31 }
 0x224   : > { %v4756_v57 = vpop.permute.xlu1 %1063 }
 0x225   : > { %6751 = vst [vmem:[#allocation98_spill] sm:$0xff] %v4756_v57  ;;  %1482 = vrot.lane.b32.xlu1 %v1465_v22, %s3820_s22  ;;  %1559 = vrot.lane.b32.xlu0 %v1554_v26, %s3823_s28  ;;  %v1824_v26 = vmul.f32 0.0, %v4187_v49 }
 0x226   : > { %v4774_v62 = vpop.permute.xlu0 %1434 }
 0x227   : > { %6754 = vst [vmem:[#allocation101_spill] sm:$0xff] %v4774_v62  ;;  %v1820_v62 = vmul.f32 %v4145_v18, %v4149_v25 }
 0x228   : > { %v4766_v44 = vpop.permute.xlu1 %1103 }
 0x229   : > { %6753 = vst [vmem:[#allocation100_spill] sm:$0xff] %v4766_v44  ;;  %1522 = vrot.lane.b32.xlu1 %v1509_v33, %s3821_s10  ;;  %1837 = vrot.lane.b32.xlu0 %v1822_v12, %s3820_s22 }
 0x22a   : > { %v4782_v31 = vpop.permute.xlu0 %1474 }
 0x22b   : > { %6756 = vst [vmem:[#allocation103_spill] sm:$0xff] %v4782_v31 }
 0x22c   : > { %v4776_v22 = vpop.permute.xlu1 %1107 }
 0x22d   : > { %6755 = vst [vmem:[#allocation102_spill] sm:$0xff] %v4776_v22  ;;  %1789 = vrot.lane.b32.xlu1 %v1774_v50, %s3819_s21  ;;  %1841 = vrot.lane.b32.xlu0 %v1824_v26, %s3820_s22  ;;  %v6758_v22 = vld [vmem:[#allocation10_spill] sm:$0xff] }
 0x22e   : > { %v1868_v12 = vmul.f32 %v6758_v22, %v4149_v25  ;;  %v4792_v1 = vpop.permute.xlu0 %1745 }
 0x22f   : > { %6759 = vst [vmem:[#allocation10_spill] sm:$0xff] %v4792_v1  ;;  %v2096_v1 = vmul.f32 0.0, %v4142_v9  ;;  %v2415_v9 = vmul.f32 0.0, %v4169_v39 }
 0x230   : > { %v4784_v33 = vpop.permute.xlu1 %1384 }
 0x231   : > { %6757 = vst [vmem:[#allocation104_spill] sm:$0xff] %v4784_v33  ;;  %1793 = vrot.lane.b32.xlu1 %v1776_v35, %s3819_s21  ;;  %1881 = vrot.lane.b32.xlu0 %v1868_v12, %s3821_s10  ;;  %v2142_v35 = vmul.f32 %v4162_v38, %v4198_v14  ;;  %v2144_v12 = vmul.f32 0.0, %v4198_v14 }
 0x232   : > { %v4802_v26 = vpop.permute.xlu0 %1783 }
 0x233   : > { %6761 = vst [vmem:[#allocation106_spill] sm:$0xff] %v4802_v26  ;;  %v2140_v26 = vmul.f32 %v4152_v28, %v4149_v25  ;;  %v2417_v28 = vmul.f32 %v4129_v37, %v4169_v39 }
 0x234   : > { %v4794_v50 = vpop.permute.xlu1 %1424 }
 0x235   : > { %6760 = vst [vmem:[#allocation105_spill] sm:$0xff] %v4794_v50  ;;  %1833 = vrot.lane.b32.xlu1 %v1820_v62, %s3820_s22  ;;  %2157 = vrot.lane.b32.xlu0 %v2142_v35, %s3819_s21  ;;  %v2188_v35 = vmul.f32 %v4207_v19, %v4149_v25 }
 0x236   : > { %v4810_v31 = vpop.permute.xlu0 %1787 }
 0x237   : > { %6763 = vst [vmem:[#allocation108_spill] sm:$0xff] %v4810_v31 }
 0x238   : > { %v4804_v18 = vpop.permute.xlu1 %1428 }
 0x239   : > { %6762 = vst [vmem:[#allocation107_spill] sm:$0xff] %v4804_v18  ;;  %2109 = vrot.lane.b32.xlu1 %v2094_v41, %s3816_s18  ;;  %2161 = vrot.lane.b32.xlu0 %v2144_v12, %s3819_s21  ;;  %v2463_v12 = vmul.f32 %v4162_v38, %v4201_v20 }
 0x23a   : > { %v4820_v18 = vpop.permute.xlu0 %2063 }
 0x23b   : > { %6765 = vst [vmem:[#allocation110_spill] sm:$0xff] %v4820_v18 }
 0x23c   : > { %v4812_v62 = vpop.permute.xlu1 %1705 }
 0x23d   : > { %6764 = vst [vmem:[#allocation109_spill] sm:$0xff] %v4812_v62  ;;  %2113 = vrot.lane.b32.xlu1 %v2096_v1, %s3816_s18  ;;  %2201 = vrot.lane.b32.xlu0 %v2188_v35, %s3820_s22  ;;  %v2465_v35 = vmul.f32 0.0, %v4201_v20 }
 0x23e   : > { %v4829_v1 = vpop.permute.xlu0 %2103 }
 0x23f   : > { %6767 = vst [vmem:[#allocation112_spill] sm:$0xff] %v4829_v1  ;;  %v3824_v1 = vmov 0  }
 0x240   : > { %v4822_v41 = vpop.permute.xlu1 %1741  ;;  %3738 = vset.pattern.permute.xlu0 %v3824_v1  ;;  %3739 = vset.pattern.permute.xlu1 %v3824_v1 }
 0x241   : > { %6766 = vst [vmem:[#allocation111_spill] sm:$0xff] %v4822_v41  ;;  %2153 = vrot.lane.b32.xlu1 %v2140_v26, %s3819_s21  ;;  %2478 = vrot.lane.b32.xlu0 %v2463_v12, %s3816_s18  ;;  %v2461_v12 = vmul.f32 %v4160_v30, %v4149_v25  ;;  %v2738_v30 = vmul.f32 %v4129_v37, %v4171_v43 }
 0x242   : > { %v4838_v18 = vpop.permute.xlu0 %2107 }
 0x243   : > { %6769 = vst [vmem:[#allocation114_spill] sm:$0xff] %v4838_v18 }
 0x244   : > { %v4831_v31 = vpop.permute.xlu1 %2013 }
 0x245   : > { %6768 = vst [vmem:[#allocation113_spill] sm:$0xff] %v4831_v31  ;;  %2430 = vrot.lane.b32.xlu1 %v2415_v9, %s3815_s17  ;;  %2482 = vrot.lane.b32.xlu0 %v2465_v35, %s3816_s18  ;;  %v2509_v9 = vmul.f32 %v4215_v34, %v4149_v25  ;;  %v2736_v35 = vmul.f32 0.0, %v4171_v43 }
 0x246   : > { %v4848_v39 = vpop.permute.xlu0 %2384 }
 0x247   : > { %6771 = vst [vmem:[#allocation116_spill] sm:$0xff] %v4848_v39 }
 0x248   : > { %v4840_v26 = vpop.permute.xlu1 %2017 }
 0x249   : > { %6770 = vst [vmem:[#allocation115_spill] sm:$0xff] %v4840_v26  ;;  %2434 = vrot.lane.b32.xlu1 %v2417_v28, %s3815_s17  ;;  %2522 = vrot.lane.b32.xlu0 %v2509_v9, %s3819_s21  ;;  %v6773_v28 = vld [vmem:[#allocation13_spill] sm:$0xff] }
 0x24a   : > { %v2784_v18 = vmul.f32 0.0, %v6773_v28  ;;  %v4856_v26 = vpop.permute.xlu0 %2424  ;;  %v2786_v9 = vmul.f32 %v4129_v37, %v6773_v28 }
 0x24b   : > { %6774 = vst [vmem:[#allocation13_spill] sm:$0xff] %v4856_v26  ;;  %v2782_v26 = vmul.f32 %v4179_v55, %v4105_v27 }
 0x24c   : > { %v4850_v31 = vpop.permute.xlu1 %2057 }
 0x24d   : > { %6772 = vst [vmem:[#allocation117_spill] sm:$0xff] %v4850_v31  ;;  %2474 = vrot.lane.b32.xlu1 %v2461_v12, %s3816_s18  ;;  %2799 = vrot.lane.b32.xlu0 %v2784_v18, %s3815_s17  ;;  %v6778_v18 = vld [vmem:[#allocation12_spill] sm:$0xff] }
 0x24e   : > { %v4866_v39 = vpop.permute.xlu0 %2428 }
 0x24f   : > { %6776 = vst [vmem:[#allocation119_spill] sm:$0xff] %v4866_v39  ;;  %v1511_v39 = vmul.f32 %v4162_v38, %v4177_v47 }
 0x250   : > { %v4858_v1 = vpop.permute.xlu1 %2376 }
 0x251   : > { %6775 = vst [vmem:[#allocation118_spill] sm:$0xff] %v4858_v1  ;;  %2751 = vrot.lane.b32.xlu1 %v2736_v35, %s3810_s16  ;;  %2803 = vrot.lane.b32.xlu0 %v2786_v9, %s3815_s17  ;;  %v2830_v35 = vmul.f32 %v6778_v18, %v4149_v25 }
 0x252   : > { %v4876_v1 = vpop.permute.xlu0 %2747 }
 0x253   : > { %6779 = vst [vmem:[#allocation12_spill] sm:$0xff] %v4876_v1  ;;  %v1872_v1 = vmul.f32 0.0, %v4232_v15 }
 0x254   : > { %v4868_v12 = vpop.permute.xlu1 %2380 }
 0x255   : > { %6777 = vst [vmem:[#allocation120_spill] sm:$0xff] %v4868_v12  ;;  %2755 = vrot.lane.b32.xlu1 %v2738_v30, %s3810_s16  ;;  %2843 = vrot.lane.b32.xlu0 %v2830_v35, %s3816_s18  ;;  %v1870_v30 = vmul.f32 %v4162_v38, %v4232_v15  ;;  %v4895_v35 = vld [vmem:[%s6454_s3 + $0x3] ss:$8 sm:$0x3] }
 0x256   : > { %v4886_v9 = vpop.permute.xlu0 %1157 }
 0x257   : > { %6781 = vst [vmem:[#allocation122_spill] sm:$0xff] %v4886_v9 }
 0x258   : > { %v4878_v43 = vpop.permute.xlu1 %1111 }
 0x259   : > { %6780 = vst [vmem:[#allocation121_spill] sm:$0xff] %v4878_v43  ;;  %2795 = vrot.lane.b32.xlu1 %v2782_v26, %s3815_s17  ;;  %1885 = vrot.lane.b32.xlu0 %v1870_v30, %s3821_s10  ;;  %v1513_v26 = vmul.f32 0.0, %v4177_v47  ;;  %v1917_v30 = vrot.slane %v4895_v35, %v4576_v58  ;;  %v1823_v47 = vmul.f32 %v4129_v37, %v4187_v49 }
 0x25a   : > { %v4899_v12 = vpop.permute.xlu0 %1161 }
 0x25c   : > { %v4888_v55 = vpop.permute.xlu1 %1151 }
 0x25d   : > { %6782 = vst [vmem:[#allocation123_spill] sm:$0xff] %v4888_v55  ;;  %1526 = vrot.lane.b32.xlu1 %v1511_v39, %s3821_s10  ;;  %1889 = vrot.lane.b32.xlu0 %v1872_v1, %s3821_s10  ;;  %v1558_v39 = vrot.slane %v4749_v17, %v4576_v58  ;;  %v6786_v1 = vld [vmem:[#allocation15_spill] sm:$0xff]  ;;  %v1867_v17 = vmul.f32 %v6758_v22, %v4105_v27 }
 0x25e   : > { %v4909_v41 = vpop.permute.xlu0 %1192 }
 0x25f   : > { %6784 = vst [vmem:[#allocation125_spill] sm:$0xff] %v4909_v41 }
 0x260   : > { %v4901_v31 = vpop.permute.xlu1 %1155 }
 0x261   : > { %6783 = vst [vmem:[#allocation124_spill] sm:$0xff] %v4901_v31  ;;  %1530 = vrot.lane.b32.xlu1 %v1513_v26, %s3821_s10  ;;  %1920 = vrot.lane.b32.xlu0 %v1917_v30, %s3816_s18  ;;  %v2191_v31 = vmul.f32 %v4129_v37, %v6786_v1  ;;  %v6789_v30 = vld [vmem:[#allocation11_spill] sm:$0xff] }
 0x262   : > { %v4919_v50 = vpop.permute.xlu0 %1480 }
 0x263   : > { %6787 = vst [vmem:[#allocation15_spill] sm:$0xff] %v4919_v50  ;;  %v1869_v50 = vmul.f32 0.0, %v6758_v22  ;;  %v2187_v22 = vmul.f32 %v4207_v19, %v4105_v27 }
 0x264   : > { %v4911_v62 = vpop.permute.xlu1 %1432 }
 0x265   : > { %6785 = vst [vmem:[#allocation126_spill] sm:$0xff] %v4911_v62  ;;  %1561 = vrot.lane.b32.xlu1 %v1558_v39, %s3823_s28  ;;  %2207 = vrot.lane.b32.xlu0 %v2191_v31, %s3820_s22  ;;  %v2235_v39 = vmul.f32 %v6789_v30, %v4105_v27  ;;  %v2237_v31 = vmul.f32 0.0, %v6789_v30 }
 0x266   : > { %v4929_v62 = vpop.permute.xlu0 %1520 }
 0x267   : > { %6790 = vst [vmem:[#allocation11_spill] sm:$0xff] %v4929_v62  ;;  %v2143_v62 = vmul.f32 %v4129_v37, %v4198_v14 }
 0x268   : > { %v4921_v26 = vpop.permute.xlu1 %1472 }
 0x269   : > { %6788 = vst [vmem:[#allocation127_spill] sm:$0xff] %v4921_v26  ;;  %1839 = vrot.lane.b32.xlu1 %v1823_v47, %s3820_s22  ;;  %2247 = vrot.lane.b32.xlu0 %v2235_v39, %s3821_s10  ;;  %v2512_v39 = vmul.f32 %v4129_v37, %v4254_v23 }
 0x26a   : > { %v4937_v26 = vpop.permute.xlu0 %1524 }
 0x26b   : > { %6792 = vst [vmem:[#allocation129_spill] sm:$0xff] %v4937_v26  ;;  %v2189_v26 = vmul.f32 0.0, %v4207_v19  ;;  %v2508_v19 = vmul.f32 %v4215_v34, %v4105_v27 }
 0x26c   : > { %v4931_v49 = vpop.permute.xlu1 %1476 }
 0x26d   : > { %6791 = vst [vmem:[#allocation128_spill] sm:$0xff] %v4931_v49  ;;  %1879 = vrot.lane.b32.xlu1 %v1867_v17, %s3821_s10  ;;  %2251 = vrot.lane.b32.xlu0 %v2237_v31, %s3821_s10 }
 0x26e   : > { %v4947_v49 = vpop.permute.xlu0 %1791 }
 0x26f   : > { %6794 = vst [vmem:[#allocation131_spill] sm:$0xff] %v4947_v49  ;;  %v2464_v49 = vmul.f32 %v4129_v37, %v4201_v20 }
 0x270   : > { %v4939_v47 = vpop.permute.xlu1 %1747 }
 0x271   : > { %6793 = vst [vmem:[#allocation130_spill] sm:$0xff] %v4939_v47  ;;  %1883 = vrot.lane.b32.xlu1 %v1869_v50, %s3821_s10  ;;  %2528 = vrot.lane.b32.xlu0 %v2512_v39, %s3819_s21  ;;  %v2556_v50 = vmul.f32 %v4262_v61, %v4105_v27  ;;  %v2558_v39 = vmul.f32 0.0, %v4262_v61 }
 0x272   : > { %v4957_v31 = vpop.permute.xlu0 %1831 }
 0x273   : > { %6796 = vst [vmem:[#allocation133_spill] sm:$0xff] %v4957_v31 }
 0x274   : > { %v4949_v17 = vpop.permute.xlu1 %1785 }
 0x275   : > { %6795 = vst [vmem:[#allocation132_spill] sm:$0xff] %v4949_v17  ;;  %2159 = vrot.lane.b32.xlu1 %v2143_v62, %s3819_s21  ;;  %2568 = vrot.lane.b32.xlu0 %v2556_v50, %s3820_s22  ;;  %v2609_v17 = vmul.f32 0.0, %v4312_v6 }
 0x276   : > { %v4965_v47 = vpop.permute.xlu0 %1835 }
 0x277   : > { %6798 = vst [vmem:[#allocation135_spill] sm:$0xff] %v4965_v47 }
 0x278   : > { %v4959_v14 = vpop.permute.xlu1 %2061 }
 0x279   : > { %6797 = vst [vmem:[#allocation134_spill] sm:$0xff] %v4959_v14  ;;  %2199 = vrot.lane.b32.xlu1 %v2187_v22, %s3820_s22  ;;  %2572 = vrot.lane.b32.xlu0 %v2558_v39, %s3820_s22  ;;  %v6800_v14 = vld [vmem:[#allocation14_spill] sm:$0xff]  ;;  %v6803_v39 = vld [vmem:[#allocation19_spill] sm:$0xff] }
 0x27a   : > { %v2833_v50 = vmul.f32 %v4129_v37, %v6800_v14  ;;  %v4975_v31 = vpop.permute.xlu0 %2111 }
 0x27b   : > { %6801 = vst [vmem:[#allocation14_spill] sm:$0xff] %v4975_v31 }
 0x27c   : > { %v4967_v62 = vpop.permute.xlu1 %2065 }
 0x27d   : > { %6799 = vst [vmem:[#allocation136_spill] sm:$0xff] %v4967_v62  ;;  %2203 = vrot.lane.b32.xlu1 %v2189_v26, %s3820_s22  ;;  %2849 = vrot.lane.b32.xlu0 %v2833_v50, %s3816_s18  ;;  %v2877_v26 = vmul.f32 %v6803_v39, %v4105_v27  ;;  %v2510_v62 = vmul.f32 0.0, %v4215_v34  ;;  %v2879_v50 = vmul.f32 0.0, %v6803_v39  ;;  %v2239_v34 = vmul.f32 %v4129_v37, %v4283_v42 }
 0x27e   : > { %v4985_v47 = vpop.permute.xlu0 %2151 }
 0x27f   : > { %6804 = vst [vmem:[#allocation19_spill] sm:$0xff] %v4985_v47 }
 0x280   : > { %v4977_v22 = vpop.permute.xlu1 %2105 }
 0x281   : > { %6802 = vst [vmem:[#allocation137_spill] sm:$0xff] %v4977_v22  ;;  %2480 = vrot.lane.b32.xlu1 %v2464_v49, %s3816_s18  ;;  %2889 = vrot.lane.b32.xlu0 %v2877_v26, %s3819_s21 }
 0x282   : > { %v4993_v31 = vpop.permute.xlu0 %2155 }
 0x283   : > { %6806 = vst [vmem:[#allocation139_spill] sm:$0xff] %v4993_v31 }
 0x284   : > { %v4987_v20 = vpop.permute.xlu1 %2382 }
 0x285   : > { %6805 = vst [vmem:[#allocation138_spill] sm:$0xff] %v4987_v20  ;;  %2520 = vrot.lane.b32.xlu1 %v2508_v19, %s3819_s21  ;;  %2893 = vrot.lane.b32.xlu0 %v2879_v50, %s3819_s21  ;;  %v5002_v20 = vld [vmem:[%s6454_s3 + $0x4] ss:$8 sm:$0x3]  ;;  %v2785_v19 = vmul.f32 %v4162_v38, %v6773_v28  ;;  %v2829_v50 = vmul.f32 %v6778_v18, %v4105_v27 }
 0x286   : > { %v5008_v26 = vpop.permute.xlu0 %2432 }
 0x287   : > { %6808 = vst [vmem:[#allocation141_spill] sm:$0xff] %v5008_v26 }
 0x288   : > { %v4995_v49 = vpop.permute.xlu1 %2386 }
 0x289   : > { %6807 = vst [vmem:[#allocation140_spill] sm:$0xff] %v4995_v49  ;;  %2524 = vrot.lane.b32.xlu1 %v2510_v62, %s3819_s21  ;;  %2255 = vrot.lane.b32.xlu0 %v2239_v34, %s3821_s10  ;;  %v2281_v62 = vrot.slane %v5002_v20, %v4715_v21  ;;  %v6812_v34 = vld [vmem:[#allocation16_spill] sm:$0xff] }
 0x28a   : > { %v5018_v49 = vpop.permute.xlu0 %2472  ;;  %v2559_v26 = vmul.f32 %v4162_v38, %v6812_v34 }
 0x28b   : > { %6810 = vst [vmem:[#allocation143_spill] sm:$0xff] %v5018_v49 }
 0x28c   : > { %v5010_v31 = vpop.permute.xlu1 %2426 }
 0x28d   : > { %6809 = vst [vmem:[#allocation142_spill] sm:$0xff] %v5010_v31  ;;  %2801 = vrot.lane.b32.xlu1 %v2785_v19, %s3815_s17  ;;  %2286 = vrot.lane.b32.xlu0 %v2281_v62, %s3825_s14  ;;  %v2831_v31 = vmul.f32 0.0, %v6778_v18  ;;  %v1871_v62 = vmul.f32 %v4129_v37, %v4232_v15  ;;  %v1913_v18 = vrot.slane %v4895_v35, %v4715_v21 }
 0x28e   : > { %v5027_v47 = vpop.permute.xlu0 %2476  ;;  %v2190_v15 = vmul.f32 %v4162_v38, %v6786_v1 }
 0x28f   : > { %6813 = vst [vmem:[#allocation16_spill] sm:$0xff] %v5027_v47 }
 0x290   : > { %v5020_v28 = vpop.permute.xlu1 %2745 }
 0x291   : > { %6811 = vst [vmem:[#allocation144_spill] sm:$0xff] %v5020_v28  ;;  %2841 = vrot.lane.b32.xlu1 %v2829_v50, %s3816_s18  ;;  %2574 = vrot.lane.b32.xlu0 %v2559_v26, %s3820_s22  ;;  %v2561_v28 = vmul.f32 0.0, %v6812_v34  ;;  %v2605_v26 = vmul.f32 %v4291_v2, %v4149_v25 }
 0x292   : > { %v5036_v49 = vpop.permute.xlu0 %2753 }
 0x293   : > { %6815 = vst [vmem:[#allocation146_spill] sm:$0xff] %v5036_v49 }
 0x294   : > { %v5029_v19 = vpop.permute.xlu1 %2749 }
 0x295   : > { %6814 = vst [vmem:[#allocation145_spill] sm:$0xff] %v5029_v19  ;;  %2845 = vrot.lane.b32.xlu1 %v2831_v31, %s3816_s18  ;;  %2578 = vrot.lane.b32.xlu0 %v2561_v28, %s3820_s22  ;;  %v2880_v28 = vmul.f32 %v4162_v38, %v4302_v45  ;;  %v6822_v19 = vld [vmem:[#allocation17_spill] sm:$0xff] }
 0x296   : > { %v5046_v31 = vpop.permute.xlu0 %2793 }
 0x297   : > { %6817 = vst [vmem:[#allocation148_spill] sm:$0xff] %v5046_v31  ;;  %v2192_v31 = vmul.f32 0.0, %v6786_v1  ;;  %v2511_v1 = vmul.f32 %v4162_v38, %v4254_v23 }
 0x298   : > { %v5038_v50 = vpop.permute.xlu1 %1159 }
 0x299   : > { %6816 = vst [vmem:[#allocation147_spill] sm:$0xff] %v5038_v50  ;;  %1887 = vrot.lane.b32.xlu1 %v1871_v62, %s3821_s10  ;;  %2618 = vrot.lane.b32.xlu0 %v2605_v26, %s3821_s10  ;;  %v2882_v26 = vmul.f32 0.0, %v4302_v45 }
 0x29a   : > { %v5056_v62 = vpop.permute.xlu0 %2797 }
 0x29b   : > { %6818 = vst [vmem:[#allocation149_spill] sm:$0xff] %v5056_v62  ;;  %v2236_v62 = vmul.f32 %v6789_v30, %v4149_v25 }
 0x29c   : > { %v5048_v47 = vpop.permute.xlu1 %1190 }
 0x29d   : > { %1918 = vrot.lane.b32.xlu1 %v1913_v18, %s3816_s18  ;;  %2895 = vrot.lane.b32.xlu0 %v2880_v28, %s3819_s21  ;;  %v2926_v28 = vmul.f32 %v6822_v19, %v4149_v25 }
 0x29e   : > { %v5064_v49 = vpop.permute.xlu0 %1528 }
 0x29f   : > { %6820 = vst [vmem:[#allocation151_spill] sm:$0xff] %v5064_v49 }
 0x2a0   : > { %v5058_v35 = vpop.permute.xlu1 %1478 }
 0x2a1   : > { %6819 = vst [vmem:[#allocation150_spill] sm:$0xff] %v5058_v35  ;;  %2205 = vrot.lane.b32.xlu1 %v2190_v15, %s3820_s22  ;;  %2899 = vrot.lane.b32.xlu0 %v2882_v26, %s3819_s21 }
 0x2a2   : > { %v5074_v22 = vpop.permute.xlu0 %1559 }
 0x2a3   : > { %6823 = vst [vmem:[#allocation17_spill] sm:$0xff] %v5074_v22 }
 0x2a4   : > { %v5066_v18 = vpop.permute.xlu1 %1482 }
 0x2a5   : > { %6821 = vst [vmem:[#allocation152_spill] sm:$0xff] %v5066_v18  ;;  %2209 = vrot.lane.b32.xlu1 %v2192_v31, %s3820_s22  ;;  %2939 = vrot.lane.b32.xlu0 %v2926_v28, %s3820_s22  ;;  %v2607_v31 = vmul.f32 %v4162_v38, %v4312_v6  ;;  %v5093_v28 = vld [vmem:[%s6454_s3 + $0x5] ss:$8 sm:$0x3] }
 0x2a6   : > { %v5084_v26 = vpop.permute.xlu0 %1837 }
 0x2a7   : > { %6825 = vst [vmem:[#allocation154_spill] sm:$0xff] %v5084_v26 }
 0x2a8   : > { %v5076_v15 = vpop.permute.xlu1 %1522 }
 0x2a9   : > { %6824 = vst [vmem:[#allocation153_spill] sm:$0xff] %v5076_v15  ;;  %2249 = vrot.lane.b32.xlu1 %v2236_v62, %s3821_s10  ;;  %2622 = vrot.lane.b32.xlu0 %v2607_v31, %s3821_s10  ;;  %v2513_v62 = vmul.f32 0.0, %v4254_v23  ;;  %v2654_v31 = vrot.slane %v5093_v28, %v4576_v58  ;;  %v2832_v23 = vmul.f32 %v4162_v38, %v6800_v14 }
 0x2aa   : > { %v5097_v49 = vpop.permute.xlu0 %1841 }
 0x2ab   : > { %6827 = vst [vmem:[#allocation156_spill] sm:$0xff] %v5097_v49 }
 0x2ac   : > { %v5086_v30 = vpop.permute.xlu1 %1789 }
 0x2ad   : > { %6826 = vst [vmem:[#allocation155_spill] sm:$0xff] %v5086_v30  ;;  %2526 = vrot.lane.b32.xlu1 %v2511_v1, %s3819_s21  ;;  %2626 = vrot.lane.b32.xlu0 %v2609_v17, %s3821_s10  ;;  %v2557_v1 = vmul.f32 %v4262_v61, %v4149_v25  ;;  %v6831_v17 = vld [vmem:[#allocation24_spill] sm:$0xff]  ;;  %v2834_v61 = vmul.f32 0.0, %v6800_v14 }
 0x2ae   : > { %v5107_v26 = vpop.permute.xlu0 %1881  ;;  %v2929_v49 = vmul.f32 %v4129_v37, %v6831_v17  ;;  %v5144_v14 = vld [vmem:[%s6454_s3 + $0x6] ss:$8 sm:$0x3] }
 0x2af   : > { %6829 = vst [vmem:[#allocation158_spill] sm:$0xff] %v5107_v26 }
 0x2b0   : > { %v5099_v18 = vpop.permute.xlu1 %1793 }
 0x2b1   : > { %6828 = vst [vmem:[#allocation157_spill] sm:$0xff] %v5099_v18  ;;  %2530 = vrot.lane.b32.xlu1 %v2513_v62, %s3819_s21  ;;  %2657 = vrot.lane.b32.xlu0 %v2654_v31, %s3826_s24  ;;  %v6834_v31 = vld [vmem:[#allocation18_spill] sm:$0xff] }
 0x2b2   : > { %v5117_v18 = vpop.permute.xlu0 %2157  ;;  %v2973_v26 = vmul.f32 %v6834_v31, %v4105_v27 }
 0x2b3   : > { %6832 = vst [vmem:[#allocation24_spill] sm:$0xff] %v5117_v18  ;;  %v2975_v18 = vmul.f32 0.0, %v6834_v31 }
 0x2b4   : > { %v5109_v30 = vpop.permute.xlu1 %1833 }
 0x2b5   : > { %6830 = vst [vmem:[#allocation159_spill] sm:$0xff] %v5109_v30  ;;  %2570 = vrot.lane.b32.xlu1 %v2557_v1, %s3820_s22  ;;  %2945 = vrot.lane.b32.xlu0 %v2929_v49, %s3820_s22  ;;  %v2878_v49 = vmul.f32 %v6803_v39, %v4149_v25 }
 0x2b6   : > { %v5126_v1 = vpop.permute.xlu0 %2161 }
 0x2b7   : > { %6835 = vst [vmem:[#allocation18_spill] sm:$0xff] %v5126_v1 }
 0x2b8   : > { %v5119_v62 = vpop.permute.xlu1 %2109 }
 0x2b9   : > { %6833 = vst [vmem:[#allocation160_spill] sm:$0xff] %v5119_v62  ;;  %2847 = vrot.lane.b32.xlu1 %v2832_v23, %s3816_s18  ;;  %2985 = vrot.lane.b32.xlu0 %v2973_v26, %s3821_s10  ;;  %v2238_v26 = vmul.f32 %v4162_v38, %v4283_v42 }
 0x2ba   : > { %v5135_v62 = vpop.permute.xlu0 %2201 }
 0x2bb   : > { %6837 = vst [vmem:[#allocation162_spill] sm:$0xff] %v5135_v62 }
 0x2bc   : > { %v5128_v30 = vpop.permute.xlu1 %2113 }
 0x2bd   : > { %6836 = vst [vmem:[#allocation161_spill] sm:$0xff] %v5128_v30  ;;  %2851 = vrot.lane.b32.xlu1 %v2834_v61, %s3816_s18  ;;  %2989 = vrot.lane.b32.xlu0 %v2975_v18, %s3821_s10  ;;  %v2977_v61 = vmul.f32 %v4129_v37, %v4333_v63  ;;  %v3019_v18 = vrot.slane %v5144_v14, %v4715_v21 }
 0x2be   : > { %v5150_v39 = vpop.permute.xlu0 %2478 }
 0x2bf   : > { %6839 = vst [vmem:[#allocation164_spill] sm:$0xff] %v5150_v39  ;;  %v2285_v39 = vrot.slane %v5002_v20, %v4576_v58 }
 0x2c0   : > { %v5137_v23 = vpop.permute.xlu1 %2153 }
 0x2c1   : > { %6838 = vst [vmem:[#allocation163_spill] sm:$0xff] %v5137_v23  ;;  %2891 = vrot.lane.b32.xlu1 %v2878_v49, %s3819_s21  ;;  %2993 = vrot.lane.b32.xlu0 %v2977_v61, %s3821_s10  ;;  %v2240_v49 = vmul.f32 0.0, %v4283_v42  ;;  %v3757_v42 = vld [vmem:[%s6453_s2] sm:$0xff] }
 0x2c2   : > { %v5159_v30 = vpop.permute.xlu0 %2482 }
 0x2c3   : > { %6841 = vst [vmem:[#allocation166_spill] sm:$0xff] %v5159_v30 }
 0x2c4   : > { %v5152_v1 = vpop.permute.xlu1 %2430 }
 0x2c5   : > { %6840 = vst [vmem:[#allocation165_spill] sm:$0xff] %v5152_v1  ;;  %2253 = vrot.lane.b32.xlu1 %v2238_v26, %s3821_s10  ;;  %3024 = vrot.lane.b32.xlu0 %v3019_v18, %s3827_s27  ;;  %v2560_v26 = vmul.f32 %v4129_v37, %v6812_v34  ;;  %v549_v18 = vmul.f32 %v4344_v46, %v4105_v27  ;;  %v2606_v34 = vmul.f32 0.0, %v4291_v2 }
 0x2c6   : > { %v5167_v61 = vpop.permute.xlu0 %2522 }
 0x2c7   : > { %6843 = vst [vmem:[#allocation168_spill] sm:$0xff] %v5167_v61  ;;  %v2608_v61 = vmul.f32 %v4129_v37, %v4312_v6  ;;  %v2928_v6 = vmul.f32 %v4162_v38, %v6831_v17 }
 0x2c8   : > { %v5161_v62 = vpop.permute.xlu1 %2434 }
 0x2c9   : > { %6842 = vst [vmem:[#allocation167_spill] sm:$0xff] %v5161_v62  ;;  %2257 = vrot.lane.b32.xlu1 %v2240_v49, %s3821_s10  ;;  %520 = vperm.xlu0 %3738, %v3757_v42   ;;  %v2604_v62 = vmul.f32 %v4291_v2, %v4105_v27  ;;  %v551_v42 = vmul.f32 0.0, %v4354_v3 }
 0x2ca   : > { %v5179_v49 = vpop.permute.xlu0 %2799 }
 0x2cb   : > { %6845 = vst [vmem:[#allocation170_spill] sm:$0xff] %v5179_v49 }
 0x2cc   : > { %v5169_v1 = vpop.permute.xlu1 %2474 }
 0x2cd   : > { %6844 = vst [vmem:[#allocation169_spill] sm:$0xff] %v5169_v1  ;;  %2288 = vrot.lane.b32.xlu1 %v2285_v39, %s3825_s14  ;;  %562 = vrot.lane.b32.xlu0 %v549_v18, %s3810_s16  ;;  %v553_v18 = vmul.f32 %v4129_v37, %v4354_v3  ;;  %v2650_v1 = vrot.slane %v5093_v28, %v4715_v21  ;;  %v2930_v28 = vmul.f32 0.0, %v6831_v17 }
 0x2ce   : > { %v5188_v39 = vpop.permute.xlu0 %2803 }
 0x2cf   : > { %6847 = vst [vmem:[#allocation172_spill] sm:$0xff] %v5188_v39  ;;  %v2881_v39 = vmul.f32 %v4129_v37, %v4302_v45  ;;  %v2927_v45 = vmul.f32 0.0, %v6822_v19 }
 0x2d0   : > { %v5181_v20 = vpop.permute.xlu1 %2751 }
 0x2d1   : > { %6846 = vst [vmem:[#allocation171_spill] sm:$0xff] %v5181_v20  ;;  %2576 = vrot.lane.b32.xlu1 %v2560_v26, %s3820_s22  ;;  %566 = vrot.lane.b32.xlu0 %v551_v42, %s3810_s16  ;;  %v598_v42 = vmul.f32 %v4366_v4, %v4105_v27 }
 0x2d2   : > { %v5197_v49 = vpop.permute.xlu0 %2843 }
 0x2d3   : > { %6849 = vst [vmem:[#allocation174_spill] sm:$0xff] %v5197_v49  ;;  %v2925_v49 = vmul.f32 %v6822_v19, %v4105_v27 }
 0x2d4   : > { %v5190_v30 = vpop.permute.xlu1 %2755 }
 0x2d5   : > { %6848 = vst [vmem:[#allocation173_spill] sm:$0xff] %v5190_v30  ;;  %2616 = vrot.lane.b32.xlu1 %v2604_v62, %s3821_s10  ;;  %570 = vrot.lane.b32.xlu0 %v553_v18, %s3810_s16  ;;  %v6853_v18 = vld [vmem:[#allocation22_spill] sm:$0xff] }
 0x2d6   : > { %v5207_v62 = vpop.permute.xlu0 %1885  ;;  %v600_v30 = vmul.f32 0.0, %v6853_v18 }
 0x2d7   : > { %6851 = vst [vmem:[#allocation176_spill] sm:$0xff] %v5207_v62 }
 0x2d8   : > { %v5199_v26 = vpop.permute.xlu1 %2795 }
 0x2d9   : > { %6850 = vst [vmem:[#allocation175_spill] sm:$0xff] %v5199_v26  ;;  %2620 = vrot.lane.b32.xlu1 %v2606_v34, %s3821_s10  ;;  %611 = vrot.lane.b32.xlu0 %v598_v42, %s3815_s17  ;;  %v602_v42 = vmul.f32 %v4129_v37, %v6853_v18 }
 0x2da   : > { %v5216_v34 = vpop.permute.xlu0 %1889 }
 0x2dc   : > { %v5209_v2 = vpop.permute.xlu1 %1526 }
 0x2dd   : > { %6852 = vst [vmem:[#allocation177_spill] sm:$0xff] %v5209_v2  ;;  %2897 = vrot.lane.b32.xlu1 %v2881_v39, %s3819_s21  ;;  %615 = vrot.lane.b32.xlu0 %v600_v30, %s3815_s17  ;;  %v647_v30 = vmul.f32 %v4387_v53, %v4105_v27 }
 0x2de   : > { %v5225_v20 = vpop.permute.xlu0 %1920 }
 0x2df   : > { %6854 = vst [vmem:[#allocation22_spill] sm:$0xff] %v5225_v20 }
 0x2e0   : > { %v5218_v26 = vpop.permute.xlu1 %1530 }
 0x2e1   : > { %2937 = vrot.lane.b32.xlu1 %v2925_v49, %s3820_s22  ;;  %619 = vrot.lane.b32.xlu0 %v602_v42, %s3815_s17  ;;  %v649_v42 = vmul.f32 0.0, %v4412_v52 }
 0x2e2   : > { %v5235_v49 = vpop.permute.xlu0 %2207 }
 0x2e3   : > { %6856 = vst [vmem:[#allocation179_spill] sm:$0xff] %v5235_v49 }
 0x2e4   : > { %v5227_v39 = vpop.permute.xlu1 %1561 }
 0x2e5   : > { %6855 = vst [vmem:[#allocation178_spill] sm:$0xff] %v5227_v39  ;;  %2941 = vrot.lane.b32.xlu1 %v2927_v45, %s3820_s22  ;;  %660 = vrot.lane.b32.xlu0 %v647_v30, %s3816_s18  ;;  %v651_v30 = vmul.f32 %v4129_v37, %v4412_v52 }
 0x2e6   : > { %v5244_v45 = vpop.permute.xlu0 %2247 }
 0x2e7   : > { %6858 = vst [vmem:[#allocation181_spill] sm:$0xff] %v5244_v45 }
 0x2e8   : > { %v5237_v19 = vpop.permute.xlu1 %1839 }
 0x2e9   : > { %6857 = vst [vmem:[#allocation180_spill] sm:$0xff] %v5237_v19  ;;  %2624 = vrot.lane.b32.xlu1 %v2608_v61, %s3821_s10  ;;  %664 = vrot.lane.b32.xlu0 %v649_v42, %s3816_s18  ;;  %v702_v42 = vmul.f32 %v4421_v0, %v4149_v25 }
 0x2ea   : > { %v5254_v61 = vpop.permute.xlu0 %2251 }
 0x2eb   : > { %6860 = vst [vmem:[#allocation183_spill] sm:$0xff] %v5254_v61  ;;  %v2974_v61 = vmul.f32 %v6834_v31, %v4149_v25  ;;  %v2978_v31 = vmul.f32 0.0, %v4333_v63 }
 0x2ec   : > { %v5246_v23 = vpop.permute.xlu1 %1879 }
 0x2ed   : > { %6859 = vst [vmem:[#allocation182_spill] sm:$0xff] %v5246_v23  ;;  %2655 = vrot.lane.b32.xlu1 %v2650_v1, %s3826_s24  ;;  %668 = vrot.lane.b32.xlu0 %v651_v30, %s3816_s18 }
 0x2ee   : > { %v5263_v1 = vpop.permute.xlu0 %2528 }
 0x2ef   : > { %6862 = vst [vmem:[#allocation185_spill] sm:$0xff] %v5263_v1 }
 0x2f0   : > { %v5256_v49 = vpop.permute.xlu1 %1883 }
 0x2f1   : > { %6861 = vst [vmem:[#allocation184_spill] sm:$0xff] %v5256_v49  ;;  %2943 = vrot.lane.b32.xlu1 %v2928_v6, %s3820_s22  ;;  %715 = vrot.lane.b32.xlu0 %v702_v42, %s3819_s21  ;;  %v6864_v49 = vld [vmem:[#allocation26_spill] sm:$0xff]  ;;  %v2976_v42 = vmul.f32 %v4162_v38, %v4333_v63 }
 0x2f2   : > { %v704_v30 = vmul.f32 %v4162_v38, %v6864_v49  ;;  %v5273_v6 = vpop.permute.xlu0 %2568  ;;  %v706_v1 = vmul.f32 0.0, %v6864_v49 }
 0x2f3   : > { %6865 = vst [vmem:[#allocation26_spill] sm:$0xff] %v5273_v6 }
 0x2f4   : > { %v5265_v21 = vpop.permute.xlu1 %2159 }
 0x2f5   : > { %6863 = vst [vmem:[#allocation186_spill] sm:$0xff] %v5265_v21  ;;  %2947 = vrot.lane.b32.xlu1 %v2930_v28, %s3820_s22  ;;  %719 = vrot.lane.b32.xlu0 %v704_v30, %s3819_s21  ;;  %v751_v30 = vmul.f32 %v4442_v56, %v4149_v25 }
 0x2f6   : > { %v5282_v28 = vpop.permute.xlu0 %2572 }
 0x2f7   : > { %6867 = vst [vmem:[#allocation188_spill] sm:$0xff] %v5282_v28  ;;  %v3023_v28 = vrot.slane %v5144_v14, %v4576_v58  ;;  %v3758_v14 = vld [vmem:[%s6453_s2 + $0x8] sm:$0xff] }
 0x2f8   : > { %v5275_v17 = vpop.permute.xlu1 %2199 }
 0x2f9   : > { %6866 = vst [vmem:[#allocation187_spill] sm:$0xff] %v5275_v17  ;;  %2987 = vrot.lane.b32.xlu1 %v2974_v61, %s3821_s10  ;;  %723 = vrot.lane.b32.xlu0 %v706_v1, %s3819_s21  ;;  %v753_v1 = vmul.f32 %v4162_v38, %v4483_v54  ;;  %v925_v17 = vsel %vm572_vm4, %v4492_v13, %v4502_v59 }
 0x2fa   : > { %v5291_v6 = vpop.permute.xlu0 %2849 }
 0x2fb   : > { %6869 = vst [vmem:[#allocation190_spill] sm:$0xff] %v5291_v6  ;;  %v755_v6 = vmul.f32 0.0, %v4483_v54 }
 0x2fc   : > { %v5284_v21 = vpop.permute.xlu1 %2203 }
 0x2fd   : > { %6868 = vst [vmem:[#allocation189_spill] sm:$0xff] %v5284_v21  ;;  %2991 = vrot.lane.b32.xlu1 %v2976_v42, %s3821_s10  ;;  %764 = vrot.lane.b32.xlu0 %v751_v30, %s3820_s22 }
 0x2fe   : > { %v5301_v42 = vpop.permute.xlu0 %2889 }
 0x2ff   : > { %6871 = vst [vmem:[#allocation192_spill] sm:$0xff] %v5301_v42  ;;  %v6875_v42 = vld [vmem:[#allocation29_spill] sm:$0xff] }
 0x300   : > { %v5293_v61 = vpop.permute.xlu1 %2480 }
 0x301   : > { %6870 = vst [vmem:[#allocation191_spill] sm:$0xff] %v5293_v61  ;;  %2995 = vrot.lane.b32.xlu1 %v2978_v31, %s3821_s10  ;;  %768 = vrot.lane.b32.xlu0 %v753_v1, %s3820_s22  ;;  %v548_v31 = vmul.f32 0.0, %v4344_v46  ;;  %v800_v1 = vmul.f32 %v6875_v42, %v4149_v25  ;;  %v6883_v42 = vld [vmem:[#allocation40_spill] sm:$0xff] }
 0x302   : > { %v5308_v21 = vpop.permute.xlu0 %2893  ;;  %v1020_v13 = vsel %vm670_vm6, %v4588_v29, %v6883_v42 }
 0x303   : > { %6873 = vst [vmem:[#allocation194_spill] sm:$0xff] %v5308_v21 }
 0x304   : > { %v5303_v63 = vpop.permute.xlu1 %2520 }
 0x305   : > { %6872 = vst [vmem:[#allocation193_spill] sm:$0xff] %v5303_v63  ;;  %3026 = vrot.lane.b32.xlu1 %v3023_v28, %s3827_s27  ;;  %772 = vrot.lane.b32.xlu0 %v755_v6, %s3820_s22  ;;  %v6876_v28 = vld [vmem:[#allocation27_spill] sm:$0xff]  ;;  %v6879_v6 = vld [vmem:[#allocation20_spill] sm:$0xff] }
 0x306   : > { %v924_v61 = vsel %vm572_vm4, %v6876_v28, %v4460_v40  ;;  %v5322_v21 = vpop.permute.xlu0 %2255  ;;  %v880_v63 = vmul.f32 %v6879_v6, %v4105_v27  ;;  %v802_v28 = vmul.f32 %v4162_v38, %v4550_v48 }
 0x307   : > { %6877 = vst [vmem:[#allocation196_spill] sm:$0xff] %v5322_v21  ;;  %v972_v21 = vsel %vm621_vm5, %v4390_v51, %v4520_v7 }
 0x308   : > { %v5310_v30 = vpop.permute.xlu1 %2524  ;;  %v934_v40 = vadd.f32 %v924_v61, %v880_v63  ;;  %v6885_v63 = vld [vmem:[#allocation51_spill] sm:$0xff] }
 0x309   : > { %6874 = vst [vmem:[#allocation195_spill] sm:$0xff] %v5310_v30  ;;  %525 = vperm.xlu1 %3739, %v3758_v14   ;;  %813 = vrot.lane.b32.xlu0 %v800_v1, %s3821_s10  ;;  %v6880_v14 = vld [vmem:[#allocation21_spill] sm:$0xff] }
 0x30a   : > { %v882_v45 = vmul.f32 0.0, %v6880_v14  ;;  %v6881_v1 = vld [vmem:[#allocation37_spill] sm:$0xff]  ;;  %v5347_v59 = vpop.permute.xlu0 %2286  ;;  %v982_v51 = vadd.f32 %v972_v21, %v934_v40  ;;  %v884_v61 = vmul.f32 %v4129_v37, %v6880_v14  ;;  %v804_v21 = vmul.f32 0.0, %v4550_v48 }
 0x30b   : > { %v5366_v40 = vld [vmem:[%s6454_s3] ss:$8 sm:$0x3] }
 0x30c   : > { %v5324_v30 = vpop.permute.xlu1 %2801  ;;  %v936_v7 = vadd.f32 %v925_v17, %v882_v45 }
 0x30d   : > { %6878 = vst [vmem:[#allocation197_spill] sm:$0xff] %v5324_v30  ;;  %560 = vrot.lane.b32.xlu1 %v548_v31, %s3810_s16  ;;  %v550_v30 = vmul.f32 %v4344_v46, %v4149_v25  ;;  %v6882_v31 = vld [vmem:[#allocation63_spill] sm:$0xff]  ;;  %817 = vrot.lane.b32.xlu0 %v802_v28, %s3821_s10  ;;  %v552_v46 = vmul.f32 %v4162_v38, %v4354_v3 }
 0x30e   : > { %v973_v54 = vsel %vm621_vm5, %v6882_v31, %v6881_v1  ;;  %v1021_v31 = vsel %vm670_vm6, %v4645_v8, %v6885_v63  ;;  %v6886_v1 = vld [vmem:[#allocation53_spill] sm:$0xff]  ;;  %6887 = vst [vmem:[#allocation63_spill] sm:$0xff] %v5366_v40  ;;  %v1030_v3 = vadd.f32 %v1020_v13, %v982_v51  ;;  %v1115_v8 = vsel %vm774_vm8, %v4766_v44, %v4624_v10  ;;  %v6896_v44 = vld [vmem:[#allocation46_spill] sm:$0xff] }
 0x30f   : > { %v1067_v45 = vsel %vm725_vm7, %v6886_v1, %v4664_v11  ;;  %v984_v17 = vadd.f32 %v973_v54, %v936_v7  ;;  %v849_v7 = vrot.slane %v5366_v40, %v4576_v58  ;;  %v597_v51 = vmul.f32 0.0, %v4366_v4  ;;  %v6897_v10 = vld [vmem:[#allocation70_spill] sm:$0xff] }
 0x310   : > { %v5349_v6 = vpop.permute.xlu1 %2841  ;;  %v1078_v11 = vadd.f32 %v1067_v45, %v1030_v3  ;;  %v599_v54 = vmul.f32 %v4366_v4, %v4149_v25  ;;  %v1163_v13 = vsel %vm823_vm9, %v4888_v55, %v4754_v32  ;;  %v6892_v45 = vld [vmem:[#allocation35_spill] sm:$0xff]  ;;  %v6894_v3 = vld [vmem:[#allocation65_spill] sm:$0xff]  ;;  %v1341_v4 = vsel %vm621_vm5, %v4617_v60, %v6896_v44 }
 0x311   : > { %6884 = vst [vmem:[#allocation21_spill] sm:$0xff] %v5349_v6  ;;  %564 = vrot.lane.b32.xlu1 %v550_v30, %s3810_s16  ;;  %v6888_v30 = vld [vmem:[#allocation31_spill] sm:$0xff]  ;;  %v5373_v6 = vpop.permute.xlu0 %2574  ;;  %v1032_v1 = vadd.f32 %v1021_v31, %v984_v17  ;;  %821 = vrot.lane.b32.xlu0 %v804_v21, %s3821_s10  ;;  %v6893_v17 = vld [vmem:[#allocation56_spill] sm:$0xff]  ;;  %v1070_v55 = vsel %vm725_vm7, %v4756_v57, %v6897_v10  ;;  %v6903_v60 = vld [vmem:[#allocation57_spill] sm:$0xff] }
 0x312   : > { %v938_v28 = vadd.f32 %v6888_v30, %v884_v61  ;;  %6889 = vst [vmem:[#allocation31_spill] sm:$0xff] %v5373_v6  ;;  %v6891_v61 = vld [vmem:[#allocation30_spill] sm:$0xff]  ;;  %v1293_v21 = vsel %vm572_vm4, %v6893_v17, %v6892_v45  ;;  %v5404_v32 = vsel %vm1194_vm10, %v5048_v47, %v4909_v41  ;;  %vm3228_vm10 = vcmask 1041408  }
 0x313   : > { %v1249_v31 = vmul.f32 %v6891_v61, %v4105_v27  ;;  %6898 = vst [vmem:[#allocation30_spill] sm:$0xff] %v5404_v32 }
 0x314   : > { %v5375_v63 = vpop.permute.xlu1 %2845  ;;  %v986_v58 = vadd.f32 %v6894_v3, %v938_v28  ;;  %v6902_v3 = vld [vmem:[#allocation68_spill] sm:$0xff] }
 0x315   : > { %6890 = vst [vmem:[#allocation198_spill] sm:$0xff] %v5375_v63  ;;  %568 = vrot.lane.b32.xlu1 %v552_v46, %s3810_s16  ;;  %v1126_v63 = vadd.f32 %v1115_v8, %v1078_v11  ;;  %v6895_v46 = vld [vmem:[#allocation42_spill] sm:$0xff]  ;;  %v5406_v40 = vpop.permute.xlu0 %2578  ;;  %s3828_s16 = smov 77   ;;  %v1303_v10 = vadd.f32 %v1293_v21, %v1249_v31 }
 0x316   : > { %v1294_v6 = vsel %vm572_vm4, %v4598_v5, %v6895_v46  ;;  %6899 = vst [vmem:[#allocation35_spill] sm:$0xff] %v5406_v40  ;;  %v6901_v11 = vld [vmem:[#allocation34_spill] sm:$0xff]  ;;  %v1080_v5 = vadd.f32 %v6902_v3, %v1032_v1  ;;  %v1034_v46 = vadd.f32 %v4654_v36, %v986_v58  ;;  %852 = vrot.lane.b32.xlu0 %v849_v7, %s3828_s16 }
 0x317   : > { %v1251_v8 = vmul.f32 0.0, %v6901_v11  ;;  %v1174_v42 = vadd.f32 %v1163_v13, %v1126_v63  ;;  %v1253_v57 = vmul.f32 %v4129_v37, %v6901_v11  ;;  %v6904_v40 = vld [vmem:[#allocation82_spill] sm:$0xff]  ;;  %v1118_v1 = vsel %vm774_vm8, %v4878_v43, %v4740_v24 }
 0x318   : > { %v5408_v28 = vpop.permute.xlu1 %1887  ;;  %v1342_v48 = vsel %vm621_vm5, %v6904_v40, %v6903_v60  ;;  %v1128_v63 = vadd.f32 %v4730_v16, %v1080_v5  ;;  %v1082_v13 = vadd.f32 %v1070_v55, %v1034_v46  ;;  %v1351_v58 = vadd.f32 %v1341_v4, %v1303_v10  ;;  %v6906_v31 = vld [vmem:[#allocation86_spill] sm:$0xff]  ;;  %v6910_v4 = vld [vmem:[#allocation69_spill] sm:$0xff]  ;;  %v6935_v16 = vld [vmem:[#allocation152_spill] sm:$0xff] }
 0x319   : > { %6900 = vst [vmem:[#allocation46_spill] sm:$0xff] %v5408_v28  ;;  %609 = vrot.lane.b32.xlu1 %v597_v51, %s3815_s17  ;;  %v1305_v3 = vadd.f32 %v1294_v6, %v1251_v8  ;;  %v1200_v7 = vmul.f32 %v5404_v32, %v1174_v42  ;;  %v6905_v51 = vld [vmem:[#allocation60_spill] sm:$0xff]  ;;  %v6907_v36 = vld [vmem:[#allocation74_spill] sm:$0xff]  ;;  %v1166_v40 = vsel %vm823_vm9, %v5038_v50, %v4899_v12  ;;  %v5434_v24 = vpop.permute.xlu0 %2618  ;;  %v6911_v5 = vld [vmem:[#allocation77_spill] sm:$0xff] }
 0x31a   : > { %v1389_v21 = vsel %vm670_vm6, %v6906_v31, %v6905_v51  ;;  %v1390_v17 = vsel %vm670_vm6, %v6907_v36, %v4784_v33  ;;  %6908 = vst [vmem:[#allocation70_spill] sm:$0xff] %v5434_v24  ;;  %v1176_v42 = vadd.f32 %v4886_v9, %v1128_v63  ;;  %v1130_v46 = vadd.f32 %v1118_v1, %v1082_v13  ;;  %v6912_v12 = vld [vmem:[#allocation105_spill] sm:$0xff]  ;;  %v6913_v1 = vld [vmem:[#allocation103_spill] sm:$0xff]  ;;  %v6926_v9 = vld [vmem:[#allocation126_spill] sm:$0xff] }
 0x31b   : > { %v1353_v55 = vadd.f32 %v1342_v48, %v1305_v3  ;;  %1213 = vrot.lane.b32.xlu0 %v1200_v7, %s3829_s15  ;;  %v601_v36 = vmul.f32 %v4162_v38, %v6853_v18  ;;  %v1307_v8 = vadd.f32 %v6910_v4, %v1253_v57  ;;  %v1436_v10 = vsel %vm725_vm7, %v6912_v12, %v6911_v5  ;;  %v6914_v63 = vld [vmem:[#allocation127_spill] sm:$0xff]  ;;  %v6917_v18 = vld [vmem:[#allocation84_spill] sm:$0xff]  ;;  %v6925_v12 = vld [vmem:[#allocation101_spill] sm:$0xff] }
 0x31c   : > { %v5436_v6 = vpop.permute.xlu1 %1918  ;;  %v1399_v24 = vadd.f32 %v1389_v21, %v1351_v58  ;;  %v1178_v48 = vadd.f32 %v1166_v40, %v1130_v46  ;;  %v1202_v3 = vmul.f32 %v5048_v47, %v1176_v42  ;;  %v1484_v13 = vsel %vm774_vm8, %v6914_v63, %v6913_v1  ;;  %v6919_v40 = vld [vmem:[#allocation11_spill] sm:$0xff]  ;;  %v6921_v46 = vld [vmem:[#allocation48_spill] sm:$0xff]  ;;  %v6923_v1 = vld [vmem:[#allocation62_spill] sm:$0xff] }
 0x31d   : > { %6909 = vst [vmem:[#allocation34_spill] sm:$0xff] %v5436_v6  ;;  %613 = vrot.lane.b32.xlu1 %v599_v54, %s3815_s17  ;;  %v1401_v32 = vadd.f32 %v1390_v17, %v1353_v55  ;;  %v5451_v7 = vpop.permute.xlu0 %2895  ;;  %v1355_v33 = vadd.f32 %v6917_v18, %v1307_v8  ;;  %v6918_v17 = vld [vmem:[#allocation23_spill] sm:$0xff]  ;;  %v646_v21 = vmul.f32 0.0, %v4387_v53  ;;  %v1532_v55 = vsel %vm823_vm9, %v6919_v40, %v5076_v15  ;;  %v6924_v63 = vld [vmem:[#allocation88_spill] sm:$0xff]  ;;  %v6933_v60 = vld [vmem:[#allocation109_spill] sm:$0xff] }
 0x31e   : > { %6915 = vst [vmem:[#allocation82_spill] sm:$0xff] %v5451_v7  ;;  %v1447_v57 = vadd.f32 %v1436_v10, %v1399_v24  ;;  %v1618_v58 = vmul.f32 %v6918_v17, %v4105_v27  ;;  %v6920_v42 = vld [vmem:[#allocation75_spill] sm:$0xff]  ;;  %v1204_v24 = vmul.f32 %v4909_v41, %v1178_v48  ;;  %v1663_v5 = vsel %vm572_vm4, %v6924_v63, %v6923_v1  ;;  %v6931_v63 = vld [vmem:[#allocation66_spill] sm:$0xff] }
 0x31f   : > { %1217 = vrot.lane.b32.xlu0 %v1202_v3, %s3829_s15  ;;  %v1662_v7 = vsel %vm572_vm4, %v6921_v46, %v6920_v42  ;;  %v6922_v10 = vld [vmem:[#allocation99_spill] sm:$0xff]  ;;  %v1439_v15 = vsel %vm725_vm7, %v6926_v9, %v6925_v12  ;;  %v5479_v40 = vsel %vm1563_vm11, %v5074_v22, %v5227_v39  ;;  %v6932_v9 = vld [vmem:[#allocation93_spill] sm:$0xff]  ;;  %vm3218_vm11 = vcmask 15360  }
 0x320   : > { %v5453_v54 = vpop.permute.xlu1 %2205  ;;  %v1495_v8 = vadd.f32 %v1484_v13, %v1447_v57  ;;  %v1449_v3 = vadd.f32 %v6922_v10, %v1401_v32  ;;  %6927 = vst [vmem:[#allocation86_spill] sm:$0xff] %v5479_v40  ;;  %v6929_v32 = vld [vmem:[#allocation76_spill] sm:$0xff]  ;;  %v6930_v10 = vld [vmem:[#allocation25_spill] sm:$0xff]  ;;  %v1672_v12 = vadd.f32 %v1662_v7, %v1618_v58  ;;  %v1710_v1 = vsel %vm621_vm5, %v6932_v9, %v6931_v63  ;;  %v6937_v58 = vld [vmem:[#allocation83_spill] sm:$0xff] }
 0x321   : > { %6916 = vst [vmem:[#allocation60_spill] sm:$0xff] %v5453_v54  ;;  %617 = vrot.lane.b32.xlu1 %v601_v36, %s3815_s17  ;;  %v648_v36 = vmul.f32 %v4387_v53, %v4149_v25  ;;  %v5481_v13 = vpop.permute.xlu0 %2899  ;;  %v1403_v57 = vadd.f32 %v6929_v32, %v1355_v33  ;;  %v1620_v53 = vmul.f32 0.0, %v6930_v10  ;;  %v6936_v33 = vld [vmem:[#allocation15_spill] sm:$0xff]  ;;  %v1622_v7 = vmul.f32 %v4129_v37, %v6930_v10  ;;  %s3830_s17 = smov 126  }
 0x322   : > { %6928 = vst [vmem:[#allocation74_spill] sm:$0xff] %v5481_v13  ;;  %v1497_v41 = vadd.f32 %v5058_v35, %v1449_v3  ;;  %v1543_v50 = vadd.f32 %v1532_v55, %v1495_v8  ;;  %v6934_v13 = vld [vmem:[#allocation79_spill] sm:$0xff]  ;;  %v1487_v32 = vsel %vm774_vm8, %v6936_v33, %v6935_v16 }
 0x323   : > { %1221 = vrot.lane.b32.xlu0 %v1204_v24, %s3829_s15  ;;  %v1711_v18 = vsel %vm621_vm5, %v6934_v13, %v6933_v60  ;;  %v1674_v43 = vadd.f32 %v1663_v5, %v1620_v53  ;;  %v1451_v3 = vadd.f32 %v1439_v15, %v1403_v57  ;;  %v6939_v35 = vld [vmem:[#allocation151_spill] sm:$0xff]  ;;  %v1720_v15 = vadd.f32 %v1710_v1, %v1672_v12  ;;  %v6942_v57 = vld [vmem:[#allocation132_spill] sm:$0xff]  ;;  %v6943_v53 = vld [vmem:[#allocation106_spill] sm:$0xff] }
 0x324   : > { %v5483_v48 = vpop.permute.xlu1 %2209  ;;  %v1545_v55 = vadd.f32 %v5209_v2, %v1497_v41  ;;  %v1569_v8 = vmul.f32 %v5479_v40, %v1543_v50  ;;  %v1535_v13 = vsel %vm823_vm9, %v6939_v35, %v5218_v26  ;;  %v650_v50 = vmul.f32 %v4162_v38, %v4412_v52  ;;  %v6944_v26 = vld [vmem:[#allocation90_spill] sm:$0xff] }
 0x325   : > { %658 = vrot.lane.b32.xlu1 %v646_v21, %s3816_s18  ;;  %v6938_v21 = vld [vmem:[#allocation111_spill] sm:$0xff]  ;;  %v5509_v60 = vpop.permute.xlu0 %2939  ;;  %v1722_v5 = vadd.f32 %v1711_v18, %v1674_v43  ;;  %v1499_v41 = vadd.f32 %v1487_v32, %v1451_v3  ;;  %v1795_v40 = vsel %vm725_vm7, %v6943_v53, %v6942_v57  ;;  %v1676_v2 = vadd.f32 %v6944_v26, %v1622_v7  ;;  %v6946_v18 = vld [vmem:[#allocation133_spill] sm:$0xff]  ;;  %v6949_v52 = vld [vmem:[#allocation10_spill] sm:$0xff] }
 0x326   : > { %v1749_v24 = vsel %vm670_vm6, %v6938_v21, %v6937_v58  ;;  %6940 = vst [vmem:[#allocation69_spill] sm:$0xff] %v5509_v60  ;;  %v1571_v35 = vmul.f32 %v5074_v22, %v1545_v55  ;;  %v6945_v43 = vld [vmem:[#allocation159_spill] sm:$0xff]  ;;  %v701_v7 = vmul.f32 %v4421_v0, %v4105_v27  ;;  %v6950_v55 = vld [vmem:[#allocation158_spill] sm:$0xff]  ;;  %v6983_v57 = vld [vmem:[#allocation137_spill] sm:$0xff] }
 0x327   : > { %1582 = vrot.lane.b32.xlu0 %v1569_v8, %s3830_s17  ;;  %v1758_v60 = vadd.f32 %v1749_v24, %v1720_v15  ;;  %v1547_v1 = vadd.f32 %v1535_v13, %v1499_v41  ;;  %v1843_v32 = vsel %vm774_vm8, %v6946_v18, %v6945_v43  ;;  %v1760_v8 = vadd.f32 %v6949_v52, %v1722_v5  ;;  %v6951_v13 = vld [vmem:[#allocation81_spill] sm:$0xff]  ;;  %v6952_v41 = vld [vmem:[#allocation155_spill] sm:$0xff] }
 0x328   : > { %v5511_v16 = vpop.permute.xlu1 %2249  ;;  %v1891_v24 = vsel %vm823_vm9, %v5246_v23, %v6950_v55  ;;  %v1724_v15 = vadd.f32 %v6951_v13, %v1676_v2  ;;  %v6954_v5 = vld [vmem:[#allocation131_spill] sm:$0xff]  ;;  %v6958_v23 = vld [vmem:[#allocation130_spill] sm:$0xff]  ;;  %v7008_v53 = vld [vmem:[#allocation181_spill] sm:$0xff] }
 0x329   : > { %6941 = vst [vmem:[#allocation23_spill] sm:$0xff] %v5511_v16  ;;  %662 = vrot.lane.b32.xlu1 %v648_v36, %s3816_s18  ;;  %v5525_v12 = vpop.permute.xlu0 %2622  ;;  %v1806_v3 = vadd.f32 %v1795_v40, %v1758_v60  ;;  %v1573_v60 = vmul.f32 %v5227_v39, %v1547_v1  ;;  %v6953_v40 = vld [vmem:[#allocation157_spill] sm:$0xff]  ;;  %v6959_v1 = vld [vmem:[#allocation156_spill] sm:$0xff] }
 0x32a   : > { %6947 = vst [vmem:[#allocation75_spill] sm:$0xff] %v5525_v12  ;;  %v1808_v12 = vadd.f32 %v6952_v41, %v1760_v8  ;;  %v1762_v2 = vadd.f32 %v6958_v23, %v1724_v15  ;;  %v1894_v15 = vsel %vm823_vm9, %v5408_v28, %v5216_v34  ;;  %v6978_v28 = vld [vmem:[#allocation117_spill] sm:$0xff]  ;;  %v6982_v23 = vld [vmem:[#allocation47_spill] sm:$0xff]  ;;  %v6989_v39 = vld [vmem:[#allocation36_spill] sm:$0xff] }
 0x32b   : > { %1586 = vrot.lane.b32.xlu0 %v1571_v35, %s3830_s17  ;;  %v1854_v18 = vadd.f32 %v1843_v32, %v1806_v3  ;;  %v1798_v35 = vsel %vm725_vm7, %v6954_v5, %v6953_v40  ;;  %v1846_v32 = vsel %vm774_vm8, %v5237_v19, %v6959_v1  ;;  %v703_v3 = vmul.f32 0.0, %v4421_v0  ;;  %v6960_v40 = vld [vmem:[#allocation154_spill] sm:$0xff] }
 0x32c   : > { %v5527_v36 = vpop.permute.xlu1 %2526  ;;  %v1810_v8 = vadd.f32 %v1798_v35, %v1762_v2  ;;  %v1856_v41 = vadd.f32 %v6960_v40, %v1808_v12  ;;  %v705_v0 = vmul.f32 %v4129_v37, %v6864_v49  ;;  %v5591_v49 = vmul.f32 %v4162_v38, %v6880_v14  ;;  %v6971_v14 = vld [vmem:[#allocation113_spill] sm:$0xff]  ;;  %v6979_v40 = vld [vmem:[#allocation110_spill] sm:$0xff] }
 0x32d   : > { %6948 = vst [vmem:[#allocation48_spill] sm:$0xff] %v5527_v36  ;;  %666 = vrot.lane.b32.xlu1 %v650_v50, %s3816_s18  ;;  %v5546_v50 = vsel %vm670_vm6, %v5436_v6, %v5225_v20  ;;  %v5548_v43 = vpop.permute.xlu0 %2626  ;;  %v1902_v55 = vadd.f32 %v1891_v24, %v1854_v18  ;;  %s3831_s18 = smov 125   ;;  %v754_v36 = vmul.f32 %v4129_v37, %v6982_v23 }
 0x32e   : > { %6955 = vst [vmem:[#allocation88_spill] sm:$0xff] %v5546_v50  ;;  %6956 = vst [vmem:[#allocation101_spill] sm:$0xff] %v5548_v43 }
 0x32f   : > { %1590 = vrot.lane.b32.xlu0 %v1573_v60, %s3830_s17  ;;  %v1927_v43 = vmul.f32 %v5546_v50, %v1902_v55  ;;  %v1858_v60 = vadd.f32 %v1846_v32, %v1810_v8  ;;  %v6967_v32 = vld [vmem:[#allocation20_spill] sm:$0xff]  ;;  %v5597_v8 = vmul.f32 %v6918_v17, %v4149_v25 }
 0x330   : > { %v5550_v52 = vpop.permute.xlu1 %2530 }
 0x331   : > { %6957 = vst [vmem:[#allocation25_spill] sm:$0xff] %v5550_v52  ;;  %713 = vrot.lane.b32.xlu1 %v701_v7, %s3819_s21  ;;  %v5564_v18 = vpop.permute.xlu0 %2657  ;;  %v1904_v7 = vadd.f32 %v5207_v62, %v1856_v41  ;;  %v1906_v12 = vadd.f32 %v1894_v15, %v1858_v60  ;;  %v750_v41 = vmul.f32 %v4442_v56, %v4105_v27  ;;  %v6968_v60 = vld [vmem:[#allocation96_spill] sm:$0xff]  ;;  %v6977_v62 = vld [vmem:[#allocation89_spill] sm:$0xff]  ;;  %v5638_v52 = vmul.f32 0.0, %v6891_v61 }
 0x332   : > { %6961 = vst [vmem:[#allocation66_spill] sm:$0xff] %v5564_v18  ;;  %v5601_v15 = vmul.f32 %v4162_v38, %v6930_v10  ;;  %v6973_v10 = vld [vmem:[#allocation28_spill] sm:$0xff] }
 0x333   : > { %1940 = vrot.lane.b32.xlu0 %v1927_v43, %s3831_s18  ;;  %v1929_v55 = vmul.f32 %v5436_v6, %v1904_v7  ;;  %v1931_v43 = vmul.f32 %v5225_v20, %v1906_v12  ;;  %v752_v7 = vmul.f32 0.0, %v4442_v56  ;;  %v5623_v20 = vmul.f32 %v4162_v38, %v6973_v10 }
 0x334   : > { %v5566_v24 = vpop.permute.xlu1 %2570 }
 0x335   : > { %6962 = vst [vmem:[#allocation93_spill] sm:$0xff] %v5566_v24  ;;  %717 = vrot.lane.b32.xlu1 %v703_v3, %s3819_s21  ;;  %v5574_v35 = vpop.permute.xlu0 %2945  ;;  %v881_v3 = vmul.f32 %v6967_v32, %v4149_v25  ;;  %6976 = vst [vmem:[#allocation157_spill] sm:$0xff] %v5623_v20  ;;  %v5661_v20 = vmul.f32 %v6989_v39, %v4105_v27 }
 0x336   : > { %6963 = vst [vmem:[#allocation79_spill] sm:$0xff] %v5574_v35 }
 0x337   : > { %1944 = vrot.lane.b32.xlu0 %v1929_v55, %s3831_s18  ;;  %v6970_v55 = vld [vmem:[#allocation85_spill] sm:$0xff]  ;;  %6990 = vst [vmem:[#allocation96_spill] sm:$0xff] %v5661_v20  ;;  %v6997_v20 = vld [vmem:[#allocation162_spill] sm:$0xff] }
 0x338   : > { %v5576_v34 = vpop.permute.xlu1 %2847 }
 0x339   : > { %6964 = vst [vmem:[#allocation152_spill] sm:$0xff] %v5576_v34  ;;  %721 = vrot.lane.b32.xlu1 %v705_v0, %s3819_s21  ;;  %v5583_v2 = vpop.permute.xlu0 %2985  ;;  %v6969_v0 = vld [vmem:[#allocation67_spill] sm:$0xff]  ;;  %v1978_v34 = vmul.f32 0.0, %v6973_v10  ;;  %s3832_s21 = smov 124  }
 0x33a   : > { %6965 = vst [vmem:[#allocation83_spill] sm:$0xff] %v5583_v2  ;;  %v2020_v12 = vsel %vm572_vm4, %v6969_v0, %v6968_v60  ;;  %v879_v2 = vmul.f32 0.0, %v6967_v32  ;;  %v2068_v32 = vsel %vm621_vm5, %v6978_v28, %v6977_v62 }
 0x33b   : > { %1948 = vrot.lane.b32.xlu0 %v1931_v43, %s3831_s18  ;;  %v6972_v43 = vld [vmem:[#allocation38_spill] sm:$0xff] }
 0x33c   : > { %v5585_v1 = vpop.permute.xlu1 %2851  ;;  %v1976_v35 = vmul.f32 %v6972_v43, %v4105_v27 }
 0x33d   : > { %6966 = vst [vmem:[#allocation111_spill] sm:$0xff] %v5585_v1  ;;  %762 = vrot.lane.b32.xlu1 %v750_v41, %s3820_s22  ;;  %v2021_v41 = vsel %vm572_vm4, %v6971_v14, %v6970_v55  ;;  %v5614_v1 = vmul.f32 0.0, %v6918_v17  ;;  %v5617_v50 = vpop.permute.xlu0 %2989  ;;  %v1980_v14 = vmul.f32 %v4129_v37, %v6973_v10  ;;  %v6980_v17 = vld [vmem:[#allocation134_spill] sm:$0xff]  ;;  %v1250_v10 = vmul.f32 %v6891_v61, %v4149_v25 }
 0x33e   : > { %6974 = vst [vmem:[#allocation90_spill] sm:$0xff] %v5617_v50  ;;  %v2069_v19 = vsel %vm621_vm5, %v6980_v17, %v6979_v40  ;;  %v6981_v50 = vld [vmem:[#allocation29_spill] sm:$0xff]  ;;  %v2030_v5 = vadd.f32 %v2020_v12, %v1976_v35  ;;  %v2032_v18 = vadd.f32 %v2021_v41, %v1978_v34  ;;  %v6984_v17 = vld [vmem:[#allocation112_spill] sm:$0xff]  ;;  %v5649_v40 = vmul.f32 %v4162_v38, %v6901_v11  ;;  %v6992_v11 = vld [vmem:[#allocation163_spill] sm:$0xff] }
 0x33f   : > { %v801_v6 = vmul.f32 0.0, %v6981_v50  ;;  %v6986_v35 = vld [vmem:[#allocation41_spill] sm:$0xff]  ;;  %v1304_v23 = vadd.f32 %v6892_v45, %v1250_v10  ;;  %v5675_v45 = vmul.f32 %v6989_v39, %v4149_v25 }
 0x340   : > { %v5619_v56 = vpop.permute.xlu1 %2891  ;;  %v2078_v12 = vadd.f32 %v2068_v32, %v2030_v5  ;;  %v2080_v41 = vadd.f32 %v2069_v19, %v2032_v18  ;;  %v5671_v19 = vmul.f32 0.0, %v6972_v43  ;;  %v6995_v18 = vld [vmem:[#allocation160_spill] sm:$0xff] }
 0x341   : > { %6975 = vst [vmem:[#allocation81_spill] sm:$0xff] %v5619_v56  ;;  %766 = vrot.lane.b32.xlu1 %v752_v7, %s3820_s22  ;;  %v799_v56 = vmul.f32 %v6981_v50, %v4105_v27  ;;  %v2115_v7 = vsel %vm670_vm6, %v6984_v17, %v6983_v57  ;;  %v6985_v50 = vld [vmem:[#allocation27_spill] sm:$0xff]  ;;  %v5654_v24 = vpop.permute.xlu0 %2993  ;;  %v5664_v57 = vmul.f32 0.0, %v6989_v39  ;;  %6994 = vst [vmem:[#allocation85_spill] sm:$0xff] %v5675_v45  ;;  %v7001_v39 = vld [vmem:[#allocation52_spill] sm:$0xff] }
 0x342   : > { %v923_v34 = vsel %vm572_vm4, %v6986_v35, %v6985_v50  ;;  %6987 = vst [vmem:[#allocation156_spill] sm:$0xff] %v5654_v24  ;;  %v6993_v17 = vld [vmem:[#allocation19_spill] sm:$0xff]  ;;  %v2126_v5 = vadd.f32 %v2115_v7, %v2078_v12  ;;  %v2128_v32 = vadd.f32 %v6995_v18, %v2080_v41  ;;  %v5681_v24 = vmul.f32 %v6972_v43, %v4149_v25  ;;  %v7000_v12 = vld [vmem:[#allocation32_spill] sm:$0xff] }
 0x343   : > { %6991 = vst [vmem:[#allocation67_spill] sm:$0xff] %v5664_v57  ;;  %v2163_v33 = vsel %vm725_vm7, %v6993_v17, %v6992_v11  ;;  %v933_v10 = vadd.f32 %v923_v34, %v879_v2  ;;  %v6996_v50 = vld [vmem:[#allocation43_spill] sm:$0xff]  ;;  %v6999_v11 = vld [vmem:[#allocation45_spill] sm:$0xff]  ;;  %v971_v45 = vsel %vm621_vm5, %v7001_v39, %v7000_v12  ;;  %v2259_v12 = vsel %vm823_vm9, %v7008_v53, %v5511_v16  ;;  %v7010_v39 = vld [vmem:[#allocation24_spill] sm:$0xff] }
 0x344   : > { %v5656_v61 = vpop.permute.xlu1 %2253  ;;  %v935_v35 = vadd.f32 %v6996_v50, %v881_v3  ;;  %v6998_v57 = vld [vmem:[#allocation187_spill] sm:$0xff]  ;;  %v5688_v7 = vmul.f32 %v6999_v11, %v4105_v27  ;;  %v2174_v34 = vadd.f32 %v2163_v33, %v2126_v5  ;;  %v7007_v27 = vld [vmem:[#allocation14_spill] sm:$0xff]  ;;  %v7009_v33 = vld [vmem:[#allocation136_spill] sm:$0xff] }
 0x345   : > { %6988 = vst [vmem:[#allocation20_spill] sm:$0xff] %v5656_v61  ;;  %770 = vrot.lane.b32.xlu1 %v754_v36, %s3820_s22  ;;  %v2211_v36 = vsel %vm774_vm8, %v6998_v57, %v6997_v20  ;;  %v7002_v41 = vld [vmem:[#allocation115_spill] sm:$0xff]  ;;  %v5694_v3 = vpop.permute.xlu0 %3024  ;;  %v5700_v20 = vmul.f32 0.0, %v6999_v11  ;;  %v7006_v57 = vld [vmem:[#allocation161_spill] sm:$0xff]  ;;  %v7013_v53 = vld [vmem:[#allocation54_spill] sm:$0xff]  ;;  %s3833_s22 = smov 123  }
 0x346   : > { %v2034_v2 = vadd.f32 %v7002_v41, %v1980_v14  ;;  %7003 = vst [vmem:[#allocation113_spill] sm:$0xff] %v5694_v3  ;;  %v7004_v43 = vld [vmem:[#allocation39_spill] sm:$0xff]  ;;  %v2118_v17 = vsel %vm670_vm6, %v7007_v27, %v7006_v57  ;;  %v2222_v5 = vadd.f32 %v2211_v36, %v2174_v34  ;;  %v2176_v3 = vadd.f32 %v7010_v39, %v2128_v32  ;;  %v7011_v57 = vld [vmem:[#allocation18_spill] sm:$0xff] }
 0x347   : > { %v1019_v18 = vsel %vm670_vm6, %v7004_v43, %v4588_v29  ;;  %7005 = vst [vmem:[#allocation38_spill] sm:$0xff] %v5700_v20  ;;  %v5712_v29 = vadd.f32 %v6896_v44, %v1304_v23  ;;  %v981_v43 = vadd.f32 %v971_v45, %v933_v10  ;;  %v5716_v20 = vmul.f32 %v6999_v11, %v4149_v25  ;;  %v7012_v27 = vld [vmem:[#allocation186_spill] sm:$0xff]  ;;  %v7016_v45 = vld [vmem:[#allocation179_spill] sm:$0xff] }
 0x348   : > { %v2258_v50 = vpop.permute.xlu1 %2257  ;;  %v2082_v14 = vadd.f32 %v7009_v33, %v2034_v2  ;;  %v2166_v16 = vsel %vm725_vm7, %v7012_v27, %v7011_v57  ;;  %v2224_v36 = vadd.f32 %v5453_v54, %v2176_v3  ;;  %v2270_v2 = vadd.f32 %v2259_v12, %v2222_v5  ;;  %v7015_v44 = vld [vmem:[#allocation50_spill] sm:$0xff] }
 0x349   : > { %811 = vrot.lane.b32.xlu1 %v799_v56, %s3821_s10  ;;  %v983_v56 = vadd.f32 %v7013_v53, %v935_v35  ;;  %v5723_v32 = vpop.permute.xlu0 %520  ;;  %v926_v23 = vsel %vm572_vm4, %v7015_v44, %v6888_v30  ;;  %v1029_v11 = vadd.f32 %v1019_v18, %v981_v43  ;;  %v2214_v10 = vsel %vm774_vm8, %v7016_v45, %v5483_v48  ;;  %v7019_v35 = vld [vmem:[#allocation33_spill] sm:$0xff]  ;;  %v7038_v54 = vld [vmem:[#allocation78_spill] sm:$0xff] }
 0x34a   : > { %v2130_v22 = vadd.f32 %v2118_v17, %v2082_v14  ;;  %7014 = vst [vmem:[#allocation28_spill] sm:$0xff] %v5723_v32  ;;  %v7018_v17 = vld [vmem:[#allocation56_spill] sm:$0xff]  ;;  %v2272_v14 = vadd.f32 %v5656_v61, %v2224_v36  ;;  %v7020_v18 = vld [vmem:[#allocation61_spill] sm:$0xff]  ;;  %v7024_v36 = vld [vmem:[#allocation55_spill] sm:$0xff] }
 0x34b   : > { %v1292_v3 = vsel %vm572_vm4, %v7019_v35, %v7018_v17  ;;  %v803_v5 = vmul.f32 %v4129_v37, %v7020_v18  ;;  %v7021_v43 = vld [vmem:[#allocation49_spill] sm:$0xff]  ;;  %v937_v17 = vadd.f32 %v926_v23, %v5591_v49  ;;  %v7025_v35 = vld [vmem:[#allocation80_spill] sm:$0xff] }
 0x34c   : > { %v5725_v34 = vpop.permute.xlu1 %2288  ;;  %v2178_v12 = vadd.f32 %v2166_v16, %v2130_v22  ;;  %v5746_v48 = vmul.f32 0.0, %v7021_v43  ;;  %v5750_v57 = vmul.f32 %v4129_v37, %v7021_v43  ;;  %v7023_v22 = vld [vmem:[#allocation40_spill] sm:$0xff]  ;;  %v1302_v43 = vadd.f32 %v1292_v3, %v5638_v52  ;;  %v7029_v23 = vld [vmem:[#allocation53_spill] sm:$0xff] }
 0x34d   : > { %v5735_v53 = vsel %vm2290_vm12, %v5347_v59, %v5725_v34  ;;  %815 = vrot.lane.b32.xlu1 %v801_v6, %s3821_s10  ;;  %v7022_v6 = vld [vmem:[#allocation196_spill] sm:$0xff]  ;;  %v1031_v16 = vadd.f32 %v7023_v22, %v983_v56  ;;  %v5759_v18 = vpop.permute.xlu0 %562  ;;  %v1077_v56 = vadd.f32 %v7029_v23, %v1029_v11  ;;  %v7030_v22 = vld [vmem:[#allocation91_spill] sm:$0xff]  ;;  %v2298_v52 = vmul.f32 %v5347_v59, %v2272_v14 }
 0x34e   : > { %7017 = vst [vmem:[#allocation89_spill] sm:$0xff] %v5735_v53  ;;  %v2296_v30 = vmul.f32 %v5735_v53, %v2270_v2  ;;  %v2262_v44 = vsel %vm823_vm9, %v7022_v6, %v2258_v50  ;;  %v1068_v2 = vsel %vm725_vm7, %v7025_v35, %v7024_v36  ;;  %v2226_v25 = vadd.f32 %v2214_v10, %v2178_v12  ;;  %v7027_v53 = vld [vmem:[#allocation65_spill] sm:$0xff]  ;;  %v7031_v36 = vld [vmem:[#allocation63_spill] sm:$0xff]  ;;  %v7032_v12 = vld [vmem:[#allocation58_spill] sm:$0xff] }
 0x34f   : > { %7026 = vst [vmem:[#allocation117_spill] sm:$0xff] %v5759_v18  ;;  %v7028_v50 = vld [vmem:[#allocation37_spill] sm:$0xff]  ;;  %v845_v10 = vrot.slane %v7031_v36, %v7030_v22  ;;  %v5774_v35 = vmul.f32 %v4162_v38, %v7032_v12  ;;  %v7033_v18 = vld [vmem:[#allocation102_spill] sm:$0xff]  ;;  %v7034_v61 = vld [vmem:[#allocation72_spill] sm:$0xff]  ;;  %v1079_v6 = vadd.f32 %v1068_v2, %v1031_v16  ;;  %v5782_v11 = vmul.f32 0.0, %v7032_v12 }
 0x350   : > { %v5761_v32 = vpop.permute.xlu1 %2576  ;;  %2309 = vrot.lane.b32.xlu0 %v2296_v30, %s3832_s21  ;;  %v974_v49 = vsel %vm621_vm5, %v7028_v50, %v7027_v53  ;;  %v1116_v30 = vsel %vm774_vm8, %v7034_v61, %v7033_v18  ;;  %v2274_v3 = vadd.f32 %v2262_v44, %v2226_v25  ;;  %v7035_v53 = vld [vmem:[#allocation100_spill] sm:$0xff]  ;;  %v7036_v22 = vld [vmem:[#allocation71_spill] sm:$0xff]  ;;  %v7041_v44 = vld [vmem:[#allocation97_spill] sm:$0xff] }
 0x351   : > { %819 = vrot.lane.b32.xlu1 %v803_v5, %s3821_s10  ;;  %v1125_v50 = vadd.f32 %v7035_v53, %v1077_v56  ;;  %v5786_v5 = vmul.f32 %v4129_v37, %v7032_v12  ;;  %v985_v23 = vadd.f32 %v974_v49, %v937_v17  ;;  %v7037_v36 = vld [vmem:[#allocation44_spill] sm:$0xff]  ;;  %v7039_v61 = vld [vmem:[#allocation51_spill] sm:$0xff]  ;;  %v5797_v2 = vpop.permute.xlu0 %566  ;;  %v7044_v17 = vld [vmem:[#allocation42_spill] sm:$0xff]  ;;  %v1127_v53 = vadd.f32 %v1116_v30, %v1079_v6  ;;  %s3834_s10 = smov 122  }
 0x352   : > { %v1340_v38 = vsel %vm621_vm5, %v7037_v36, %v7036_v22  ;;  %v1022_v14 = vsel %vm670_vm6, %v7039_v61, %v7038_v54  ;;  %v7040_v25 = vld [vmem:[#allocation124_spill] sm:$0xff]  ;;  %7042 = vst [vmem:[#allocation134_spill] sm:$0xff] %v5797_v2  ;;  %v1295_v49 = vsel %vm572_vm4, %v7044_v17, %v6910_v4  ;;  %v7045_v56 = vld [vmem:[#allocation73_spill] sm:$0xff]  ;;  %v7046_v54 = vld [vmem:[#allocation123_spill] sm:$0xff]  ;;  %v1673_v36 = vadd.f32 %v6920_v42, %v5597_v8 }
 0x353   : > { %v1164_v16 = vsel %vm823_vm9, %v7041_v44, %v7040_v25  ;;  %v1661_v12 = vsel %vm572_vm4, %v7045_v56, %v6921_v46  ;;  %v1173_v22 = vadd.f32 %v7046_v54, %v1125_v50  ;;  %v7047_v61 = vld [vmem:[#allocation59_spill] sm:$0xff]  ;;  %v7048_v25 = vld [vmem:[#allocation98_spill] sm:$0xff]  ;;  %v7049_v44 = vld [vmem:[#allocation68_spill] sm:$0xff]  ;;  %v2300_v17 = vmul.f32 %v5725_v34, %v2274_v3 }
 0x354   : > { %v5799_v18 = vpop.permute.xlu1 %2616  ;;  %2313 = vrot.lane.b32.xlu0 %v2298_v52, %s3832_s21  ;;  %v1388_v52 = vsel %vm670_vm6, %v7047_v61, %v6906_v31  ;;  %v1069_v4 = vsel %vm725_vm7, %v7049_v44, %v7048_v25  ;;  %v1350_v2 = vadd.f32 %v1340_v38, %v1302_v43  ;;  %v1033_v46 = vadd.f32 %v1022_v14, %v985_v23  ;;  %v7050_v50 = vld [vmem:[#allocation121_spill] sm:$0xff]  ;;  %v7051_v31 = vld [vmem:[#allocation94_spill] sm:$0xff]  ;;  %v7053_v38 = vld [vmem:[#allocation84_spill] sm:$0xff] }
 0x355   : > { %7043 = vst [vmem:[#allocation29_spill] sm:$0xff] %v5799_v18  ;;  %850 = vrot.lane.b32.xlu1 %v845_v10, %s3828_s16  ;;  %v1175_v6 = vadd.f32 %v1164_v16, %v1127_v53  ;;  %v1199_v30 = vmul.f32 %v5048_v47, %v1173_v22  ;;  %v1400_v10 = vadd.f32 %v6905_v51, %v5712_v29  ;;  %v5827_v54 = vpop.permute.xlu0 %570  ;;  %v7054_v43 = vld [vmem:[#allocation57_spill] sm:$0xff]  ;;  %v7055_v51 = vld [vmem:[#allocation62_spill] sm:$0xff]  ;;  %v7056_v23 = vld [vmem:[#allocation64_spill] sm:$0xff] }
 0x356   : > { %v1306_v42 = vadd.f32 %v1295_v49, %v5649_v40  ;;  %v1671_v8 = vadd.f32 %v1661_v12, %v5614_v1  ;;  %v1117_v56 = vsel %vm774_vm8, %v7051_v31, %v7050_v50  ;;  %7052 = vst [vmem:[#allocation47_spill] sm:$0xff] %v5827_v54  ;;  %v1343_v47 = vsel %vm621_vm5, %v7054_v43, %v7053_v38  ;;  %v7057_v49 = vld [vmem:[#allocation147_spill] sm:$0xff]  ;;  %v7058_v12 = vld [vmem:[#allocation122_spill] sm:$0xff]  ;;  %v7060_v22 = vld [vmem:[#allocation105_spill] sm:$0xff] }
 0x357   : > { %v1398_v3 = vadd.f32 %v1388_v52, %v1350_v2  ;;  %v1664_v40 = vsel %vm572_vm4, %v7055_v51, %v6944_v26  ;;  %v1081_v1 = vadd.f32 %v1069_v4, %v1033_v46  ;;  %v1721_v29 = vadd.f32 %v6931_v63, %v1673_v36  ;;  %v7059_v53 = vld [vmem:[#allocation95_spill] sm:$0xff]  ;;  %v7061_v44 = vld [vmem:[#allocation125_spill] sm:$0xff]  ;;  %v7067_v38 = vld [vmem:[#allocation138_spill] sm:$0xff] }
 0x358   : > { %v5829_v61 = vpop.permute.xlu1 %2620  ;;  %2317 = vrot.lane.b32.xlu0 %v2300_v17, %s3832_s21  ;;  %v1709_v14 = vsel %vm621_vm5, %v7056_v23, %v6932_v9  ;;  %v2031_v16 = vadd.f32 %v6968_v60, %v5681_v24  ;;  %v1165_v2 = vsel %vm823_vm9, %v7058_v12, %v7057_v49  ;;  %v2019_v26 = vsel %vm572_vm4, %v7059_v53, %v6969_v0  ;;  %v7062_v24 = vld [vmem:[#allocation107_spill] sm:$0xff]  ;;  %v7063_v60 = vld [vmem:[#allocation77_spill] sm:$0xff]  ;;  %v7068_v43 = vld [vmem:[#allocation76_spill] sm:$0xff] }
 0x359   : > { %1211 = vrot.lane.b32.xlu1 %v1199_v30, %s3829_s15  ;;  %v1446_v52 = vadd.f32 %v7060_v22, %v1398_v3  ;;  %v1129_v25 = vadd.f32 %v1117_v56, %v1081_v1  ;;  %v1201_v63 = vmul.f32 %v7061_v44, %v1175_v6  ;;  %v5854_v36 = vadd.f32 %v6937_v58, %v1721_v29  ;;  %v5860_v46 = vpop.permute.xlu0 %611  ;;  %v7065_v50 = vld [vmem:[#allocation127_spill] sm:$0xff]  ;;  %v7066_v56 = vld [vmem:[#allocation116_spill] sm:$0xff]  ;;  %v7074_v12 = vld [vmem:[#allocation141_spill] sm:$0xff] }
 0x35a   : > { %v1354_v9 = vadd.f32 %v1343_v47, %v1306_v42  ;;  %v1675_v4 = vadd.f32 %v1664_v40, %v5601_v15  ;;  %v1437_v17 = vsel %vm725_vm7, %v7063_v60, %v7062_v24  ;;  %7064 = vst [vmem:[#allocation27_spill] sm:$0xff] %v5860_v46  ;;  %v1719_v0 = vadd.f32 %v1709_v14, %v1671_v8  ;;  %v7069_v47 = vld [vmem:[#allocation104_spill] sm:$0xff]  ;;  %v7070_v8 = vld [vmem:[#allocation87_spill] sm:$0xff]  ;;  %v7073_v14 = vld [vmem:[#allocation30_spill] sm:$0xff] }
 0x35b   : > { %v1494_v31 = vadd.f32 %v7065_v50, %v1446_v52  ;;  %v2390_v6 = vsel %vm572_vm4, %v7067_v38, %v7066_v56  ;;  %v1177_v58 = vadd.f32 %v1165_v2, %v1129_v25  ;;  %v2029_v15 = vadd.f32 %v2019_v26, %v5671_v19  ;;  %v7071_v1 = vld [vmem:[#allocation120_spill] sm:$0xff]  ;;  %v7075_v19 = vld [vmem:[#allocation165_spill] sm:$0xff]  ;;  %v7078_v22 = vld [vmem:[#allocation103_spill] sm:$0xff] }
 0x35c   : > { %v5862_v30 = vpop.permute.xlu1 %2897  ;;  %v5871_v42 = vadd.f32 %v6977_v62, %v2031_v16  ;;  %v1391_v3 = vsel %vm670_vm6, %v7069_v47, %v7068_v43  ;;  %v2067_v51 = vsel %vm621_vm5, %v7070_v8, %v6978_v28  ;;  %v1448_v40 = vadd.f32 %v1437_v17, %v1400_v10  ;;  %v7072_v29 = vld [vmem:[#allocation92_spill] sm:$0xff]  ;;  %v7076_v16 = vld [vmem:[#allocation109_spill] sm:$0xff]  ;;  %v7080_v60 = vld [vmem:[#allocation119_spill] sm:$0xff] }
 0x35d   : > { %1215 = vrot.lane.b32.xlu1 %v1201_v63, %s3829_s15  ;;  %v2389_v23 = vsel %vm572_vm4, %v7072_v29, %v7071_v1  ;;  %v1203_v49 = vmul.f32 %v7073_v14, %v1177_v58  ;;  %v2438_v62 = vsel %vm621_vm5, %v7075_v19, %v7074_v12  ;;  %v1712_v2 = vsel %vm621_vm5, %v7076_v16, %v6951_v13  ;;  %v7077_v26 = vld [vmem:[#allocation128_spill] sm:$0xff]  ;;  %v7079_v63 = vld [vmem:[#allocation11_spill] sm:$0xff]  ;;  %v7081_v17 = vld [vmem:[#allocation142_spill] sm:$0xff] }
 0x35e   : > { %v1757_v53 = vadd.f32 %v6938_v21, %v1719_v0  ;;  %v1485_v28 = vsel %vm774_vm8, %v7078_v22, %v7077_v26  ;;  %v2401_v10 = vadd.f32 %v2390_v6, %v5782_v11  ;;  %v2022_v25 = vsel %vm572_vm4, %v6970_v55, %v7002_v41  ;;  %v7082_v0 = vld [vmem:[#allocation126_spill] sm:$0xff]  ;;  %v7083_v50 = vld [vmem:[#allocation99_spill] sm:$0xff]  ;;  %v7084_v38 = vld [vmem:[#allocation129_spill] sm:$0xff]  ;;  %v5911_v41 = vpop.permute.xlu0 %615 }
 0x35f   : > { %v2077_v44 = vadd.f32 %v2067_v51, %v2029_v15  ;;  %v1542_v24 = vadd.f32 %v7079_v63, %v1494_v31  ;;  %v2437_v13 = vsel %vm621_vm5, %v7081_v17, %v7080_v60  ;;  %v2399_v21 = vadd.f32 %v2389_v23, %v5688_v7  ;;  %v7085_v6 = vld [vmem:[#allocation153_spill] sm:$0xff]  ;;  %7086 = vst [vmem:[#allocation41_spill] sm:$0xff] %v5911_v41  ;;  %v7089_v51 = vld [vmem:[#allocation143_spill] sm:$0xff]  ;;  %v7090_v23 = vld [vmem:[#allocation106_spill] sm:$0xff] }
 0x360   : > { %v5894_v52 = vpop.permute.xlu1 %2937  ;;  %v1438_v11 = vsel %vm725_vm7, %v7083_v50, %v7082_v0  ;;  %v1533_v58 = vsel %vm823_vm9, %v7085_v6, %v7084_v38  ;;  %v2449_v55 = vadd.f32 %v2438_v62, %v2401_v10  ;;  %v1402_v31 = vadd.f32 %v1391_v3, %v1354_v9  ;;  %v7087_v43 = vld [vmem:[#allocation17_spill] sm:$0xff]  ;;  %v7091_v16 = vld [vmem:[#allocation15_spill] sm:$0xff]  ;;  %v7092_v26 = vld [vmem:[#allocation150_spill] sm:$0xff] }
 0x361   : > { %1219 = vrot.lane.b32.xlu1 %v1203_v49, %s3829_s15  ;;  %v1496_v15 = vadd.f32 %v1485_v28, %v1448_v40  ;;  %v1568_v47 = vmul.f32 %v7087_v43, %v1542_v24  ;;  %v7088_v8 = vld [vmem:[#allocation169_spill] sm:$0xff]  ;;  %v1723_v7 = vadd.f32 %v1712_v2, %v1675_v4  ;;  %v1805_v49 = vadd.f32 %v7090_v23, %v1757_v53  ;;  %v7095_v40 = vld [vmem:[#allocation168_spill] sm:$0xff]  ;;  %v7099_v0 = vld [vmem:[#allocation151_spill] sm:$0xff] }
 0x362   : > { %v2484_v14 = vsel %vm670_vm6, %v7089_v51, %v7088_v8  ;;  %v2447_v19 = vadd.f32 %v2437_v13, %v2399_v21  ;;  %v1486_v22 = vsel %vm774_vm8, %v7092_v26, %v7091_v16  ;;  %v7094_v62 = vld [vmem:[#allocation157_spill] sm:$0xff]  ;;  %v1450_v9 = vadd.f32 %v1438_v11, %v1402_v31  ;;  %v7097_v4 = vld [vmem:[#allocation112_spill] sm:$0xff]  ;;  %v7104_v43 = vld [vmem:[#allocation26_spill] sm:$0xff] }
 0x363   : > { %v5924_v10 = vadd.f32 %v2022_v25, %v7094_v62  ;;  %v1544_v3 = vadd.f32 %v1533_v58, %v1496_v15  ;;  %v7096_v28 = vld [vmem:[#allocation193_spill] sm:$0xff]  ;;  %v2125_v2 = vadd.f32 %v7097_v4, %v2077_v44  ;;  %v7098_v53 = vld [vmem:[#allocation164_spill] sm:$0xff]  ;;  %v7101_v25 = vld [vmem:[#allocation118_spill] sm:$0xff]  ;;  %v5948_v4 = vpop.permute.xlu0 %619 }
 0x364   : > { %v5921_v63 = vpop.permute.xlu1 %2941  ;;  %v2532_v24 = vsel %vm725_vm7, %v7096_v28, %v7095_v40  ;;  %v2497_v13 = vadd.f32 %v7098_v53, %v2449_v55  ;;  %v2495_v21 = vadd.f32 %v2484_v14, %v2447_v19  ;;  %v7100_v50 = vld [vmem:[#allocation177_spill] sm:$0xff]  ;;  %v2388_v11 = vsel %vm572_vm4, %v7101_v25, %v7072_v29  ;;  %v7102_v58 = vld [vmem:[#allocation178_spill] sm:$0xff]  ;;  %v7105_v23 = vld [vmem:[#allocation108_spill] sm:$0xff]  ;;  %7109 = vst [vmem:[#allocation43_spill] sm:$0xff] %v5948_v4 }
 0x365   : > { %7093 = vst [vmem:[#allocation36_spill] sm:$0xff] %v5921_v63  ;;  %1580 = vrot.lane.b32.xlu1 %v1568_v47, %s3830_s17  ;;  %v1534_v38 = vsel %vm823_vm9, %v7100_v50, %v7099_v0  ;;  %v1498_v6 = vadd.f32 %v1486_v22, %v1450_v9  ;;  %v1570_v31 = vmul.f32 %v7102_v58, %v1544_v3  ;;  %v7103_v15 = vld [vmem:[#allocation93_spill] sm:$0xff]  ;;  %v7106_v44 = vld [vmem:[#allocation132_spill] sm:$0xff]  ;;  %v7110_v22 = vld [vmem:[#allocation130_spill] sm:$0xff] }
 0x366   : > { %v2580_v47 = vsel %vm774_vm8, %v7104_v43, %v7103_v15  ;;  %v1796_v55 = vsel %vm725_vm7, %v7106_v44, %v7105_v23  ;;  %v7107_v14 = vld [vmem:[#allocation140_spill] sm:$0xff]  ;;  %v2543_v16 = vadd.f32 %v2532_v24, %v2495_v21  ;;  %v7111_v9 = vld [vmem:[#allocation10_spill] sm:$0xff]  ;;  %v7113_v25 = vld [vmem:[#allocation191_spill] sm:$0xff] }
 0x367   : > { %v2403_v19 = vadd.f32 %v7107_v14, %v5786_v5  ;;  %v7108_v26 = vld [vmem:[#allocation48_spill] sm:$0xff]  ;;  %v1750_v3 = vsel %vm670_vm6, %v7111_v9, %v7110_v22  ;;  %v1546_v0 = vadd.f32 %v1534_v38, %v1498_v6  ;;  %v7112_v50 = vld [vmem:[#allocation166_spill] sm:$0xff]  ;;  %v7115_v24 = vld [vmem:[#allocation135_spill] sm:$0xff]  ;;  %v1807_v6 = vadd.f32 %v1796_v55, %v5854_v36 }
 0x368   : > { %v2545_v62 = vadd.f32 %v7108_v26, %v2497_v13  ;;  %v5950_v29 = vpop.permute.xlu1 %2624  ;;  %v2487_v58 = vsel %vm670_vm6, %v7113_v25, %v7112_v50  ;;  %v7114_v23 = vld [vmem:[#allocation70_spill] sm:$0xff]  ;;  %v7116_v13 = vld [vmem:[#allocation159_spill] sm:$0xff]  ;;  %v2591_v46 = vadd.f32 %v2580_v47, %v2543_v16  ;;  %v7118_v22 = vld [vmem:[#allocation133_spill] sm:$0xff] }
 0x369   : > { %v2628_v5 = vsel %vm823_vm9, %v5799_v18, %v7114_v23  ;;  %1584 = vrot.lane.b32.xlu1 %v1570_v31, %s3830_s17  ;;  %v1844_v21 = vsel %vm774_vm8, %v7116_v13, %v7115_v24  ;;  %v7117_v44 = vld [vmem:[#allocation167_spill] sm:$0xff]  ;;  %v1853_v38 = vadd.f32 %v7118_v22, %v1805_v49  ;;  %v7119_v9 = vld [vmem:[#allocation86_spill] sm:$0xff]  ;;  %v7120_v63 = vld [vmem:[#allocation25_spill] sm:$0xff] }
 0x36a   : > { %v2451_v41 = vadd.f32 %v7117_v44, %v2403_v19  ;;  %v1572_v50 = vmul.f32 %v7119_v9, %v1546_v0  ;;  %v7121_v4 = vld [vmem:[#allocation185_spill] sm:$0xff]  ;;  %v7122_v37 = vld [vmem:[#allocation184_spill] sm:$0xff]  ;;  %v7123_v31 = vld [vmem:[#allocation158_spill] sm:$0xff]  ;;  %v2639_v19 = vadd.f32 %v2628_v5, %v2591_v46  ;;  %v1855_v16 = vadd.f32 %v1844_v21, %v1807_v6  ;;  %v5992_v5 = vpop.permute.xlu0 %660 }
 0x36b   : > { %v2535_v54 = vsel %vm725_vm7, %v7121_v4, %v7120_v63  ;;  %v1892_v26 = vsel %vm823_vm9, %v7123_v31, %v7122_v37  ;;  %v7124_v24 = vld [vmem:[#allocation31_spill] sm:$0xff]  ;;  %v7125_v49 = vld [vmem:[#allocation182_spill] sm:$0xff]  ;;  %v2400_v37 = vadd.f32 %v7071_v1, %v5716_v20  ;;  %v7133_v1 = vld [vmem:[#allocation180_spill] sm:$0xff] }
 0x36c   : > { %v2499_v18 = vadd.f32 %v2487_v58, %v2451_v41  ;;  %v2593_v13 = vadd.f32 %v7124_v24, %v2545_v62  ;;  %v5976_v47 = vpop.permute.xlu1 %2655  ;;  %v1901_v22 = vadd.f32 %v7125_v49, %v1853_v38  ;;  %v7126_v36 = vld [vmem:[#allocation35_spill] sm:$0xff]  ;;  %v7127_v0 = vld [vmem:[#allocation66_spill] sm:$0xff]  ;;  %v1761_v38 = vadd.f32 %v1750_v3, %v1723_v7  ;;  %v7131_v49 = vld [vmem:[#allocation101_spill] sm:$0xff] }
 0x36d   : > { %v2583_v55 = vsel %vm774_vm8, %v5761_v32, %v7126_v36  ;;  %v5984_v63 = vsel %vm2659_vm13, %v5976_v47, %v7127_v0  ;;  %1588 = vrot.lane.b32.xlu1 %v1572_v50, %s3830_s17  ;;  %v7128_v41 = vld [vmem:[#allocation131_spill] sm:$0xff]  ;;  %v1903_v6 = vadd.f32 %v1892_v26, %v1855_v16  ;;  %v7130_v9 = vld [vmem:[#allocation34_spill] sm:$0xff]  ;;  %v2631_v50 = vsel %vm823_vm9, %v5950_v29, %v7131_v49  ;;  %v7132_v36 = vld [vmem:[#allocation13_spill] sm:$0xff] }
 0x36e   : > { %v7129_v46 = vld [vmem:[#allocation155_spill] sm:$0xff]  ;;  %v2547_v58 = vadd.f32 %v2535_v54, %v2499_v18  ;;  %v2665_v21 = vmul.f32 %v5984_v63, %v2639_v19  ;;  %v1926_v31 = vmul.f32 %v7130_v9, %v1901_v22  ;;  %v2436_v20 = vsel %vm621_vm5, %v7132_v36, %v7081_v17  ;;  %v7134_v24 = vld [vmem:[#allocation154_spill] sm:$0xff]  ;;  %v7139_v17 = vld [vmem:[#allocation137_spill] sm:$0xff] }
 0x36f   : > { %v1797_v62 = vsel %vm725_vm7, %v7129_v46, %v7128_v41  ;;  %v1845_v18 = vsel %vm774_vm8, %v7134_v24, %v7133_v1  ;;  %v7135_v54 = vld [vmem:[#allocation75_spill] sm:$0xff]  ;;  %v7136_v7 = vld [vmem:[#allocation38_spill] sm:$0xff] }
 0x370   : > { %v2641_v41 = vadd.f32 %v7135_v54, %v2593_v13  ;;  %v2595_v46 = vadd.f32 %v2583_v55, %v2547_v58  ;;  %v6006_v19 = vpop.permute.xlu1 %2943  ;;  %2678 = vrot.lane.b32.xlu0 %v2665_v21, %s3833_s22  ;;  %v2398_v26 = vadd.f32 %v2388_v11, %v7136_v7  ;;  %v7137_v3 = vld [vmem:[#allocation110_spill] sm:$0xff]  ;;  %v1809_v49 = vadd.f32 %v1797_v62, %v1761_v38  ;;  %v7140_v24 = vld [vmem:[#allocation19_spill] sm:$0xff]  ;;  %v7142_v58 = vld [vmem:[#allocation176_spill] sm:$0xff] }
 0x371   : > { %v2070_v16 = vsel %vm621_vm5, %v7137_v3, %v7009_v33  ;;  %v7138_v22 = vld [vmem:[#allocation114_spill] sm:$0xff]  ;;  %1938 = vrot.lane.b32.xlu1 %v1926_v31, %s3831_s18  ;;  %v2173_v13 = vadd.f32 %v7140_v24, %v2125_v2  ;;  %v2391_v33 = vsel %vm572_vm4, %v7066_v56, %v7107_v14  ;;  %v2448_v62 = vadd.f32 %v7080_v60, %v2400_v37  ;;  %v7144_v2 = vld [vmem:[#allocation12_spill] sm:$0xff]  ;;  %v7146_v24 = vld [vmem:[#allocation145_spill] sm:$0xff] }
 0x372   : > { %v2116_v9 = vsel %vm670_vm6, %v7139_v17, %v7138_v22  ;;  %v7141_v55 = vld [vmem:[#allocation46_spill] sm:$0xff]  ;;  %v2643_v21 = vadd.f32 %v2631_v50, %v2595_v46  ;;  %v2667_v11 = vmul.f32 %v5976_v47, %v2641_v41  ;;  %v2446_v1 = vadd.f32 %v2436_v20, %v2398_v26  ;;  %v7145_v31 = vld [vmem:[#allocation144_spill] sm:$0xff]  ;;  %v6034_v41 = vpop.permute.xlu0 %664  ;;  %v7149_v37 = vld [vmem:[#allocation139_spill] sm:$0xff] }
 0x373   : > { %v1893_v36 = vsel %vm823_vm9, %v7142_v58, %v7141_v55  ;;  %v1857_v7 = vadd.f32 %v1845_v18, %v1809_v49  ;;  %v7143_v3 = vld [vmem:[#allocation22_spill] sm:$0xff]  ;;  %v2081_v38 = vadd.f32 %v2070_v16, %v5924_v10  ;;  %v2757_v17 = vsel %vm572_vm4, %v7145_v31, %v7144_v2  ;;  %v7148_v14 = vld [vmem:[#allocation160_spill] sm:$0xff]  ;;  %v7150_v10 = vld [vmem:[#allocation163_spill] sm:$0xff] }
 0x374   : > { %v1928_v22 = vmul.f32 %v7143_v3, %v1903_v6  ;;  %v2758_v50 = vsel %vm572_vm4, %v7144_v2, %v7146_v24  ;;  %v6036_v46 = vpop.permute.xlu1 %2947  ;;  %2682 = vrot.lane.b32.xlu0 %v2667_v11, %s3833_s22  ;;  %v7147_v56 = vld [vmem:[#allocation14_spill] sm:$0xff]  ;;  %v2164_v6 = vsel %vm725_vm7, %v7150_v10, %v7149_v37  ;;  %v7151_v20 = vld [vmem:[#allocation187_spill] sm:$0xff]  ;;  %v2127_v16 = vadd.f32 %v2116_v9, %v5871_v42 }
 0x375   : > { %v2117_v60 = vsel %vm670_vm6, %v7148_v14, %v7147_v56  ;;  %v2221_v18 = vadd.f32 %v7151_v20, %v2173_v13  ;;  %v1905_v26 = vadd.f32 %v1893_v36, %v1857_v7  ;;  %v2402_v49 = vadd.f32 %v2391_v33, %v5774_v35  ;;  %v7152_v11 = vld [vmem:[#allocation67_spill] sm:$0xff]  ;;  %v7153_v2 = vld [vmem:[#allocation146_spill] sm:$0xff]  ;;  %v7155_v36 = vld [vmem:[#allocation88_spill] sm:$0xff] }
 0x376   : > { %1942 = vrot.lane.b32.xlu1 %v1928_v22, %s3831_s18  ;;  %v2439_v55 = vsel %vm621_vm5, %v7074_v12, %v7117_v44  ;;  %v2669_v58 = vmul.f32 %v7127_v0, %v2643_v21  ;;  %v2767_v3 = vadd.f32 %v2757_v17, %v7152_v11  ;;  %v7154_v31 = vld [vmem:[#allocation171_spill] sm:$0xff]  ;;  %v2494_v13 = vadd.f32 %v7089_v51, %v2446_v1  ;;  %v7156_v22 = vld [vmem:[#allocation96_spill] sm:$0xff]  ;;  %v7157_v33 = vld [vmem:[#allocation189_spill] sm:$0xff] }
 0x377   : > { %v2759_v56 = vsel %vm572_vm4, %v7154_v31, %v7153_v2  ;;  %v1930_v7 = vmul.f32 %v7155_v36, %v1905_v26  ;;  %v2768_v42 = vadd.f32 %v2758_v50, %v7156_v22  ;;  %v2129_v9 = vadd.f32 %v2117_v60, %v2081_v38  ;;  %v7158_v14 = vld [vmem:[#allocation162_spill] sm:$0xff]  ;;  %v7159_v17 = vld [vmem:[#allocation149_spill] sm:$0xff]  ;;  %v7160_v37 = vld [vmem:[#allocation175_spill] sm:$0xff] }
 0x378   : > { %v2175_v35 = vadd.f32 %v2164_v6, %v2127_v16  ;;  %v2212_v12 = vsel %vm774_vm8, %v7158_v14, %v7157_v33  ;;  %v6063_v44 = vpop.permute.xlu1 %2987  ;;  %2686 = vrot.lane.b32.xlu0 %v2669_v58, %s3833_s22  ;;  %v6066_v21 = vadd.f32 %v2439_v55, %v2402_v49  ;;  %v2806_v51 = vsel %vm621_vm5, %v7160_v37, %v7159_v17  ;;  %v7161_v1 = vld [vmem:[#allocation181_spill] sm:$0xff]  ;;  %v7163_v50 = vld [vmem:[#allocation170_spill] sm:$0xff]  ;;  %v7164_v60 = vld [vmem:[#allocation16_spill] sm:$0xff]  ;;  %v6086_v58 = vpop.permute.xlu0 %668 }
 0x379   : > { %v2269_v10 = vadd.f32 %v7161_v1, %v2221_v18  ;;  %v7162_v20 = vld [vmem:[#allocation197_spill] sm:$0xff]  ;;  %v2485_v6 = vsel %vm670_vm6, %v7088_v8, %v7164_v60  ;;  %v2770_v26 = vadd.f32 %v2759_v56, %v5746_v48  ;;  %v2165_v16 = vsel %vm725_vm7, %v7010_v39, %v7012_v27  ;;  %v7165_v49 = vld [vmem:[#allocation183_spill] sm:$0xff]  ;;  %v7168_v22 = vld [vmem:[#allocation174_spill] sm:$0xff] }
 0x37a   : > { %v2807_v38 = vsel %vm621_vm5, %v7163_v50, %v7162_v20  ;;  %1946 = vrot.lane.b32.xlu1 %v1930_v7, %s3831_s18  ;;  %v7166_v55 = vld [vmem:[#allocation23_spill] sm:$0xff]  ;;  %v7167_v11 = vld [vmem:[#allocation173_spill] sm:$0xff]  ;;  %v2223_v36 = vadd.f32 %v2212_v12, %v2175_v35  ;;  %v7170_v56 = vld [vmem:[#allocation148_spill] sm:$0xff]  ;;  %v2816_v39 = vadd.f32 %v2806_v51, %v2768_v42  ;;  %v2542_v35 = vadd.f32 %v7096_v28, %v2494_v13 }
 0x37b   : > { %v2260_v18 = vsel %vm823_vm9, %v7166_v55, %v7165_v49  ;;  %v2772_v31 = vadd.f32 %v7167_v11, %v5750_v57  ;;  %v2295_v7 = vmul.f32 %v5347_v59, %v2269_v10  ;;  %v7169_v8 = vld [vmem:[#allocation21_spill] sm:$0xff]  ;;  %v2805_v27 = vsel %vm621_vm5, %v7170_v56, %v7160_v37  ;;  %v7171_v14 = vld [vmem:[#allocation60_spill] sm:$0xff] }
 0x37c   : > { %v2853_v48 = vsel %vm670_vm6, %v7169_v8, %v7168_v22  ;;  %v2818_v33 = vadd.f32 %v2807_v38, %v2770_v26  ;;  %v2213_v1 = vsel %vm774_vm8, %v7171_v14, %v7016_v45  ;;  %v6100_v50 = vpop.permute.xlu1 %2991  ;;  %v2177_v57 = vadd.f32 %v2165_v16, %v2129_v9  ;;  %v7172_v12 = vld [vmem:[#allocation81_spill] sm:$0xff]  ;;  %v7173_v10 = vld [vmem:[#allocation192_spill] sm:$0xff] }
 0x37d   : > { %v2271_v59 = vadd.f32 %v2260_v18, %v2223_v36  ;;  %v2901_v60 = vsel %vm725_vm7, %v7173_v10, %v7172_v12  ;;  %v2496_v49 = vadd.f32 %v2485_v6, %v2448_v62  ;;  %v2864_v37 = vadd.f32 %v2853_v48, %v2816_v39  ;;  %v7174_v42 = vld [vmem:[#allocation152_spill] sm:$0xff]  ;;  %v7178_v13 = vld [vmem:[#allocation69_spill] sm:$0xff]  ;;  %v7179_v6 = vld [vmem:[#allocation195_spill] sm:$0xff]  ;;  %v6122_v48 = vpop.permute.xlu0 %715 }
 0x37e   : > { %2307 = vrot.lane.b32.xlu1 %v2295_v7, %s3832_s21  ;;  %v2866_v51 = vadd.f32 %v7174_v42, %v2818_v33  ;;  %v7175_v38 = vld [vmem:[#allocation196_spill] sm:$0xff]  ;;  %v2225_v55 = vadd.f32 %v2213_v1, %v2177_v57  ;;  %v2949_v16 = vsel %vm774_vm8, %v5894_v52, %v7178_v13  ;;  %v2815_v18 = vadd.f32 %v2805_v27, %v2767_v3  ;;  %v7181_v33 = vld [vmem:[#allocation190_spill] sm:$0xff]  ;;  %v7182_v3 = vld [vmem:[#allocation83_spill] sm:$0xff] }
 0x37f   : > { %v7176_v26 = vld [vmem:[#allocation20_spill] sm:$0xff]  ;;  %v2297_v28 = vmul.f32 %v5725_v34, %v2271_v59  ;;  %v2486_v62 = vsel %vm670_vm6, %v7098_v53, %v7113_v25  ;;  %v2533_v36 = vsel %vm725_vm7, %v7095_v40, %v7179_v6  ;;  %v2912_v7 = vadd.f32 %v2901_v60, %v2864_v37  ;;  %v7184_v57 = vld [vmem:[#allocation82_spill] sm:$0xff] }
 0x380   : > { %v2261_v45 = vsel %vm823_vm9, %v7176_v26, %v7175_v38  ;;  %v7177_v56 = vld [vmem:[#allocation172_spill] sm:$0xff]  ;;  %v2996_v39 = vpop.permute.xlu1 %2995  ;;  %v2590_v1 = vadd.f32 %v7104_v43, %v2542_v35  ;;  %v2997_v27 = vsel %vm823_vm9, %v7182_v3, %v6063_v44  ;;  %v2914_v59 = vadd.f32 %v7184_v57, %v2866_v51  ;;  %v7185_v38 = vld [vmem:[#allocation89_spill] sm:$0xff]  ;;  %v7186_v43 = vld [vmem:[#allocation74_spill] sm:$0xff] }
 0x381   : > { %v2820_v9 = vadd.f32 %v7177_v56, %v2772_v31  ;;  %v7180_v31 = vld [vmem:[#allocation111_spill] sm:$0xff]  ;;  %v2273_v14 = vadd.f32 %v2261_v45, %v2225_v55  ;;  %v7183_v53 = vld [vmem:[#allocation188_spill] sm:$0xff]  ;;  %v2960_v25 = vadd.f32 %v2949_v16, %v2912_v7  ;;  %v2544_v60 = vadd.f32 %v2533_v36, %v2496_v49  ;;  %v7187_v49 = vld [vmem:[#allocation29_spill] sm:$0xff] }
 0x382   : > { %v2856_v34 = vsel %vm670_vm6, %v7181_v33, %v7180_v31  ;;  %2311 = vrot.lane.b32.xlu1 %v2297_v28, %s3832_s21  ;;  %v2581_v40 = vsel %vm774_vm8, %v7103_v15, %v7183_v53  ;;  %v2863_v37 = vadd.f32 %v7169_v8, %v2815_v18  ;;  %v2904_v35 = vsel %vm725_vm7, %v5862_v30, %v7186_v43  ;;  %v7188_v8 = vld [vmem:[#allocation79_spill] sm:$0xff]  ;;  %v7189_v36 = vld [vmem:[#allocation113_spill] sm:$0xff]  ;;  %v6159_v31 = vpop.permute.xlu0 %719  ;;  %v7191_v53 = vld [vmem:[#allocation156_spill] sm:$0xff] }
 0x383   : > { %v2299_v26 = vmul.f32 %v7185_v38, %v2273_v14  ;;  %v2868_v45 = vadd.f32 %v2856_v34, %v2820_v9  ;;  %v2629_v55 = vsel %vm823_vm9, %v7114_v23, %v5829_v61  ;;  %v2962_v15 = vadd.f32 %v6006_v19, %v2914_v59  ;;  %v7190_v61 = vld [vmem:[#allocation48_spill] sm:$0xff]  ;;  %v7193_v38 = vld [vmem:[#allocation85_spill] sm:$0xff] }
 0x384   : > { %v3008_v28 = vadd.f32 %v2997_v27, %v2960_v25  ;;  %v6145_v16 = vpop.permute.xlu1 %3026  ;;  %v2592_v51 = vadd.f32 %v2581_v40, %v2544_v60  ;;  %v2638_v6 = vadd.f32 %v7187_v49, %v2590_v1  ;;  %v2952_v18 = vsel %vm774_vm8, %v7188_v8, %v6036_v46  ;;  %v7192_v25 = vld [vmem:[#allocation31_spill] sm:$0xff] }
 0x385   : > { %v6153_v7 = vsel %vm3028_vm14, %v7189_v36, %v6145_v16  ;;  %v2534_v23 = vsel %vm725_vm7, %v7190_v61, %v7121_v4  ;;  %v2916_v9 = vadd.f32 %v2904_v35, %v2868_v45  ;;  %v3010_v34 = vadd.f32 %v6100_v50, %v2962_v15  ;;  %v7200_v61 = vld [vmem:[#allocation43_spill] sm:$0xff] }
 0x386   : > { %2315 = vrot.lane.b32.xlu1 %v2299_v26, %s3832_s21  ;;  %v3034_v14 = vmul.f32 %v6153_v7, %v3008_v28  ;;  %v2498_v1 = vadd.f32 %v2486_v62, %v6066_v21  ;;  %v2640_v46 = vadd.f32 %v2629_v55, %v2592_v51  ;;  %v2664_v27 = vmul.f32 %v5976_v47, %v2638_v6  ;;  %v7194_v62 = vld [vmem:[#allocation7_spill] sm:$0xff]  ;;  %v7196_v28 = vld [vmem:[#allocation49_spill] sm:$0xff]  ;;  %v7198_v6 = vld [vmem:[#allocation198_spill] sm:$0xff] }
 0x387   : > { %v3000_v40 = vsel %vm823_vm9, %v7191_v53, %v2996_v39  ;;  %v2582_v59 = vsel %vm774_vm8, %v7192_v25, %v5761_v32  ;;  %v2964_v4 = vadd.f32 %v2952_v18, %v2916_v9  ;;  %v2769_v26 = vadd.f32 %v7146_v24, %v7193_v38  ;;  %v7197_v51 = vld [vmem:[#allocation9_spill] sm:$0xff] }
 0x388   : > { %v526_v60 = vpop.permute.xlu1 %525  ;;  %3047 = vrot.lane.b32.xlu0 %v3034_v14, %s3834_s10  ;;  %v2546_v43 = vadd.f32 %v2534_v23, %v2498_v1  ;;  %v2911_v21 = vadd.f32 %v7173_v10, %v2863_v37  ;;  %v2760_v39 = vsel %vm572_vm4, %v7153_v2, %v7167_v11  ;;  %v2630_v32 = vsel %vm823_vm9, %v7135_v54, %v5950_v29  ;;  %v7195_v37 = vld [vmem:[#allocation47_spill] sm:$0xff]  ;;  %v6191_v11 = vpop.permute.xlu0 %723 }
 0x389   : > { %v533_v47 = vmul.f32 %v7194_v62, %v526_v60  ;;  %v3036_v35 = vmul.f32 %v7189_v36, %v3010_v34  ;;  %v3012_v45 = vadd.f32 %v3000_v40, %v2964_v4  ;;  %v2666_v24 = vmul.f32 %v7127_v0, %v2640_v46  ;;  %v7199_v0 = vld [vmem:[#allocation117_spill] sm:$0xff]  ;;  %v7201_v34 = vld [vmem:[#allocation194_spill] sm:$0xff] }
 0x38a   : > { %2676 = vrot.lane.b32.xlu1 %v2664_v27, %s3833_s22  ;;  %v2594_v55 = vadd.f32 %v2582_v59, %v2546_v43  ;;  %v2959_v10 = vadd.f32 %v5894_v52, %v2911_v21  ;;  %v2717_v49 = vmul.f32 %v7197_v51, %v7196_v28  ;;  %v2854_v2 = vsel %vm670_vm6, %v7168_v22, %v7198_v6  ;;  %v7202_v59 = vld [vmem:[#allocation36_spill] sm:$0xff] }
 0x38b   : > { %v588_v15 = vadd.f32 %v7195_v37, %v533_v47  ;;  %v2817_v54 = vadd.f32 %v7159_v17, %v2769_v26  ;;  %v2808_v22 = vsel %vm621_vm5, %v7162_v20, %v7177_v56  ;;  %v2902_v14 = vsel %vm725_vm7, %v7172_v12, %v7201_v34 }
 0x38c   : > { %v561_v29 = vpop.permute.xlu1 %560  ;;  %3051 = vrot.lane.b32.xlu0 %v3036_v35, %s3834_s10  ;;  %v2642_v18 = vadd.f32 %v2630_v32, %v2594_v55  ;;  %v2771_v9 = vadd.f32 %v2760_v39, %v2717_v49  ;;  %v3038_v1 = vmul.f32 %v6145_v16, %v3012_v45  ;;  %v3007_v46 = vadd.f32 %v7182_v3, %v2959_v10  ;;  %v6224_v38 = vpop.permute.xlu0 %764  ;;  %v7204_v39 = vld [vmem:[#allocation28_spill] sm:$0xff]  ;;  %v7205_v45 = vld [vmem:[#allocation134_spill] sm:$0xff] }
 0x38d   : > { %v573_v52 = vsel %vm572_vm4, %v561_v29, %v7199_v0  ;;  %v637_v23 = vadd.f32 %v7200_v61, %v588_v15  ;;  %v2865_v17 = vadd.f32 %v2854_v2, %v2817_v54  ;;  %v2855_v25 = vsel %vm670_vm6, %v7174_v42, %v7181_v33  ;;  %v7203_v42 = vld [vmem:[#allocation90_spill] sm:$0xff]  ;;  %v7206_v49 = vld [vmem:[#allocation8_spill] sm:$0xff] }
 0x38e   : > { %2680 = vrot.lane.b32.xlu1 %v2666_v24, %s3833_s22  ;;  %v2668_v27 = vmul.f32 %v5984_v63, %v2642_v18  ;;  %v2950_v20 = vsel %vm774_vm8, %v7178_v13, %v7202_v59  ;;  %v2819_v12 = vadd.f32 %v2808_v22, %v2771_v9  ;;  %v2903_v63 = vsel %vm725_vm7, %v7184_v57, %v5862_v30  ;;  %v7208_v29 = vld [vmem:[#allocation6_spill] sm:$0xff] }
 0x38f   : > { %v6209_v40 = vadd.f32 %v6086_v58, %v637_v23  ;;  %v2913_v4 = vadd.f32 %v2902_v14, %v2865_v17  ;;  %v2998_v13 = vsel %vm823_vm9, %v6063_v44, %v7203_v42  ;;  %v3033_v43 = vmul.f32 %v7189_v36, %v3007_v46  ;;  %v7209_v14 = vld [vmem:[#allocation41_spill] sm:$0xff] }
 0x390   : > { %v565_v56 = vpop.permute.xlu1 %564  ;;  %3055 = vrot.lane.b32.xlu0 %v3038_v1, %s3834_s10  ;;  %v2867_v33 = vadd.f32 %v2855_v25, %v2819_v12  ;;  %v2951_v21 = vsel %vm774_vm8, %v6006_v19, %v7188_v8  ;;  %v531_v62 = vmul.f32 0.0, %v526_v60  ;;  %v532_v47 = vmul.f32 %v7197_v51, %v526_v60  ;;  %v6244_v10 = vpop.permute.xlu0 %768 }
 0x391   : > { %v574_v3 = vsel %vm572_vm4, %v7199_v0, %v565_v56  ;;  %v2961_v26 = vadd.f32 %v2950_v20, %v2913_v4  ;;  %v528_v32 = vmul.f32 0.0, %v7204_v39  ;;  %v2999_v19 = vsel %vm823_vm9, %v6100_v50, %v7191_v53 }
 0x392   : > { %2684 = vrot.lane.b32.xlu1 %v2668_v27, %s3833_s22  ;;  %v2915_v57 = vadd.f32 %v2903_v63, %v2867_v33  ;;  %v530_v6 = vmul.f32 %v7204_v39, %v7206_v49  ;;  %v529_v50 = vmul.f32 %v7204_v39, %v7208_v29 }
 0x393   : > { %v3009_v35 = vadd.f32 %v2998_v13, %v2961_v26  ;;  %v583_v15 = vadd.f32 %v573_v52, %v528_v32 }
 0x394   : > { %v569_v30 = vpop.permute.xlu1 %568  ;;  %v2963_v60 = vadd.f32 %v2951_v21, %v2915_v57  ;;  %v584_v18 = vadd.f32 %v574_v3, %v529_v50  ;;  %v773_v9 = vpop.permute.xlu0 %772 }
 0x395   : > { %v575_v55 = vsel %vm572_vm4, %v7205_v45, %v569_v30  ;;  %v576_v44 = vsel %vm572_vm4, %v569_v30, %v7195_v37  ;;  %v3035_v24 = vmul.f32 %v6145_v16, %v3009_v35  ;;  %v7207_v37 = vld [vmem:[#allocation27_spill] sm:$0xff]  ;;  %v585_v16 = vadd.f32 %v565_v56, %v530_v6 }
 0x396   : > { %3045 = vrot.lane.b32.xlu1 %v3033_v43, %s3834_s10  ;;  %v586_v8 = vadd.f32 %v575_v55, %v531_v62  ;;  %v587_v36 = vadd.f32 %v576_v44, %v532_v47  ;;  %v3011_v51 = vadd.f32 %v2999_v19, %v2963_v60  ;;  %vm2688_vm4 = vcmask 1006592  }
 0x398   : > { %v610_v28 = vpop.permute.xlu1 %609  ;;  %v3037_v54 = vmul.f32 %v6153_v7, %v3011_v51  ;;  %v814_v27 = vpop.permute.xlu0 %813 }
 0x399   : > { %v622_v2 = vsel %vm621_vm5, %v610_v28, %v7207_v37 }
 0x39a   : > { %3049 = vrot.lane.b32.xlu1 %v3035_v24, %s3834_s10  ;;  %v632_v53 = vadd.f32 %v622_v2, %v583_v15 }
 0x39c   : > { %v614_v0 = vpop.permute.xlu1 %613  ;;  %v818_v3 = vpop.permute.xlu0 %817 }
 0x39d   : > { %v623_v52 = vsel %vm621_vm5, %v7207_v37, %v614_v0  ;;  %v634_v23 = vadd.f32 %v614_v0, %v585_v16 }
 0x39e   : > { %3053 = vrot.lane.b32.xlu1 %v3037_v54, %s3834_s10  ;;  %v633_v22 = vadd.f32 %v623_v52, %v584_v18 }
 0x3a0   : > { %v618_v34 = vpop.permute.xlu1 %617  ;;  %v822_v43 = vpop.permute.xlu0 %821 }
 0x3a1   : > { %v624_v1 = vsel %vm621_vm5, %v7209_v14, %v618_v34  ;;  %v625_v17 = vsel %vm621_vm5, %v618_v34, %v7200_v61  ;;  %vm3057_vm5 = vcmask 998400  }
 0x3a2   : > { %v635_v46 = vadd.f32 %v624_v1, %v586_v8  ;;  %v636_v7 = vadd.f32 %v625_v17, %v587_v36 }
 0x3a4   : > { %v659_v25 = vpop.permute.xlu1 %658 }
 0x3a5   : > { %v671_v59 = vsel %vm670_vm6, %v659_v25, %v5992_v5 }
 0x3a6   : > { %v681_v20 = vadd.f32 %v671_v59, %v632_v53 }
 0x3a8   : > { %v663_v56 = vpop.permute.xlu1 %662 }
 0x3a9   : > { %v672_v12 = vsel %vm670_vm6, %v5992_v5, %v663_v56  ;;  %v683_v4 = vadd.f32 %v663_v56, %v634_v23 }
 0x3aa   : > { %v682_v63 = vadd.f32 %v672_v12, %v633_v22 }
 0x3ac   : > { %v667_v42 = vpop.permute.xlu1 %666 }
 0x3ad   : > { %v673_v13 = vsel %vm670_vm6, %v6034_v41, %v667_v42  ;;  %v674_v61 = vsel %vm670_vm6, %v667_v42, %v6086_v58  ;;  %v6277_v58 = vpop.permute.xlu0 %852  ;;  %vm3083_vm6 = vcmask 416768  }
 0x3ae   : > { %v684_v33 = vadd.f32 %v673_v13, %v635_v46  ;;  %v685_v26 = vadd.f32 %v674_v61, %v636_v7 }
 0x3b0   : > { %v739_v21 = vadd.f32 %v6159_v31, %v684_v33  ;;  %v714_v62 = vpop.permute.xlu1 %713 }
 0x3b1   : > { %v726_v47 = vsel %vm725_vm7, %v714_v62, %v6122_v48  ;;  %v736_v5 = vadd.f32 %v714_v62, %v681_v20  ;;  %v6284_v36 = vpop.permute.xlu0 %1213 }
 0x3b2   : > { %v788_v39 = vadd.f32 %v6244_v10, %v739_v21  ;;  %v737_v32 = vadd.f32 %v726_v47, %v682_v63 }
 0x3b4   : > { %v718_v30 = vpop.permute.xlu1 %717  ;;  %v6273_v57 = vadd.f32 %v818_v3, %v788_v39 }
 0x3b5   : > { %v727_v41 = vsel %vm725_vm7, %v6122_v48, %v718_v30  ;;  %v6290_v49 = vpop.permute.xlu0 %1217 }
 0x3b6   : > { %v738_v35 = vadd.f32 %v727_v41, %v683_v4 }
 0x3b8   : > { %v722_v45 = vpop.permute.xlu1 %721 }
 0x3b9   : > { %v728_v55 = vsel %vm725_vm7, %v6159_v31, %v722_v45  ;;  %v729_v44 = vsel %vm725_vm7, %v722_v45, %v6191_v11  ;;  %v6295_v29 = vpop.permute.xlu0 %1221  ;;  %vm3836_vm7 = vmmov 0  }
 0x3ba   : > { %v740_v19 = vadd.f32 %v728_v55, %v685_v26  ;;  %v741_v8 = vadd.f32 %v729_v44, %v6209_v40 }
 0x3bc   : > { %v763_v60 = vpop.permute.xlu1 %762 }
 0x3bd   : > { %v775_v24 = vsel %vm774_vm8, %v763_v60, %v6224_v38  ;;  %v785_v48 = vadd.f32 %v763_v60, %v736_v5  ;;  %v1583_v18 = vpop.permute.xlu0 %1582 }
 0x3be   : > { %v786_v15 = vadd.f32 %v775_v24, %v737_v32 }
 0x3c0   : > { %v767_v28 = vpop.permute.xlu1 %766 }
 0x3c1   : > { %v776_v51 = vsel %vm774_vm8, %v6224_v38, %v767_v28  ;;  %v6301_v34 = vpop.permute.xlu0 %1586 }
 0x3c2   : > { %v787_v31 = vadd.f32 %v776_v51, %v738_v35 }
 0x3c4   : > { %v771_v6 = vpop.permute.xlu1 %770 }
 0x3c5   : > { %v777_v11 = vsel %vm774_vm8, %v6244_v10, %v771_v6  ;;  %v778_v40 = vsel %vm774_vm8, %v771_v6, %v773_v9  ;;  %v1591_v46 = vpop.permute.xlu0 %1590  ;;  %vm3111_vm8 = vcmask 64512  }
 0x3c6   : > { %v789_v37 = vadd.f32 %v777_v11, %v740_v19  ;;  %v790_v2 = vadd.f32 %v778_v40, %v741_v8 }
 0x3c8   : > { %v812_v50 = vpop.permute.xlu1 %811 }
 0x3c9   : > { %v824_v53 = vsel %vm823_vm9, %v812_v50, %v814_v27  ;;  %v1941_v25 = vpop.permute.xlu0 %1940  ;;  %v834_v5 = vadd.f32 %v812_v50, %v785_v48 }
 0x3ca   : > { %v835_v54 = vadd.f32 %v824_v53, %v786_v15 }
 0x3cc   : > { %v816_v16 = vpop.permute.xlu1 %815 }
 0x3cd   : > { %v825_v38 = vsel %vm823_vm9, %v814_v27, %v816_v16  ;;  %v1945_v20 = vpop.permute.xlu0 %1944 }
 0x3ce   : > { %v836_v0 = vadd.f32 %v825_v38, %v787_v31 }
 0x3d0   : > { %v820_v52 = vpop.permute.xlu1 %819  ;;  %v861_v19 = vmul.f32 %v6277_v58, %v836_v0 }
 0x3d1   : > { %v826_v23 = vsel %vm823_vm9, %v818_v3, %v820_v52  ;;  %v827_v10 = vsel %vm823_vm9, %v820_v52, %v822_v43  ;;  %v6304_v12 = vpop.permute.xlu0 %1948 }
 0x3d2   : > { %v838_v22 = vadd.f32 %v826_v23, %v789_v37  ;;  %v839_v9 = vadd.f32 %v827_v10, %v790_v2 }
 0x3d4   : > { %v864_v14 = vmul.f32 %v6277_v58, %v839_v9  ;;  %v851_v1 = vpop.permute.xlu1 %850 }
 0x3d5   : > { %v2310_v3 = vpop.permute.xlu0 %2309  ;;  %v859_v30 = vmul.f32 %v851_v1, %v834_v5  ;;  %v855_v41 = vsel %vm854_vm0, %v851_v1, %v6277_v58  ;;  %v862_v58 = vmul.f32 %v851_v1, %v6273_v57 }
 0x3d6   : > { %v1239_v24 = vadd.f32 %v6295_v29, %v864_v14  ;;  %v860_v48 = vmul.f32 %v855_v41, %v835_v54  ;;  %v863_v11 = vmul.f32 %v855_v41, %v838_v22 }
 0x3d8   : > { %v1212_v17 = vpop.permute.xlu1 %1211 }
 0x3d9   : > { %v6306_v13 = vpop.permute.xlu0 %2313  ;;  %v1224_v32 = vsel %vm1223_vm15, %v1212_v17, %v6284_v36 }
 0x3da   : > { %v1234_v45 = vadd.f32 %v1224_v32, %v859_v30 }
 0x3dc   : > { %v1216_v7 = vpop.permute.xlu1 %1215 }
 0x3dd   : > { %v6308_v33 = vpop.permute.xlu0 %2317  ;;  %v1225_v8 = vsel %vm1223_vm15, %v6284_v36, %v1216_v7  ;;  %v1236_v28 = vadd.f32 %v1216_v7, %v861_v19 }
 0x3de   : > { %v1235_v36 = vadd.f32 %v1225_v8, %v860_v48 }
 0x3e0   : > { %v1220_v59 = vpop.permute.xlu1 %1219 }
 0x3e1   : > { %v1226_v51 = vsel %vm1223_vm15, %v6290_v49, %v1220_v59  ;;  %v1227_v50 = vsel %vm1223_vm15, %v1220_v59, %v6295_v29 }
 0x3e2   : > { %v2679_v43 = vpop.permute.xlu0 %2678  ;;  %v1237_v49 = vadd.f32 %v1226_v51, %v862_v58  ;;  %v1238_v22 = vadd.f32 %v1227_v50, %v863_v11 }
 0x3e4   : > { %v1581_v27 = vpop.permute.xlu1 %1580 }
 0x3e5   : > { %v1593_v35 = vsel %vm1592_vm1, %v1581_v27, %v1583_v18 }
 0x3e6   : > { %v6310_v47 = vpop.permute.xlu0 %2682  ;;  %v1603_v15 = vadd.f32 %v1593_v35, %v1234_v45 }
 0x3e8   : > { %v1585_v56 = vpop.permute.xlu1 %1584 }
 0x3e9   : > { %v1594_v31 = vsel %vm1592_vm1, %v1583_v18, %v1585_v56  ;;  %v1605_v53 = vadd.f32 %v1585_v56, %v1236_v28  ;;  %v1608_v18 = vadd.f32 %v1591_v46, %v1239_v24 }
 0x3ea   : > { %v6316_v55 = vpop.permute.xlu0 %2686  ;;  %v1604_v38 = vadd.f32 %v1594_v31, %v1235_v36  ;;  %v7210_v36 = vld [vmem:[#allocation4_spill] sm:$0xff] }
 0x3ec   : > { %v1589_v4 = vpop.permute.xlu1 %1588 }
 0x3ed   : > { %v1595_v57 = vsel %vm1592_vm1, %v6301_v34, %v1589_v4  ;;  %v1596_v52 = vsel %vm1592_vm1, %v1589_v4, %v1591_v46 }
 0x3ee   : > { %v1606_v34 = vadd.f32 %v1595_v57, %v1237_v49  ;;  %v1607_v27 = vadd.f32 %v1596_v52, %v1238_v22  ;;  %v3109_v52 = vld [vmem:[%s6455_s4] sm:$0x3] }
 0x3f0   : > { %v1939_v63 = vpop.permute.xlu1 %1938 }
 0x3f1   : > { %v1951_v60 = vsel %vm1950_vm2, %v1939_v63, %v1941_v25 }
 0x3f2   : > { %v1961_v40 = vadd.f32 %v1951_v60, %v1603_v15 }
 0x3f4   : > { %v1943_v42 = vpop.permute.xlu1 %1942 }
 0x3f5   : > { %v1952_v54 = vsel %vm1950_vm2, %v1941_v25, %v1943_v42  ;;  %v1963_v23 = vadd.f32 %v1943_v42, %v1605_v53 }
 0x3f6   : > { %v1962_v9 = vadd.f32 %v1952_v54, %v1604_v38  ;;  %v3384_v38 = vld [vmem:[%s6460_s9] sm:$0xff] }
 0x3f8   : > { %v1947_v61 = vpop.permute.xlu1 %1946 }
 0x3f9   : > { %v1953_v29 = vsel %vm1950_vm2, %v1945_v20, %v1947_v61  ;;  %v1954_v17 = vsel %vm1950_vm2, %v1947_v61, %v6304_v12 }
 0x3fa   : > { %v3048_v37 = vpop.permute.xlu0 %3047  ;;  %v1964_v42 = vadd.f32 %v1953_v29, %v1606_v34  ;;  %v1965_v61 = vadd.f32 %v1954_v17, %v1607_v27 }
 0x3fc   : > { %v2308_v26 = vpop.permute.xlu1 %2307 }
 0x3fd   : > { %v2320_v6 = vsel %vm2319_vm3, %v2308_v26, %v2310_v3 }
 0x3fe   : > { %v2330_v0 = vadd.f32 %v2320_v6, %v1961_v40  ;;  %v3052_v46 = vpop.permute.xlu0 %3051 }
 0x400   : > { %v2312_v21 = vpop.permute.xlu1 %2311 }
 0x401   : > { %v2321_v10 = vsel %vm2319_vm3, %v2310_v3, %v2312_v21  ;;  %v2332_v7 = vadd.f32 %v2312_v21, %v1963_v23  ;;  %v3110_v23 = vld [vmem:[%s6456_s5] sm:$0x3] }
 0x402   : > { %v2331_v56 = vadd.f32 %v2321_v10, %v1962_v9  ;;  %v3056_v35 = vpop.permute.xlu0 %3055 }
 0x404   : > { %v2316_v62 = vpop.permute.xlu1 %2315 }
 0x405   : > { %v2322_v3 = vsel %vm2319_vm3, %v6306_v13, %v2316_v62  ;;  %v2323_v20 = vsel %vm2319_vm3, %v2316_v62, %v6308_v33  ;;  %v1966_v62 = vadd.f32 %v6304_v12, %v1608_v18  ;;  %v7212_v18 = vmov 0.0  }
 0x406   : > { %v2333_v32 = vadd.f32 %v2322_v3, %v1964_v42  ;;  %v2334_v30 = vadd.f32 %v2323_v20, %v1965_v61  ;;  %3559 = vmatprep.mubr.msk.f32.mxu1 %vm3836_vm7, %v7212_v18 }
 0x407   : > { %v2335_v12 = vadd.f32 %v6308_v33, %v1966_v62 }
 0x408   : > { %v2677_v39 = vpop.permute.xlu1 %2676 }
 0x409   : > { %v2689_v16 = vsel %vm2688_vm4, %v2677_v39, %v2679_v43  ;;  %v2704_v48 = vadd.f32 %v6316_v55, %v2335_v12 }
 0x40a   : > { %v2699_v14 = vadd.f32 %v2689_v16, %v2330_v0 }
 0x40b   : > { %v6375_v15 = vadd.f32 %v3056_v35, %v2704_v48 }
 0x40c   : > { %v2681_v44 = vpop.permute.xlu1 %2680 }
 0x40d   : > { %v2690_v25 = vsel %vm2688_vm4, %v2679_v43, %v2681_v44  ;;  %v2701_v63 = vadd.f32 %v2681_v44, %v2332_v7 }
 0x40e   : > { %v2700_v26 = vadd.f32 %v2690_v25, %v2331_v56 }
 0x410   : > { %v2685_v2 = vpop.permute.xlu1 %2684 }
 0x411   : > { %v2691_v43 = vsel %vm2688_vm4, %v6310_v47, %v2685_v2  ;;  %v2692_v5 = vsel %vm2688_vm4, %v2685_v2, %v6316_v55 }
 0x412   : > { %v2702_v45 = vadd.f32 %v2691_v43, %v2333_v32  ;;  %v2703_v44 = vadd.f32 %v2692_v5, %v2334_v30 }
 0x414   : > { %v3046_v1 = vpop.permute.xlu1 %3045 }
 0x415   : > { %v3058_v59 = vsel %vm3057_vm5, %v3046_v1, %v3048_v37 }
 0x416   : > { %v6341_v4 = vadd.f32 %v3058_v59, %v2699_v14 }
 0x418   : > { %v3050_v21 = vpop.permute.xlu1 %3049  ;;  %3077 = vrot.lane.b32.xlu1 %v6341_v4, %s3835_s23 }
 0x419   : > { %v3059_v13 = vsel %vm3057_vm5, %v3048_v37, %v3050_v21  ;;  %v6354_v39 = vadd.f32 %v3050_v21, %v2701_v63  ;;  %v7211_v37 = vld [vmem:[#allocation5_spill] sm:$0xff] }
 0x41a   : > { %v6357_v41 = vadd.f32 %v3059_v13, %v2700_v26 }
 0x41c   : > { %v3054_v19 = vpop.permute.xlu1 %3053  ;;  %3079 = vrot.lane.b32.xlu0 %v6357_v41, %s3835_s23  ;;  %3081 = vrot.lane.b32.xlu1 %v6354_v39, %s3835_s23 }
 0x41d   : > { %v3060_v47 = vsel %vm3057_vm5, %v3052_v46, %v3054_v19  ;;  %v3061_v8 = vsel %vm3057_vm5, %v3054_v19, %v3056_v35  ;;  %v3214_v19 = vld [vmem:[%s6457_s6 + $0x10] sm:$0xff] }
 0x41e   : > { %v6366_v60 = vadd.f32 %v3060_v47, %v2702_v45  ;;  %v6368_v24 = vadd.f32 %v3061_v8, %v2703_v44  ;;  %v3212_v45 = vld [vmem:[%s6457_s6] sm:$0xff]  ;;  %v3213_v44 = vld [vmem:[%s6457_s6 + $0x8] sm:$0xff] }
 0x420   : > { %3093 = vrot.lane.b32.xlu0 %v6366_v60, %s3835_s23  ;;  %3095 = vrot.lane.b32.xlu1 %v6368_v24, %s3835_s23 }
 0x424   : > { %3097 = vrot.lane.b32.xlu0 %v6375_v15, %s3835_s23 }
 0x48a   : > { %v3078_v28 = vpop.permute.xlu1 %3077 }
 0x48e   : > { %v3082_v51 = vpop.permute.xlu1 %3081  ;;  %v3080_v33 = vpop.permute.xlu0 %3079 }
 0x48f   : > { %v3084_v58 = vsel %vm3083_vm6, %v3078_v28, %v3080_v33  ;;  %v3085_v55 = vsel %vm3083_vm6, %v3080_v33, %v3082_v51  ;;  %v3216_v28 = vld [vmem:[%s6458_s7 + $0x8] sm:$0xff]  ;;  %v3217_v51 = vld [vmem:[%s6458_s7 + $0x10] sm:$0xff]  ;;  %v3215_v33 = vld [vmem:[%s6458_s7] sm:$0xff] }
 0x490   : > { %v3088_v40 = vadd.f32 %v3084_v58, %v7210_v36  ;;  %v3089_v2 = vadd.f32 %v3085_v55, %v7211_v37 }
 0x492   : > { %v3096_v31 = vpop.permute.xlu1 %3095  ;;  %v3094_v6 = vpop.permute.xlu0 %3093 }
 0x493   : > { %v3099_v11 = vsel %vm3083_vm6, %v3094_v6, %v3096_v31 }
 0x494   : > { %v3103_v54 = vadd.f32 %v3099_v11, %v3088_v40 }
 0x496   : > { %v3098_v50 = vpop.permute.xlu0 %3097 }
 0x497   : > { %v3100_v53 = vsel %vm3083_vm6, %v3096_v31, %v3098_v50 }
 0x498   : > { %v3104_v16 = vadd.f32 %v3100_v53, %v3089_v2 }
 0x49a   : > { %v3105_v49 = vadd.f32 %v3104_v16, %v3103_v54 }
 0x49c   : > { %3106 = vadd.xlane.f32.xlu1 %v3105_v49 }
 0x4ad   : > { %3387 = vperm.xlu1 %3739, %v3384_v38  }
 0x529   : > { %v3107_v0 = vpop.xlane.xlu1 %3106 }
 0x52a   : > { %v3108_v57 = vmul.f32 0.00390625, %v3107_v0 }
 0x52c   : > { %3558 = vmatpush3.msra.mxu1 %v3108_v57 }
 0x52d   : > { %3560 = vmatmul.mubr.msk.f32.vlgmr.msra.gmra.mrb[0].mxu1 %vm3111_vm8, %v3109_v52  ;;  %3562 = vmatprep.subr.mxu1 %v7212_v18 }
 0x52e   : > { %3564 = vmatprep.mubr.msk.f32.mxu1 %vm3836_vm7, %v7212_v18 }
 0x600   : > { %v3181_v10 = vpop.f32.mrb[0].mxu1 }
 0x601   : > { %v3182_v22 = vadd.f32 %v3181_v10, %v3110_v23  ;;  %v3561_v9 = vpop.f32.mrb[1].mxu1 }
 0x603   : > { %v3186_v29 = vmul.f32 0.70710677, %v3182_v22  ;;  %v3185_v32 = vmul.f32 0.5, %v3182_v22 }
 0x605   : > { %v3187_v14 = vand.u32 2147483647, %v3186_v29  ;;  %vm3207_vm9 = vcmp.ge.f32.partialorder %v3186_v29, 0.0 }
 0x607   : > { %v3188_v1 = vmul.f32 0.3275911, %v3187_v14  ;;  %v3201_v7 = vsub.f32 0.0, %v3187_v14 }
 0x609   : > { %v3189_v17 = vadd.f32 1.0, %v3188_v1  ;;  %v3202_v59 = vmul.f32 %v3201_v7, %v3187_v14 }
 0x60b   : > { %3745 = vrcp.f32 %v3189_v17  ;;  %v3203_v46 = vmul.f32 1.442695, %v3202_v59 }
 0x60d   : > { %3747 = vpow2.f32 %v3203_v46 }
 0x615   : > { %v3746_v25 = vpop.eup %3745 }
 0x616   : > { %v3192_v34 = vmul.f32 1.0614054, %v3746_v25 }
 0x617   : > { %v3748_v21 = vpop.eup %3747 }
 0x618   : > { %v3193_v27 = vadd.f32 -1.4531521, %v3192_v34 }
 0x61a   : > { %v3194_v56 = vmul.f32 %v3746_v25, %v3193_v27 }
 0x61c   : > { %v3195_v3 = vadd.f32 1.4214138, %v3194_v56 }
 0x61e   : > { %v3196_v20 = vmul.f32 %v3746_v25, %v3195_v3 }
 0x620   : > { %v3197_v63 = vadd.f32 -0.28449672, %v3196_v20 }
 0x622   : > { %v3198_v42 = vmul.f32 %v3746_v25, %v3197_v63 }
 0x624   : > { %v3199_v61 = vadd.f32 0.2548296, %v3198_v42 }
 0x626   : > { %v3200_v26 = vmul.f32 %v3746_v25, %v3199_v61 }
 0x628   : > { %v3205_v43 = vmul.f32 %v3748_v21, %v3200_v26 }
 0x62a   : > { %v3206_v5 = vsub.f32 1.0, %v3205_v43 }
 0x62c   : > { %v3208_v13 = vsub.f32 0.0, %v3206_v5 }
 0x62e   : > { %v3209_v62 = vsel %vm3207_vm9, %v3206_v5, %v3208_v13  ;;  %v3383_v13 = vld [vmem:[%s6459_s8] sm:$0xff] }
 0x62f   : > { %v3210_v30 = vadd.f32 1.0, %v3209_v62 }
 0x631   : > { %v3211_v35 = vmul.f32 %v3210_v30, %v3185_v32 }
 0x633   : > { %3563 = vmatpush3.msk.msra.mxu1 %vm3228_vm10, %v3211_v35 }
 0x634   : > { %3565 = vmatmul.mubr.msk.f32.vlgmr.msra.gmra.mrb[2].mxu1 %vm3218_vm11, %v3212_v45 }
 0x635   : > { %3567 = vmatprep.mubr.msk.f32.mxu1 %vm3836_vm7, %v7212_v18 }
 0x638   : > { %3568 = vmatmul.mubr.msk.f32.gmra.mrb[4].mxu1 %vm3218_vm11, %v3213_v44 }
 0x639   : > { %3570 = vmatprep.mubr.msk.f32.mxu1 %vm3836_vm7, %v7212_v18 }
 0x63c   : > { %3571 = vmatmul.mubr.msk.f32.gmra.mrb[6].mxu1 %vm3218_vm11, %v3214_v19 }
 0x707   : > { %v3298_v47 = vpop.f32.mrb[2].mxu1 }
 0x708   : > { %v3566_v8 = vpop.f32.mrb[3].mxu1  ;;  %v3299_v11 = vadd.f32 %v3298_v47, %v3215_v33 }
 0x70b   : > { %v3303_v12 = vpop.f32.mrb[4].mxu1 }
 0x70c   : > { %v3569_v48 = vpop.f32.mrb[5].mxu1  ;;  %v3304_v6 = vadd.f32 %v3303_v12, %v3216_v28 }
 0x70f   : > { %v3308_v31 = vpop.f32.mrb[6].mxu1 }
 0x710   : > { %v3309_v58 = vadd.f32 %v3308_v31, %v3217_v51  ;;  %v3572_v55 = vpop.f32.mrb[7].mxu1 }
 0x712   : > { %v3312_v40 = vmax.f32 %v3304_v6, %v3309_v58 }
 0x714   : > { %v3313_v2 = vmax.f32 %v3299_v11, %v3312_v40 }
 0x716   : > { %v3314_v50 = vsub.f32 %v3299_v11, %v3313_v2  ;;  %v3317_v53 = vsub.f32 %v3304_v6, %v3313_v2  ;;  %v3320_v54 = vsub.f32 %v3309_v58, %v3313_v2 }
 0x718   : > { %v3315_v16 = vmul.f32 1.442695, %v3314_v50  ;;  %v3318_v49 = vmul.f32 1.442695, %v3317_v53  ;;  %v3321_v38 = vmul.f32 1.442695, %v3320_v54 }
 0x71a   : > { %3749 = vpow2.f32 %v3315_v16 }
 0x71b   : > { %3751 = vpow2.f32 %v3318_v49 }
 0x71c   : > { %3753 = vpow2.f32 %v3321_v38 }
 0x724   : > { %v3750_v18 = vpop.eup %3749 }
 0x725   : > { %v3752_v0 = vpop.eup %3751 }
 0x726   : > { %v3323_v57 = vadd.f32 %v3752_v0, %v3750_v18  ;;  %v3754_v52 = vpop.eup %3753 }
 0x728   : > { %v3324_v23 = vadd.f32 %v3754_v52, %v3323_v57 }
 0x72a   : > { %3755 = vrcp.f32 %v3324_v23 }
 0x734   : > { %v3756_v10 = vpop.eup %3755 }
 0x735   : > { %v3335_v22 = vmul.f32 %v3756_v10, %v3752_v0  ;;  %v3359_v9 = vmul.f32 %v3756_v10, %v3754_v52  ;;  %v3327_v29 = vmul.f32 %v3756_v10, %v3750_v18 }
 0x737   : > { %3338 = vperm.xlu0 %3738, %v3335_v22  }
 0x73b   : > { %3362 = vperm.xlu0 %3738, %v3359_v9  }
 0x73f   : > { %3330 = vperm.xlu0 %3738, %v3327_v29  }
 0x7b6   : > { %v3339_v14 = vpop.permute.xlu0 %3338 }
 0x7b7   : > { %v3342_v1 = vmul.f32 %v3339_v14, %v6357_v41  ;;  %v3343_v17 = vmul.f32 %v3339_v14, %v6354_v39  ;;  %v3341_v7 = vmul.f32 %v3339_v14, %v6341_v4 }
 0x7b9   : > { %3349 = vrot.lane.b32.xlu0 %v3342_v1, %s3835_s23 }
 0x7ba   : > { %v3363_v25 = vpop.permute.xlu0 %3362 }
 0x7bb   : > { %v3366_v59 = vmul.f32 %v3363_v25, %v6368_v24  ;;  %v3367_v34 = vmul.f32 %v3363_v25, %v6375_v15  ;;  %v3365_v41 = vmul.f32 %v3363_v25, %v6366_v60 }
 0x7bd   : > { %3351 = vrot.lane.b32.xlu0 %v3343_v17, %s3835_s23 }
 0x7be   : > { %v3331_v39 = vpop.permute.xlu0 %3330 }
 0x7bf   : > { %v3334_v24 = vmul.f32 %v3331_v39, %v7211_v37  ;;  %v3333_v60 = vmul.f32 %v3331_v39, %v7210_v36  ;;  %v3388_v37 = vpop.permute.xlu1 %3387 }
 0x7c1   : > { %3347 = vrot.lane.b32.xlu0 %v3341_v7, %s3835_s23 }
 0x7c5   : > { %3373 = vrot.lane.b32.xlu0 %v3366_v59, %s3835_s23 }
 0x7c9   : > { %3375 = vrot.lane.b32.xlu0 %v3367_v34, %s3835_s23 }
 0x7cd   : > { %3371 = vrot.lane.b32.xlu0 %v3365_v41, %s3835_s23 }
 0x82b   : > { %v3350_v27 = vpop.permute.xlu0 %3349 }
 0x82f   : > { %v3352_v46 = vpop.permute.xlu0 %3351 }
 0x830   : > { %v3354_v3 = vsel %vm3083_vm6, %v3350_v27, %v3352_v46 }
 0x831   : > { %v3358_v20 = vadd.f32 %v3354_v3, %v3334_v24 }
 0x833   : > { %v3348_v56 = vpop.permute.xlu0 %3347 }
 0x834   : > { %v3353_v15 = vsel %vm3083_vm6, %v3348_v56, %v3350_v27 }
 0x835   : > { %v3357_v26 = vadd.f32 %v3353_v15, %v3333_v60 }
 0x837   : > { %v3374_v4 = vpop.permute.xlu0 %3373 }
 0x83b   : > { %v3376_v63 = vpop.permute.xlu0 %3375 }
 0x83c   : > { %v3378_v42 = vsel %vm3083_vm6, %v3374_v4, %v3376_v63 }
 0x83d   : > { %v3382_v61 = vadd.f32 %v3378_v42, %v3358_v20 }
 0x83f   : > { %3393 = vmatprep.subr.mxu0 %v3382_v61  ;;  %v3372_v21 = vpop.permute.xlu0 %3371 }
 0x840   : > { %v3377_v43 = vsel %vm3083_vm6, %v3372_v21, %v3374_v4 }
 0x841   : > { %v3381_v5 = vadd.f32 %v3377_v43, %v3357_v26 }
 0x843   : > { %3394 = vmatpush1.msra.mxu0 %v3381_v5 }
 0x844   : > { %3546 = vmatmul.mubr.msk.f32.vlgmr.msra.gmra.mrb[6].mxu0 %vm3111_vm8, %v3383_v13 }
 0x917   : > { %v3459_v36 = vpop.f32.mrb[6].mxu0 }
 0x918   : > { %v3460_v62 = vadd.f32 %v3459_v36, %v3388_v37  ;;  %v3461_v32 = vpop.f32.mrb[7].mxu0 }
 0x919   : > { %v3462_v30 = vadd.f32 %v3461_v32, %v3388_v37 }
 0x91a   : > { %3464 = vst [vmem:[%s387_s29] sm:$0xff] %v3460_v62 }
 0x91b   : > { %3465 = vst [vmem:[%s387_s29 + $0x8] sm:$0xff] %v3462_v30 }
 0x91c PF: > { %s22_s19 = sadd.s32 1, %s3765_s19  }
 0x91d   : > { %p19_p4 = scmp.ge.s32.totalorder %s22_s19, 4  }
 0x91f   :  { %21 = sbr.rel (!%p19_p4) target bundleno = 2 (0x2), region = 100 }

</bundles_post_ra>
